<compile_context>
chip_gen: v7x
topology: tpu7x:2x2x1
jax: 0.10.0
libtpu: 0.0.40
codegen_flags: <defaults>
</compile_context>

<pallas_src>
import jax
import jax.numpy as jnp
import numpy as np
from jax.experimental import pallas as pl
from jax.experimental.pallas import tpu as pltpu


# --------------------------------------------------------------------------- #
# Kernel
# --------------------------------------------------------------------------- #
def _tpa_kernel(z_ref, t_ref, mask_ref, wq_ref, wkv_ref, seg_ref, wo_ref, bo_ref,
                out_ref):
    """One tile of TM pair positions: pointwise attention over NT templates."""
    nt, tm, dt = t_ref.shape
    hdh2 = wkv_ref.shape[1]          # 2 * num_heads * d_hid  (K half || V half)

    # Q projection.  1/sqrt(d_hid) is folded into Wq on the host; the V-half
    # columns of Wq are zero, so q's V half is exactly 0.
    q = jnp.dot(z_ref[...], wq_ref[...], preferred_element_type=jnp.float32)   # [TM, 2hdh]

    # Fused K||V projection for all templates in a single MXU pass.  The result
    # is never lane-sliced: all downstream ops consume the full 2*hdh width.
    t2 = t_ref[...].reshape(nt * tm, dt)
    kv = jnp.dot(t2, wkv_ref[...], preferred_element_type=jnp.float32)         # [NT*TM, 2hdh]
    kv3 = kv.reshape(nt, tm, hdh2)

    # Per-head logits, produced already broadcast over each head's d_hid lanes
    # of the V half (seg maps K-half rows -> same-head V-half columns).  All
    # softmax intermediates therefore stay 2*hdh lanes wide -- no [TM, H]
    # lane-narrow temporaries padded to 128 lanes.
    qk = (q[None, :, :] * kv3).reshape(nt * tm, hdh2)
    logits = jnp.dot(qk, seg_ref[...], preferred_element_type=jnp.float32)
    logits = logits.reshape(nt, tm, hdh2)
    # TODO(synk): if the vmatmul-push slot binds on v7x, cast `qk`/`seg` to bf16
    # here to cut the f32 multi-pass MXU cost (seg is exact 0/1 in bf16).

    # Softmax over the template axis.  The template axis lives in row blocks,
    # so the reductions below are plain elementwise ops; mask_ref holds the
    # additive 0 / -inf per template (SMEM scalars).
    mx = logits[0] + mask_ref[0]
    for n in range(1, nt):
        mx = jnp.maximum(mx, logits[n] + mask_ref[n])
    denom = jnp.zeros_like(mx)
    o = jnp.zeros_like(mx)
    for n in range(nt):
        p = jnp.exp(logits[n] + mask_ref[n] - mx)   # per-head weight, broadcast over d_hid
        denom = denom + p
        o = o + p * kv3[n]                          # V half: softmax(QK)·V ; K half: garbage
    o = o * pl.reciprocal(denom, approx=True)       # EUP slot

    # Output projection.  Wo's K-half rows are zero, discarding the garbage K
    # half of `o`; only the V half (the attention output) survives.
    out = jnp.dot(o, wo_ref[...], preferred_element_type=jnp.float32) + bo_ref[...]
    out_ref[...] = out.astype(out_ref.dtype)


# --------------------------------------------------------------------------- #
# Host-side helpers
# --------------------------------------------------------------------------- #
def _head_broadcast_matrix(num_heads, d_hid):
    """[2hdh, 2hdh] 0/1 matrix: K-half row (h, d) -> every V-half column of head h."""
    hdh = num_heads * d_hid
    hdh2 = 2 * hdh
    r = np.arange(hdh2)
    c = np.arange(hdh2)
    is_k_row = (r < hdh)[:, None]
    is_v_col = (c >= hdh)[None, :]
    same_head = (r[:, None] // d_hid) == ((c[None, :] - hdh) // d_hid)
    return jnp.asarray((is_k_row & is_v_col & same_head).astype(np.float32))


def _choose_tile_m(m_total, tm_max):
    """Pick the M tile; returns (tm, pad) with (m_total + pad) % tm == 0.

    Prefers tiles that are multiples of 8 (sublane) and divide M, as large as
    possible but <= tm_max, with >= 2 grid steps for large problems so both
    v7x TensorCores are fed via the 'parallel' grid axis.
    """
    if m_total <= tm_max and m_total < 1024:
        pad = ((-m_total) % 8) if m_total > 8 else 0      # single (possibly padded) tile
        return m_total + pad, pad
    upper = min(tm_max, max(8, m_total // 2))             # >= 2 steps for v7x megacore
    upper -= upper % 8
    for cand in range(upper, 7, -8):
        if m_total % cand == 0:
            return cand, 0
    # No aligned divisor: minimal padding for the same number of grid steps.
    steps = -(-m_total // upper)
    tm = (-(-(-(-m_total // steps)) // 8)) * 8            # round_up(ceil(M/steps), 8)
    pad = steps * tm - m_total
    return tm, pad


def _vmem_limit_bytes(nt, tm, d_t, d_pair, hdh2, t_bytes, z_bytes):
    """Right-sized scoped-VMEM request (leave headroom on 64 MiB v7x parts)."""
    # Double-buffered pipeline copies of the grid-tiled operands (t, z, out).
    tiles = 2 * (nt * tm * d_t * t_bytes + 2 * tm * d_pair * z_bytes)
    # Resident weight inputs (their double-buffer slots still get allocated).
    weights = 2 * 4 * (d_pair * hdh2 + d_t * hdh2 + hdh2 * hdh2 + hdh2 * d_pair + d_pair)
    # f32 in-kernel temporaries: kv + qk + logits (3 x [NT*TM, 2hdh]) plus
    # q / mx / denom / p / o and the f32 output tile.
    temps = 4 * (3 * nt * tm * hdh2 + 6 * tm * hdh2 + 2 * tm * d_pair)
    est = int(1.3 * (tiles + weights + temps))
    try:
        cap = pltpu.get_tpu_info().vmem_capacity_bytes    # 64 MiB v7x, 128 MiB v5e/v6e
    except Exception:
        cap = 64 * 1024 * 1024
    return max(32 * 1024 * 1024, min(est, int(0.85 * cap)))


# --------------------------------------------------------------------------- #
# Public wrapper
# --------------------------------------------------------------------------- #
def template_pointwise_attention(t, z, template_mask, params, *, inf=1e9,
                                 num_heads=4, d_hid=8, tm_max=2048,
                                 kv_dtype=jnp.bfloat16):
    """JAX wrapper reproducing TemplatePointwiseAttention.forward (chunk_size=None)."""
    nt, n_res, _, d_t = t.shape
    d_pair = z.shape[-1]
    hdh = num_heads * d_hid
    hdh2 = 2 * hdh
    m_total = n_res * n_res

    tm, pad = _choose_tile_m(m_total, tm_max)
    m_padded = m_total + pad

    # Native-layout t: only a free reshape on the host (no HBM transpose of the
    # largest tensor).  t and Wk||Wv are streamed in kv_dtype (bf16 by default)
    # to halve the dominant HBM stream; the MXU accumulates in f32.
    t_flat = t.reshape(nt, m_total, d_t).astype(kv_dtype)
    z_flat = z.reshape(m_total, d_pair)
    if pad:
        # TODO(synk): the pad copies t through HBM once; only hit when N_res^2
        # has no sublane-aligned divisor <= tm_max.
        t_flat = jnp.pad(t_flat, ((0, 0), (0, pad), (0, 0)))
        z_flat = jnp.pad(z_flat, ((0, pad), (0, 0)))

    # gen_attn_mask: 0 where mask != 0, -inf where mask == 0 (NT scalars -> SMEM).
    mask_add = jnp.where(template_mask == 0, -inf, 0.0).astype(jnp.float32)

    f32 = jnp.float32
    norm = d_hid ** -0.5
    # Wq: fold 1/sqrt(d_hid); zero V-half columns so q's V half is exactly 0.
    wq_pad = jnp.concatenate(
        [params["wq"].astype(f32) * norm, jnp.zeros((d_pair, hdh), f32)],
        axis=1).astype(z.dtype)
    # Fused K||V weight streamed in kv_dtype.
    wkv = jnp.concatenate([params["wk"], params["wv"]], axis=1).astype(kv_dtype)
    # Wo padded with zero rows for the K half (discards the garbage K half of o).
    wo_pad = jnp.concatenate(
        [jnp.zeros((hdh, d_pair), f32), params["wo"].astype(f32)], axis=0)
    bo = params["bo"].astype(f32).reshape(1, d_pair)
    seg = _head_broadcast_matrix(num_heads, d_hid)        # [2hdh, 2hdh] constant

    grid = (m_padded // tm,)
    vmem_limit = _vmem_limit_bytes(nt, tm, d_t, d_pair, hdh2,
                                   jnp.dtype(kv_dtype).itemsize,
                                   jnp.dtype(z.dtype).itemsize)

    # TODO(synk): for d_pair < 128 a lane-dense output slab would avoid masked
    # partial stores; production Uni-Fold uses d_pair = 128 so the natural
    # layout is kept.  If profiles show exposed DMA waits on the t stream,
    # switch its BlockSpec to pipeline_mode=pl.Buffered(3).
    out_flat = pl.pallas_call(
        _tpa_kernel,
        out_shape=jax.ShapeDtypeStruct((m_padded, d_pair), z.dtype),
        grid_spec=pltpu.PrefetchScalarGridSpec(
            num_scalar_prefetch=0,
            grid=grid,
            in_specs=[
                pl.BlockSpec((tm, d_pair), lambda i: (i, 0)),          # z tile
                pl.BlockSpec((nt, tm, d_t), lambda i: (0, i, 0)),      # t tile (native layout)
                pl.BlockSpec(memory_space=pltpu.MemorySpace.SMEM),     # template mask (NT scalars)
                pl.BlockSpec((d_pair, hdh2), lambda i: (0, 0)),        # Wq (scaled, V-half zero)
                pl.BlockSpec((d_t, hdh2), lambda i: (0, 0)),           # Wk || Wv
                pl.BlockSpec((hdh2, hdh2), lambda i: (0, 0)),          # head-broadcast matrix
                pl.BlockSpec((hdh2, d_pair), lambda i: (0, 0)),        # Wo (K-half rows zero)
                pl.BlockSpec((1, d_pair), lambda i: (0, 0)),           # bo
            ],
            out_specs=pl.BlockSpec((tm, d_pair), lambda i: (i, 0)),
        ),
        compiler_params=pltpu.CompilerParams(
            dimension_semantics=("parallel",),
            vmem_limit_bytes=vmem_limit),
    )(z_flat, t_flat, mask_add, wq_pad, wkv, seg, wo_pad, bo)

    if pad:
        out_flat = out_flat[:m_total]
    # NOTE: when every template is masked the result is the uniform average of
    # the masked templates' V (matches the reference softmax); Uni-Fold call
    # sites gate the result by (sum(template_mask) > 0) outside this module.
    return out_flat.reshape(n_res, n_res, d_pair)


# --------------------------------------------------------------------------- #
# Pure-JAX reference (transcription of the PyTorch forward) for validation
# --------------------------------------------------------------------------- #
def reference_forward(t, z, template_mask, params, *, inf=1e9, num_heads=4, d_hid=8):
    nt, n_res, _, d_t = t.shape
    norm = d_hid ** -0.5
    wq, wk, wv, wo, bo = (params["wq"], params["wk"], params["wv"],
                          params["wo"], params["bo"])

    mask = jnp.where(template_mask == 0, -inf, 0.0)           # [NT]
    mask = mask[None, None, None, None, :]                    # [...,1,1,1,1,NT]

    zq = z[..., None, :]                                      # [N,N,1,d_pair]
    tp = jnp.transpose(t, (1, 2, 0, 3))                       # [N,N,NT,d_t]

    q = jnp.einsum("nmqc,ch->nmqh", zq, wq) * norm            # [N,N,1,H*dh]
    k = jnp.einsum("nmtc,ch->nmth", tp, wk)                   # [N,N,NT,H*dh]
    v = jnp.einsum("nmtc,ch->nmth", tp, wv)

    q = q.reshape(n_res, n_res, 1, num_heads, d_hid).transpose(0, 1, 3, 2, 4)
    k = k.reshape(n_res, n_res, nt, num_heads, d_hid).transpose(0, 1, 3, 2, 4)
    v = v.reshape(n_res, n_res, nt, num_heads, d_hid).transpose(0, 1, 3, 2, 4)

    logits = jnp.einsum("nmhqd,nmhtd->nmhqt", q, k) + mask    # [N,N,H,1,NT]
    p = jax.nn.softmax(logits, axis=-1)
    o = jnp.einsum("nmhqt,nmhtd->nmhqd", p, v)                # [N,N,H,1,dh]
    o = o.transpose(0, 1, 3, 2, 4).reshape(n_res, n_res, 1, num_heads * d_hid)
    out = jnp.einsum("nmqh,hc->nmqc", o, wo) + bo
    return out[..., 0, :]


if __name__ == "__main__":
    # Small, module-consistent shapes.
    N_TEMPL, N_RES = 4, 16
    D_TEMPLATE, D_PAIR, D_HID, NUM_HEADS = 16, 32, 8, 4
    INF = 1e9

    key = jax.random.PRNGKey(0)
    k_t, k_z, k_wq, k_wk, k_wv, k_wo, k_bo = jax.random.split(key, 7)

    t = jax.random.normal(k_t, (N_TEMPL, N_RES, N_RES, D_TEMPLATE), jnp.float32)
    z = jax.random.normal(k_z, (N_RES, N_RES, D_PAIR), jnp.float32)
    # Mask out the last template to exercise the -inf masking path.
    template_mask = jnp.array([1.0, 1.0, 1.0, 0.0], jnp.float32)

    # Deterministic synthetic weights (Attention(d_pair, d_templ, d_templ, d_hid, H, gating=False)).
    params = {
        "wq": 0.1 * jax.random.normal(k_wq, (D_PAIR, NUM_HEADS * D_HID), jnp.float32),
        "wk": 0.1 * jax.random.normal(k_wk, (D_TEMPLATE, NUM_HEADS * D_HID), jnp.float32),
        "wv": 0.1 * jax.random.normal(k_wv, (D_TEMPLATE, NUM_HEADS * D_HID), jnp.float32),
        "wo": 0.1 * jax.random.normal(k_wo, (NUM_HEADS * D_HID, D_PAIR), jnp.float32),
        "bo": 0.1 * jax.random.normal(k_bo, (D_PAIR,), jnp.float32),
    }

    out = template_pointwise_attention(t, z, template_mask, params,
                                       inf=INF, num_heads=NUM_HEADS, d_hid=D_HID)
    out = jax.block_until_ready(out)

    # The kernel streams t / Wk / Wv in bf16; give the reference the same
    # bf16-quantized values so the comparison isolates kernel numerics.
    q16 = lambda a: a.astype(jnp.bfloat16).astype(jnp.float32)
    params_ref = dict(params, wk=q16(params["wk"]), wv=q16(params["wv"]))
    ref = reference_forward(q16(t), z, template_mask, params_ref,
                            inf=INF, num_heads=NUM_HEADS, d_hid=D_HID)
    ref = jax.block_until_ready(ref)

    # Tolerance loosened slightly for the approx (EUP) reciprocal in the softmax.
    np.testing.assert_allclose(np.asarray(out), np.asarray(ref),
                               rtol=2e-3, atol=2e-3)
    print("KERNEL_OK")
</pallas_src>

<mosaic_0001>
module attributes {stable_mosaic.version = 11 : i64} {
  func.func @_tpa_kernel(%arg0: i32, %arg1: memref<256x32xf32, #tpu.memory_space<vmem>>, %arg2: memref<4x256x16xbf16, #tpu.memory_space<vmem>>, %arg3: memref<4xf32, #tpu.memory_space<smem>>, %arg4: memref<32x64xf32, #tpu.memory_space<vmem>>, %arg5: memref<16x64xbf16, #tpu.memory_space<vmem>>, %arg6: memref<64x64xf32, #tpu.memory_space<vmem>>, %arg7: memref<64x32xf32, #tpu.memory_space<vmem>>, %arg8: memref<1x32xf32, #tpu.memory_space<vmem>>, %arg9: memref<256x32xf32, #tpu.memory_space<vmem>>) attributes {dimension_semantics = [#tpu.dimension_semantics<parallel>], iteration_bounds = array<i64: 1>, scalar_prefetch = 0 : i64, scratch_operands = 0 : i64, tpu.core_type = #tpu.core_type<tc>, window_params = [{transform_indices = @transform_0, window_bounds = array<i64: 256, 32>}, {transform_indices = @transform_1, window_bounds = array<i64: 4, 256, 16>}, {transform_indices = @transform_2, window_bounds = array<i64: 4>}, {pipeline_mode = #tpu.pipeline_mode<synchronous>, transform_indices = @transform_3, window_bounds = array<i64: 32, 64>}, {pipeline_mode = #tpu.pipeline_mode<synchronous>, transform_indices = @transform_4, window_bounds = array<i64: 16, 64>}, {pipeline_mode = #tpu.pipeline_mode<synchronous>, transform_indices = @transform_5, window_bounds = array<i64: 64, 64>}, {pipeline_mode = #tpu.pipeline_mode<synchronous>, transform_indices = @transform_6, window_bounds = array<i64: 64, 32>}, {pipeline_mode = #tpu.pipeline_mode<synchronous>, transform_indices = @transform_7, window_bounds = array<i64: 1, 32>}, {transform_indices = @transform_8, window_bounds = array<i64: 256, 32>}]} {
    %c0 = arith.constant 0 : index
    %c0_0 = arith.constant 0 : index
    %0 = vector.load %arg1[%c0, %c0_0] : memref<256x32xf32, #tpu.memory_space<vmem>>, vector<256x32xf32>
    %c0_1 = arith.constant 0 : index
    %c0_2 = arith.constant 0 : index
    %1 = vector.load %arg4[%c0_1, %c0_2] : memref<32x64xf32, #tpu.memory_space<vmem>>, vector<32x64xf32>
    %cst = arith.constant dense<0.000000e+00> : vector<256x64xf32>
    %2 = tpu.matmul %0, %1, %cst {dimension_numbers = #tpu.dot_dimension_numbers<[1], [0], [0], [1], [0, 0, 1, 1], [], []>} : vector<256x32xf32>, vector<32x64xf32>, vector<256x64xf32> -> vector<256x64xf32>
    %c0_3 = arith.constant 0 : index
    %c0_4 = arith.constant 0 : index
    %c0_5 = arith.constant 0 : index
    %3 = vector.load %arg2[%c0_3, %c0_4, %c0_5] : memref<4x256x16xbf16, #tpu.memory_space<vmem>>, vector<4x256x16xbf16>
    %4 = vector.shape_cast %3 : vector<4x256x16xbf16> to vector<1024x16xbf16>
    %c0_6 = arith.constant 0 : index
    %c0_7 = arith.constant 0 : index
    %5 = vector.load %arg5[%c0_6, %c0_7] : memref<16x64xbf16, #tpu.memory_space<vmem>>, vector<16x64xbf16>
    %cst_8 = arith.constant dense<0.000000e+00> : vector<1024x64xf32>
    %6 = tpu.matmul %4, %5, %cst_8 {dimension_numbers = #tpu.dot_dimension_numbers<[1], [0], [0], [1], [0, 0, 1, 1], [], []>} : vector<1024x16xbf16>, vector<16x64xbf16>, vector<1024x64xf32> -> vector<1024x64xf32>
    %7 = vector.shape_cast %6 : vector<1024x64xf32> to vector<4x256x64xf32>
    %8 = vector.shape_cast %2 : vector<256x64xf32> to vector<1x256x64xf32>
    %9 = vector.broadcast %8 : vector<1x256x64xf32> to vector<4x256x64xf32>
    %10 = arith.mulf %9, %7 : vector<4x256x64xf32>
    %11 = vector.shape_cast %10 : vector<4x256x64xf32> to vector<1024x64xf32>
    %c0_9 = arith.constant 0 : index
    %c0_10 = arith.constant 0 : index
    %12 = vector.load %arg6[%c0_9, %c0_10] : memref<64x64xf32, #tpu.memory_space<vmem>>, vector<64x64xf32>
    %cst_11 = arith.constant dense<0.000000e+00> : vector<1024x64xf32>
    %13 = tpu.matmul %11, %12, %cst_11 {dimension_numbers = #tpu.dot_dimension_numbers<[1], [0], [0], [1], [0, 0, 1, 1], [], []>} : vector<1024x64xf32>, vector<64x64xf32>, vector<1024x64xf32> -> vector<1024x64xf32>
    %14 = vector.shape_cast %13 : vector<1024x64xf32> to vector<4x256x64xf32>
    %15 = vector.extract_strided_slice %14 {offsets = [0, 0, 0], sizes = [1, 256, 64], strides = [1, 1, 1]} : vector<4x256x64xf32> to vector<1x256x64xf32>
    %16 = vector.shape_cast %15 : vector<1x256x64xf32> to vector<256x64xf32>
    %c0_12 = arith.constant 0 : index
    %17 = memref.load %arg3[%c0_12] : memref<4xf32, #tpu.memory_space<smem>>
    %18 = vector.broadcast %17 : f32 to vector<256x64xf32>
    %19 = arith.addf %16, %18 : vector<256x64xf32>
    %20 = vector.extract_strided_slice %14 {offsets = [1, 0, 0], sizes = [1, 256, 64], strides = [1, 1, 1]} : vector<4x256x64xf32> to vector<1x256x64xf32>
    %21 = vector.shape_cast %20 : vector<1x256x64xf32> to vector<256x64xf32>
    %c1 = arith.constant 1 : index
    %22 = memref.load %arg3[%c1] : memref<4xf32, #tpu.memory_space<smem>>
    %23 = vector.broadcast %22 : f32 to vector<256x64xf32>
    %24 = arith.addf %21, %23 : vector<256x64xf32>
    %25 = arith.maximumf %19, %24 : vector<256x64xf32>
    %26 = vector.extract_strided_slice %14 {offsets = [2, 0, 0], sizes = [1, 256, 64], strides = [1, 1, 1]} : vector<4x256x64xf32> to vector<1x256x64xf32>
    %27 = vector.shape_cast %26 : vector<1x256x64xf32> to vector<256x64xf32>
    %c2 = arith.constant 2 : index
    %28 = memref.load %arg3[%c2] : memref<4xf32, #tpu.memory_space<smem>>
    %29 = vector.broadcast %28 : f32 to vector<256x64xf32>
    %30 = arith.addf %27, %29 : vector<256x64xf32>
    %31 = arith.maximumf %25, %30 : vector<256x64xf32>
    %32 = vector.extract_strided_slice %14 {offsets = [3, 0, 0], sizes = [1, 256, 64], strides = [1, 1, 1]} : vector<4x256x64xf32> to vector<1x256x64xf32>
    %33 = vector.shape_cast %32 : vector<1x256x64xf32> to vector<256x64xf32>
    %c3 = arith.constant 3 : index
    %34 = memref.load %arg3[%c3] : memref<4xf32, #tpu.memory_space<smem>>
    %35 = vector.broadcast %34 : f32 to vector<256x64xf32>
    %36 = arith.addf %33, %35 : vector<256x64xf32>
    %37 = arith.maximumf %31, %36 : vector<256x64xf32>
    %cst_13 = arith.constant 0.000000e+00 : f32
    %38 = vector.broadcast %cst_13 : f32 to vector<256x64xf32>
    %cst_14 = arith.constant 0.000000e+00 : f32
    %39 = vector.broadcast %cst_14 : f32 to vector<256x64xf32>
    %40 = vector.extract_strided_slice %14 {offsets = [0, 0, 0], sizes = [1, 256, 64], strides = [1, 1, 1]} : vector<4x256x64xf32> to vector<1x256x64xf32>
    %41 = vector.shape_cast %40 : vector<1x256x64xf32> to vector<256x64xf32>
    %c0_15 = arith.constant 0 : index
    %42 = memref.load %arg3[%c0_15] : memref<4xf32, #tpu.memory_space<smem>>
    %43 = vector.broadcast %42 : f32 to vector<256x64xf32>
    %44 = arith.addf %41, %43 : vector<256x64xf32>
    %45 = arith.subf %44, %37 : vector<256x64xf32>
    %46 = math.exp %45 : vector<256x64xf32>
    %47 = arith.addf %38, %46 : vector<256x64xf32>
    %48 = vector.extract_strided_slice %7 {offsets = [0, 0, 0], sizes = [1, 256, 64], strides = [1, 1, 1]} : vector<4x256x64xf32> to vector<1x256x64xf32>
    %49 = vector.shape_cast %48 : vector<1x256x64xf32> to vector<256x64xf32>
    %50 = arith.mulf %46, %49 : vector<256x64xf32>
    %51 = arith.addf %39, %50 : vector<256x64xf32>
    %52 = vector.extract_strided_slice %14 {offsets = [1, 0, 0], sizes = [1, 256, 64], strides = [1, 1, 1]} : vector<4x256x64xf32> to vector<1x256x64xf32>
    %53 = vector.shape_cast %52 : vector<1x256x64xf32> to vector<256x64xf32>
    %c1_16 = arith.constant 1 : index
    %54 = memref.load %arg3[%c1_16] : memref<4xf32, #tpu.memory_space<smem>>
    %55 = vector.broadcast %54 : f32 to vector<256x64xf32>
    %56 = arith.addf %53, %55 : vector<256x64xf32>
    %57 = arith.subf %56, %37 : vector<256x64xf32>
    %58 = math.exp %57 : vector<256x64xf32>
    %59 = arith.addf %47, %58 : vector<256x64xf32>
    %60 = vector.extract_strided_slice %7 {offsets = [1, 0, 0], sizes = [1, 256, 64], strides = [1, 1, 1]} : vector<4x256x64xf32> to vector<1x256x64xf32>
    %61 = vector.shape_cast %60 : vector<1x256x64xf32> to vector<256x64xf32>
    %62 = arith.mulf %58, %61 : vector<256x64xf32>
    %63 = arith.addf %51, %62 : vector<256x64xf32>
    %64 = vector.extract_strided_slice %14 {offsets = [2, 0, 0], sizes = [1, 256, 64], strides = [1, 1, 1]} : vector<4x256x64xf32> to vector<1x256x64xf32>
    %65 = vector.shape_cast %64 : vector<1x256x64xf32> to vector<256x64xf32>
    %c2_17 = arith.constant 2 : index
    %66 = memref.load %arg3[%c2_17] : memref<4xf32, #tpu.memory_space<smem>>
    %67 = vector.broadcast %66 : f32 to vector<256x64xf32>
    %68 = arith.addf %65, %67 : vector<256x64xf32>
    %69 = arith.subf %68, %37 : vector<256x64xf32>
    %70 = math.exp %69 : vector<256x64xf32>
    %71 = arith.addf %59, %70 : vector<256x64xf32>
    %72 = vector.extract_strided_slice %7 {offsets = [2, 0, 0], sizes = [1, 256, 64], strides = [1, 1, 1]} : vector<4x256x64xf32> to vector<1x256x64xf32>
    %73 = vector.shape_cast %72 : vector<1x256x64xf32> to vector<256x64xf32>
    %74 = arith.mulf %70, %73 : vector<256x64xf32>
    %75 = arith.addf %63, %74 : vector<256x64xf32>
    %76 = vector.extract_strided_slice %14 {offsets = [3, 0, 0], sizes = [1, 256, 64], strides = [1, 1, 1]} : vector<4x256x64xf32> to vector<1x256x64xf32>
    %77 = vector.shape_cast %76 : vector<1x256x64xf32> to vector<256x64xf32>
    %c3_18 = arith.constant 3 : index
    %78 = memref.load %arg3[%c3_18] : memref<4xf32, #tpu.memory_space<smem>>
    %79 = vector.broadcast %78 : f32 to vector<256x64xf32>
    %80 = arith.addf %77, %79 : vector<256x64xf32>
    %81 = arith.subf %80, %37 : vector<256x64xf32>
    %82 = math.exp %81 : vector<256x64xf32>
    %83 = arith.addf %71, %82 : vector<256x64xf32>
    %84 = vector.extract_strided_slice %7 {offsets = [3, 0, 0], sizes = [1, 256, 64], strides = [1, 1, 1]} : vector<4x256x64xf32> to vector<1x256x64xf32>
    %85 = vector.shape_cast %84 : vector<1x256x64xf32> to vector<256x64xf32>
    %86 = arith.mulf %82, %85 : vector<256x64xf32>
    %87 = arith.addf %75, %86 : vector<256x64xf32>
    %88 = tpu.reciprocal %83 {approx = true} : vector<256x64xf32> -> vector<256x64xf32>
    %89 = arith.mulf %87, %88 : vector<256x64xf32>
    %c0_19 = arith.constant 0 : index
    %c0_20 = arith.constant 0 : index
    %90 = vector.load %arg7[%c0_19, %c0_20] : memref<64x32xf32, #tpu.memory_space<vmem>>, vector<64x32xf32>
    %cst_21 = arith.constant dense<0.000000e+00> : vector<256x32xf32>
    %91 = tpu.matmul %89, %90, %cst_21 {dimension_numbers = #tpu.dot_dimension_numbers<[1], [0], [0], [1], [0, 0, 1, 1], [], []>} : vector<256x64xf32>, vector<64x32xf32>, vector<256x32xf32> -> vector<256x32xf32>
    %c0_22 = arith.constant 0 : index
    %c0_23 = arith.constant 0 : index
    %92 = vector.load %arg8[%c0_22, %c0_23] : memref<1x32xf32, #tpu.memory_space<vmem>>, vector<1x32xf32>
    %93 = vector.broadcast %92 : vector<1x32xf32> to vector<256x32xf32>
    %94 = arith.addf %91, %93 : vector<256x32xf32>
    %c0_24 = arith.constant 0 : index
    %c0_25 = arith.constant 0 : index
    %95 = vector.load %arg9[%c0_24, %c0_25] : memref<256x32xf32, #tpu.memory_space<vmem>>, vector<256x32xf32>
    tpu.vector_store %arg9[%c0_24, %c0_25], %94 {strides = array<i32>} : memref<256x32xf32, #tpu.memory_space<vmem>>, vector<256x32xf32>,
    return
  }
  func.func @transform_0(%arg0: i32) -> (i32, i32) {
    %c0_i32 = arith.constant 0 : i32
    %c0_i32_0 = arith.constant 0 : i32
    return %arg0, %c0_i32 : i32, i32
  }
  func.func @transform_1(%arg0: i32) -> (i32, i32, i32) {
    %c0_i32 = arith.constant 0 : i32
    %c0_i32_0 = arith.constant 0 : i32
    %c0_i32_1 = arith.constant 0 : i32
    return %c0_i32, %arg0, %c0_i32_0 : i32, i32, i32
  }
  func.func @transform_2(%arg0: i32) -> i32 {
    %c0_i32 = arith.constant 0 : i32
    %c0_i32_0 = arith.constant 0 : i32
    return %c0_i32 : i32
  }
  func.func @transform_3(%arg0: i32) -> (i32, i32) {
    %c0_i32 = arith.constant 0 : i32
    %c0_i32_0 = arith.constant 0 : i32
    %c0_i32_1 = arith.constant 0 : i32
    return %c0_i32, %c0_i32_0 : i32, i32
  }
  func.func @transform_4(%arg0: i32) -> (i32, i32) {
    %c0_i32 = arith.constant 0 : i32
    %c0_i32_0 = arith.constant 0 : i32
    %c0_i32_1 = arith.constant 0 : i32
    return %c0_i32, %c0_i32_0 : i32, i32
  }
  func.func @transform_5(%arg0: i32) -> (i32, i32) {
    %c0_i32 = arith.constant 0 : i32
    %c0_i32_0 = arith.constant 0 : i32
    %c0_i32_1 = arith.constant 0 : i32
    return %c0_i32, %c0_i32_0 : i32, i32
  }
  func.func @transform_6(%arg0: i32) -> (i32, i32) {
    %c0_i32 = arith.constant 0 : i32
    %c0_i32_0 = arith.constant 0 : i32
    %c0_i32_1 = arith.constant 0 : i32
    return %c0_i32, %c0_i32_0 : i32, i32
  }
  func.func @transform_7(%arg0: i32) -> (i32, i32) {
    %c0_i32 = arith.constant 0 : i32
    %c0_i32_0 = arith.constant 0 : i32
    %c0_i32_1 = arith.constant 0 : i32
    return %c0_i32, %c0_i32_0 : i32, i32
  }
  func.func @transform_8(%arg0: i32) -> (i32, i32) {
    %c0_i32 = arith.constant 0 : i32
    %c0_i32_0 = arith.constant 0 : i32
    return %arg0, %c0_i32 : i32, i32
  }
}

</mosaic_0001>

<bundles_post_ra>
// kernel: tpu_custom_call.1
= control target key start
LH: loop header
LB: loop body
LE: loop exit
PB: predicated region body
PF: predicated region fallthrough
CT: control target
= control target key end

     0   :  { %13 = vsyncpa [#allocation3], 0  ;;  %s8851_s0 = inlined_call_operand.vmem [shape: f32[256,32], index: 0, kind: input, shape index: {}]   ;;  %s8852_s1 = inlined_call_operand.vmem [shape: bf16[4,256,16], index: 1, kind: input, shape index: {}]   ;;  %s8853_s2 = inlined_call_operand.vmem [shape: f32[4], index: 2, kind: input, shape index: {}]   ;;  %s8854_s3 = inlined_call_operand.vmem [shape: f32[32,64], index: 3, kind: input, shape index: {}]   ;;  %s8855_s4 = inlined_call_operand.vmem [shape: bf16[16,64], index: 4, kind: input, shape index: {}]   ;;  %s8856_s5 = inlined_call_operand.vmem [shape: f32[64,64], index: 5, kind: input, shape index: {}]   ;;  %s8857_s6 = inlined_call_operand.vmem [shape: f32[64,32], index: 6, kind: input, shape index: {}]   ;;  %s8858_s7 = inlined_call_operand.vmem [shape: f32[1,32], index: 7, kind: input, shape index: {}]   ;;  %s8859_s8 = inlined_call_operand.vmem [shape: f32[256,32], index: 8, kind: output, shape index: {}]  }
   0x1   :  { %s24_s29 = sshll.u32 %s8853_s2, 4  ;;  %s25_s29 = int_to_ptr.vmem [resolvable:$true] %s24_s29 }
   0x2   :  { %s5744_s30 = scalar_lea.vmem %s25_s29, 16  ;;  %p5749_p1 = scmp.lt.s32.totalorder %s25_s29, %s25_s29 }
   0x3   :  { %p5745_p0 = scmp.ne.s32.totalorder %s25_s29, %s5744_s30  ;;  %p5750_p2 = scmp.lt.s32.totalorder %s5744_s30, %s5744_s30 }
   0x5   :  { %p5751_p3 = por %p5750_p2, %p5749_p1 }
   0x7   :  { %p5752_p4 = pnand %p5751_p3, %p5745_p0 }
   0x9   :  { %5755 = shalt.err (!%p5752_p4)
}
   0xa   :  { %s5758_s9 = smov [#allocation2]  }
   0xb   :  { %27 = dma.vmem_to_smem %s25_s29, 16, %s5758_s9, [#allocation3]  }
   0xc   :  { %5756 = dma.done.wait [#allocation3], 16  }
   0xd   :  { %5757 = vsyncadd [#allocation3], 4294967280 }
   0xe   :  { %41 = sfence }
   0xf   :  { %v75_v0 = vld [vmem:[%s8854_s3] sm:$0xff]  ;;  %v76_v1 = vld [vmem:[%s8854_s3 + $0x8] sm:$0xff]  ;;  %vm857_vm0 = vcmask 130048   ;;  %v77_v5 = vld [vmem:[%s8854_s3 + $0x10] sm:$0xff]  ;;  %vm79_vm1 = vcmask 261120   ;;  %vm1731_vm2 = vcmask 523264  }
  0x10   :  { %v5318_v2 = vpack.c.bf16 %v76_v1, %v75_v0  ;;  %v5359_v3 = vld [vmem:[%s8855_s4] sm:$0xff]   ;;  %v78_v6 = vld [vmem:[%s8854_s3 + $0x18] sm:$0xff]  ;;  %v5361_v8 = vld [vmem:[%s8852_s1 + $0x8] sm:$0xff]   ;;  %s2821_s28 = sld [smem:[#allocation2]]  ;;  %s4549_s11 = sld [smem:[#allocation2 + $0x3]] }
  0x11   :  { %v5360_v4 = vld [vmem:[%s8852_s1] sm:$0xff]   ;;  %4916 = vmatprep.subr.bf16.mxu1 %v5359_v3  ;;  %v5322_v7 = vpack.c.bf16 %v78_v6, %v77_v5  ;;  %v5362_v10 = vld [vmem:[%s8852_s1 + $0x10] sm:$0xff]   ;;  %v44_v11 = vld [vmem:[%s8851_s0 + $0x8] sm:$0xff] }
  0x12   :  { %5319 = vmatprep.subr.bf16.mxu0 %v5318_v2  ;;  %4917 = vmatpush3.bf16.msra.mxu1 %v5359_v3  ;;  %v43_v9 = vld [vmem:[%s8851_s0] sm:$0xff]  ;;  %v45_v12 = vld [vmem:[%s8851_s0 + $0x10] sm:$0xff]  ;;  %v46_v13 = vld [vmem:[%s8851_s0 + $0x18] sm:$0xff] }
  0x13   :  { %5321 = vmatpush3.bf16.msra.mxu0 %v5318_v2  ;;  %4918 = vmatprep.mubr.msk.bf16.mxu1 %vm857_vm0, %v5360_v4  ;;  %v5363_v14 = vld [vmem:[%s8852_s1 + $0x18] sm:$0xff]   ;;  %v5364_v15 = vld [vmem:[%s8852_s1 + $0x20] sm:$0xff]   ;;  %v48_v17 = vld [vmem:[%s8851_s0 + $0x28] sm:$0xff] }
  0x14   :  { %4868 = vmatprep.mubr.msk.f32.mxu0 %vm79_vm1, %v43_v9  ;;  %5323 = vmatprep.subr.bf16.mxu0 %v5322_v7  ;;  %v47_v16 = vld [vmem:[%s8851_s0 + $0x20] sm:$0xff]  ;;  %v49_v18 = vld [vmem:[%s8851_s0 + $0x30] sm:$0xff]  ;;  %v50_v19 = vld [vmem:[%s8851_s0 + $0x38] sm:$0xff] }
  0x15   :  { %4919 = vmatmul.mubr.msk.bf16.vlgmr.msra.gmra.mrb[0].mxu1 %vm857_vm0, %v5361_v8  ;;  %v5365_v20 = vld [vmem:[%s8852_s1 + $0x28] sm:$0xff]   ;;  %v5366_v21 = vld [vmem:[%s8852_s1 + $0x30] sm:$0xff]   ;;  %v51_v22 = vld [vmem:[%s8851_s0 + $0x40] sm:$0xff] }
  0x16   :  { %4922 = vmatprep.mubr.msk.bf16.mxu1 %vm857_vm0, %v5362_v10  ;;  %v52_v23 = vld [vmem:[%s8851_s0 + $0x48] sm:$0xff]  ;;  %v53_v24 = vld [vmem:[%s8851_s0 + $0x50] sm:$0xff]  ;;  %v5367_v25 = vld [vmem:[%s8852_s1 + $0x38] sm:$0xff]  }
  0x17   :  { %5325 = vmatpush3.bf16.msra.mxu0 %v5322_v7  ;;  %v54_v26 = vld [vmem:[%s8851_s0 + $0x58] sm:$0xff]  ;;  %v5368_v27 = vld [vmem:[%s8852_s1 + $0x40] sm:$0xff]   ;;  %v56_v29 = vld [vmem:[%s8851_s0 + $0x68] sm:$0xff] }
  0x18   :  { %v55_v28 = vld [vmem:[%s8851_s0 + $0x60] sm:$0xff]  ;;  %v57_v30 = vld [vmem:[%s8851_s0 + $0x70] sm:$0xff]  ;;  %v58_v31 = vld [vmem:[%s8851_s0 + $0x78] sm:$0xff] }
  0x19   :  { %v5369_v32 = vld [vmem:[%s8852_s1 + $0x48] sm:$0xff]   ;;  %v5370_v33 = vld [vmem:[%s8852_s1 + $0x50] sm:$0xff]   ;;  %v59_v34 = vld [vmem:[%s8851_s0 + $0x80] sm:$0xff] }
  0x1a   :  { %4869 = vmatmul.mubr.msk.f32.vlgmr.msra.gmra.mrb[0].mxu0 %vm79_vm1, %v44_v11  ;;  %v60_v35 = vld [vmem:[%s8851_s0 + $0x88] sm:$0xff]  ;;  %v61_v36 = vld [vmem:[%s8851_s0 + $0x90] sm:$0xff]  ;;  %v62_v37 = vld [vmem:[%s8851_s0 + $0x98] sm:$0xff] }
  0x1b   :  { %4871 = vmatprep.mubr.msk.f32.mxu0 %vm79_vm1, %v45_v12  ;;  %v5371_v38 = vld [vmem:[%s8852_s1 + $0x58] sm:$0xff]   ;;  %v5372_v39 = vld [vmem:[%s8852_s1 + $0x60] sm:$0xff]   ;;  %v64_v41 = vld [vmem:[%s8851_s0 + $0xa8] sm:$0xff] }
  0x1c   :  { %v63_v40 = vld [vmem:[%s8851_s0 + $0xa0] sm:$0xff]  ;;  %v65_v42 = vld [vmem:[%s8851_s0 + $0xb0] sm:$0xff]  ;;  %v66_v43 = vld [vmem:[%s8851_s0 + $0xb8] sm:$0xff] }
  0x1d   :  { %4923 = vmatmul.mubr.msk.bf16.gmra.mrb[4].mxu1 %vm857_vm0, %v5363_v14  ;;  %v5373_v44 = vld [vmem:[%s8852_s1 + $0x68] sm:$0xff]   ;;  %v67_v45 = vld [vmem:[%s8851_s0 + $0xc0] sm:$0xff]  ;;  %v5374_v46 = vld [vmem:[%s8852_s1 + $0x70] sm:$0xff]  }
  0x1e   :  { %4872 = vmatmul.mubr.msk.f32.gmra.mrb[2].mxu0 %vm79_vm1, %v46_v13  ;;  %4926 = vmatprep.mubr.msk.bf16.mxu1 %vm857_vm0, %v5364_v15  ;;  %v1723_v47 = vld [vmem:[%s8856_s5] sm:$0xff]  ;;  %v1724_v48 = vld [vmem:[%s8856_s5 + $0x8] sm:$0xff]  ;;  %v69_v51 = vld [vmem:[%s8851_s0 + $0xd0] sm:$0xff] }
  0x1f   :  { %4874 = vmatprep.mubr.msk.f32.mxu0 %vm79_vm1, %v47_v16  ;;  %v5326_v49 = vpack.c.bf16 %v1724_v48, %v1723_v47  ;;  %v68_v50 = vld [vmem:[%s8851_s0 + $0xc8] sm:$0xff]  ;;  %v1725_v52 = vld [vmem:[%s8856_s5 + $0x10] sm:$0xff]  ;;  %v70_v53 = vld [vmem:[%s8851_s0 + $0xd8] sm:$0xff] }
  0x20   :  { %v1726_v54 = vld [vmem:[%s8856_s5 + $0x18] sm:$0xff]  ;;  %v5376_v57 = vld [vmem:[%s8852_s1 + $0x80] sm:$0xff]   ;;  %v72_v59 = vld [vmem:[%s8851_s0 + $0xe8] sm:$0xff] }
  0x21   :  { %5327 = vmatprep.subr.bf16.mxu0 %v5326_v49  ;;  %v5375_v55 = vld [vmem:[%s8852_s1 + $0x78] sm:$0xff]   ;;  %v5330_v56 = vpack.c.bf16 %v1726_v54, %v1725_v52  ;;  %v71_v58 = vld [vmem:[%s8851_s0 + $0xe0] sm:$0xff]  ;;  %v1728_v61 = vld [vmem:[%s8856_s5 + $0x28] sm:$0xff] }
  0x22   :  { %4875 = vmatmul.mubr.msk.f32.gmra.mrb[4].mxu0 %vm79_vm1, %v48_v17  ;;  %v1727_v60 = vld [vmem:[%s8856_s5 + $0x20] sm:$0xff]  ;;  %v73_v62 = vld [vmem:[%s8851_s0 + $0xf0] sm:$0xff]  ;;  %v5377_v0 = vld [vmem:[%s8852_s1 + $0x88] sm:$0xff]  }
  0x23   :  { %4877 = vmatprep.mubr.msk.f32.mxu0 %vm79_vm1, %v49_v18  ;;  %5329 = vmatpush3.bf16.msra.mxu0 %v5326_v49  ;;  %v5334_v63 = vpack.c.bf16 %v1728_v61, %v1727_v60  ;;  %v74_v1 = vld [vmem:[%s8851_s0 + $0xf8] sm:$0xff]  ;;  %v5378_v2 = vld [vmem:[%s8852_s1 + $0x90] sm:$0xff]   ;;  %v5380_v4 = vld [vmem:[%s8852_s1 + $0xa0] sm:$0xff]   ;;  %s4548_s0 = sld [smem:[#allocation2 + $0x2]] }
  0x24   :  { %5331 = vmatprep.subr.bf16.mxu0 %v5330_v56  ;;  %v5379_v3 = vld [vmem:[%s8852_s1 + $0x98] sm:$0xff]   ;;  %v1729_v5 = vld [vmem:[%s8856_s5 + $0x30] sm:$0xff]  ;;  %v5381_v8 = vld [vmem:[%s8852_s1 + $0xa8] sm:$0xff]  }
  0x25   :  { %4927 = vmatmul.mubr.msk.bf16.gmra.mrb[8].mxu1 %vm857_vm0, %v5365_v20  ;;  %v1730_v6 = vld [vmem:[%s8856_s5 + $0x38] sm:$0xff]  ;;  %v5382_v9 = vld [vmem:[%s8852_s1 + $0xb0] sm:$0xff]   ;;  %v5384_v11 = vld [vmem:[%s8852_s1 + $0xc0] sm:$0xff]  }
  0x26   :  { %4878 = vmatmul.mubr.msk.f32.gmra.mrb[6].mxu0 %vm79_vm1, %v50_v19  ;;  %4930 = vmatprep.mubr.msk.bf16.mxu1 %vm857_vm0, %v5366_v21  ;;  %v5338_v7 = vpack.c.bf16 %v1730_v6, %v1729_v5  ;;  %v5383_v10 = vld [vmem:[%s8852_s1 + $0xb8] sm:$0xff]   ;;  %v5385_v12 = vld [vmem:[%s8852_s1 + $0xc8] sm:$0xff]   ;;  %v5386_v13 = vld [vmem:[%s8852_s1 + $0xd0] sm:$0xff]  }
  0x27   :  { %4880 = vmatprep.mubr.msk.f32.mxu0 %vm79_vm1, %v51_v22  ;;  %5333 = vmatpush3.bf16.msra.mxu0 %v5330_v56  ;;  %v5387_v14 = vld [vmem:[%s8852_s1 + $0xd8] sm:$0xff]   ;;  %v5388_v15 = vld [vmem:[%s8852_s1 + $0xe0] sm:$0xff]   ;;  %v5389_v16 = vld [vmem:[%s8852_s1 + $0xe8] sm:$0xff]  }
  0x28   :  { %5335 = vmatprep.subr.bf16.mxu0 %v5334_v63  ;;  %v5390_v17 = vld [vmem:[%s8852_s1 + $0xf0] sm:$0xff]   ;;  %v5391_v18 = vld [vmem:[%s8852_s1 + $0xf8] sm:$0xff]   ;;  %v5392_v19 = vld [vmem:[%s8852_s1 + $0x100] sm:$0xff]  }
  0x29   :  { %v5393_v20 = vld [vmem:[%s8852_s1 + $0x108] sm:$0xff]   ;;  %v5394_v21 = vld [vmem:[%s8852_s1 + $0x110] sm:$0xff]   ;;  %v5395_v22 = vld [vmem:[%s8852_s1 + $0x118] sm:$0xff]  }
  0x2a   :  { %4881 = vmatmul.mubr.msk.f32.gmra.mrb[8].mxu0 %vm79_vm1, %v52_v23  ;;  %v5396_v23 = vld [vmem:[%s8852_s1 + $0x120] sm:$0xff]   ;;  %v5418_v60 = vld [vmem:[%s8852_s1 + $0x1d0] sm:$0xff]  }
  0x2b   :  { %4883 = vmatprep.mubr.msk.f32.mxu0 %vm79_vm1, %v53_v24  ;;  %5337 = vmatpush3.bf16.msra.mxu0 %v5334_v63  ;;  %v5397_v24 = vld [vmem:[%s8852_s1 + $0x128] sm:$0xff]  }
  0x2c   :  { %5339 = vmatprep.subr.bf16.mxu0 %v5338_v7 }
  0x2d   :  { %4931 = vmatmul.mubr.msk.bf16.gmra.mrb[12].mxu1 %vm857_vm0, %v5367_v25  ;;  %v5398_v25 = vld [vmem:[%s8852_s1 + $0x130] sm:$0xff]  }
  0x2e   :  { %4884 = vmatmul.mubr.msk.f32.gmra.mrb[10].mxu0 %vm79_vm1, %v54_v26  ;;  %4934 = vmatprep.mubr.msk.bf16.mxu1 %vm857_vm0, %v5368_v27  ;;  %v5399_v26 = vld [vmem:[%s8852_s1 + $0x138] sm:$0xff]   ;;  %v5400_v27 = vld [vmem:[%s8852_s1 + $0x140] sm:$0xff]  }
  0x2f   :  { %4886 = vmatprep.mubr.msk.f32.mxu0 %vm79_vm1, %v55_v28  ;;  %5341 = vmatpush3.bf16.msra.mxu0 %v5338_v7  ;;  %v5401_v28 = vld [vmem:[%s8852_s1 + $0x148] sm:$0xff]   ;;  %v5419_v7 = vld [vmem:[%s8852_s1 + $0x1d8] sm:$0xff]  }
  0x32   :  { %4887 = vmatmul.mubr.msk.f32.gmra.mrb[12].mxu0 %vm79_vm1, %v56_v29  ;;  %v5402_v29 = vld [vmem:[%s8852_s1 + $0x150] sm:$0xff]  }
  0x33   :  { %4889 = vmatprep.mubr.msk.f32.mxu0 %vm79_vm1, %v57_v30  ;;  %v5403_v30 = vld [vmem:[%s8852_s1 + $0x158] sm:$0xff]  }
  0x35   :  { %4935 = vmatmul.mubr.msk.bf16.gmra.mrb[16].mxu1 %vm857_vm0, %v5369_v32  ;;  %v5405_v32 = vld [vmem:[%s8852_s1 + $0x168] sm:$0xff]  }
  0x36   :  { %4890 = vmatmul.mubr.msk.f32.gmra.mrb[14].mxu0 %vm79_vm1, %v58_v31  ;;  %4938 = vmatprep.mubr.msk.bf16.mxu1 %vm857_vm0, %v5370_v33  ;;  %v5404_v31 = vld [vmem:[%s8852_s1 + $0x160] sm:$0xff]   ;;  %v5406_v33 = vld [vmem:[%s8852_s1 + $0x170] sm:$0xff]  }
  0x37   :  { %4892 = vmatprep.mubr.msk.f32.mxu0 %vm79_vm1, %v59_v34  ;;  %v5407_v34 = vld [vmem:[%s8852_s1 + $0x178] sm:$0xff]  }
  0x3a   :  { %4893 = vmatmul.mubr.msk.f32.gmra.mrb[16].mxu0 %vm79_vm1, %v60_v35  ;;  %v5408_v35 = vld [vmem:[%s8852_s1 + $0x180] sm:$0xff]  }
  0x3b   :  { %4895 = vmatprep.mubr.msk.f32.mxu0 %vm79_vm1, %v61_v36  ;;  %v5409_v36 = vld [vmem:[%s8852_s1 + $0x188] sm:$0xff]  }
  0x3d   :  { %4939 = vmatmul.mubr.msk.bf16.gmra.mrb[20].mxu1 %vm857_vm0, %v5371_v38  ;;  %v5411_v38 = vld [vmem:[%s8852_s1 + $0x198] sm:$0xff]  }
  0x3e   :  { %4896 = vmatmul.mubr.msk.f32.gmra.mrb[18].mxu0 %vm79_vm1, %v62_v37  ;;  %4942 = vmatprep.mubr.msk.bf16.mxu1 %vm857_vm0, %v5372_v39  ;;  %v5410_v37 = vld [vmem:[%s8852_s1 + $0x190] sm:$0xff]   ;;  %v5412_v39 = vld [vmem:[%s8852_s1 + $0x1a0] sm:$0xff]  }
  0x3f   :  { %4898 = vmatprep.mubr.msk.f32.mxu0 %vm79_vm1, %v63_v40  ;;  %v5413_v40 = vld [vmem:[%s8852_s1 + $0x1a8] sm:$0xff]  }
  0x42   :  { %4899 = vmatmul.mubr.msk.f32.gmra.mrb[20].mxu0 %vm79_vm1, %v64_v41  ;;  %v5414_v41 = vld [vmem:[%s8852_s1 + $0x1b0] sm:$0xff]  }
  0x43   :  { %4901 = vmatprep.mubr.msk.f32.mxu0 %vm79_vm1, %v65_v42 }
  0x45   :  { %4943 = vmatmul.mubr.msk.bf16.gmra.mrb[24].mxu1 %vm857_vm0, %v5373_v44  ;;  %v5415_v44 = vld [vmem:[%s8852_s1 + $0x1b8] sm:$0xff]  }
  0x46   :  { %4902 = vmatmul.mubr.msk.f32.gmra.mrb[22].mxu0 %vm79_vm1, %v66_v43  ;;  %4946 = vmatprep.mubr.msk.bf16.mxu1 %vm857_vm0, %v5374_v46  ;;  %v5416_v46 = vld [vmem:[%s8852_s1 + $0x1c0] sm:$0xff]  }
  0x47   :  { %4904 = vmatprep.mubr.msk.f32.mxu0 %vm79_vm1, %v67_v45 }
  0x4a   :  { %4905 = vmatmul.mubr.msk.f32.gmra.mrb[24].mxu0 %vm79_vm1, %v68_v50 }
  0x4b   :  { %4907 = vmatprep.mubr.msk.f32.mxu0 %vm79_vm1, %v69_v51 }
  0x4d   :  { %4947 = vmatmul.mubr.msk.bf16.gmra.mrb[28].mxu1 %vm857_vm0, %v5375_v55 }
  0x4e   :  { %4908 = vmatmul.mubr.msk.f32.gmra.mrb[26].mxu0 %vm79_vm1, %v70_v53  ;;  %4950 = vmatprep.mubr.msk.bf16.mxu1 %vm857_vm0, %v5376_v57  ;;  %v5417_v57 = vld [vmem:[%s8852_s1 + $0x1c8] sm:$0xff]  }
  0x4f   :  { %4910 = vmatprep.mubr.msk.f32.mxu0 %vm79_vm1, %v71_v58 }
  0x52   :  { %4911 = vmatmul.mubr.msk.f32.gmra.mrb[28].mxu0 %vm79_vm1, %v72_v59 }
  0x53   :  { %4913 = vmatprep.mubr.msk.f32.mxu0 %vm79_vm1, %v73_v62 }
  0x55   :  { %4951 = vmatmul.mubr.msk.bf16.gmra.mrb[32].mxu1 %vm857_vm0, %v5377_v0 }
  0x56   :  { %4914 = vmatmul.mubr.msk.f32.gmra.mrb[30].mxu0 %vm79_vm1, %v74_v1  ;;  %4954 = vmatprep.mubr.msk.bf16.mxu1 %vm857_vm0, %v5378_v2 }
  0x5d   :  { %4955 = vmatmul.mubr.msk.bf16.gmra.mrb[36].mxu1 %vm857_vm0, %v5379_v3 }
  0x5e   :  { %4958 = vmatprep.mubr.msk.bf16.mxu1 %vm857_vm0, %v5380_v4 }
  0x65   :  { %4959 = vmatmul.mubr.msk.bf16.gmra.mrb[40].mxu1 %vm857_vm0, %v5381_v8 }
  0x66   :  { %4962 = vmatprep.mubr.msk.bf16.mxu1 %vm857_vm0, %v5382_v9 }
  0x6d   :  { %4963 = vmatmul.mubr.msk.bf16.gmra.mrb[44].mxu1 %vm857_vm0, %v5383_v10  ;;  %v5420_v10 = vld [vmem:[%s8852_s1 + $0x1e0] sm:$0xff]  }
  0x6e   :  { %4966 = vmatprep.mubr.msk.bf16.mxu1 %vm857_vm0, %v5384_v11 }
  0x75   :  { %4967 = vmatmul.mubr.msk.bf16.gmra.mrb[48].mxu1 %vm857_vm0, %v5385_v12 }
  0x76   :  { %4970 = vmatprep.mubr.msk.bf16.mxu1 %vm857_vm0, %v5386_v13 }
  0x7d   :  { %4971 = vmatmul.mubr.msk.bf16.gmra.mrb[52].mxu1 %vm857_vm0, %v5387_v14 }
  0x7e   :  { %4974 = vmatprep.mubr.msk.bf16.mxu1 %vm857_vm0, %v5388_v15 }
  0x85   :  { %4975 = vmatmul.mubr.msk.bf16.gmra.mrb[56].mxu1 %vm857_vm0, %v5389_v16 }
  0x86   :  { %4978 = vmatprep.mubr.msk.bf16.mxu1 %vm857_vm0, %v5390_v17 }
  0x8d   :  { %4979 = vmatmul.mubr.msk.bf16.gmra.mrb[60].mxu1 %vm857_vm0, %v5391_v18 }
  0x8e   :  { %4982 = vmatprep.mubr.msk.bf16.mxu1 %vm857_vm0, %v5392_v19 }
  0x95   :  { %4983 = vmatmul.mubr.msk.bf16.gmra.mrb[64].mxu1 %vm857_vm0, %v5393_v20 }
  0x96   :  { %4986 = vmatprep.mubr.msk.bf16.mxu1 %vm857_vm0, %v5394_v21  ;;  %v5421_v21 = vld [vmem:[%s8852_s1 + $0x1e8] sm:$0xff]  }
  0x9d   :  { %4987 = vmatmul.mubr.msk.bf16.gmra.mrb[68].mxu1 %vm857_vm0, %v5395_v22 }
  0x9e   :  { %4990 = vmatprep.mubr.msk.bf16.mxu1 %vm857_vm0, %v5396_v23 }
  0xa5   :  { %4991 = vmatmul.mubr.msk.bf16.gmra.mrb[72].mxu1 %vm857_vm0, %v5397_v24  ;;  %v5422_v24 = vld [vmem:[%s8852_s1 + $0x1f0] sm:$0xff]  }
  0xa6   :  { %4994 = vmatprep.mubr.msk.bf16.mxu1 %vm857_vm0, %v5398_v25 }
  0xad   :  { %4995 = vmatmul.mubr.msk.bf16.gmra.mrb[76].mxu1 %vm857_vm0, %v5399_v26 }
  0xae   :  { %4998 = vmatprep.mubr.msk.bf16.mxu1 %vm857_vm0, %v5400_v27 }
  0xb5   :  { %4999 = vmatmul.mubr.msk.bf16.gmra.mrb[80].mxu1 %vm857_vm0, %v5401_v28 }
  0xb6   :  { %5002 = vmatprep.mubr.msk.bf16.mxu1 %vm857_vm0, %v5402_v29 }
  0xbd   :  { %5003 = vmatmul.mubr.msk.bf16.gmra.mrb[84].mxu1 %vm857_vm0, %v5403_v30 }
  0xbe   :  { %5006 = vmatprep.mubr.msk.bf16.mxu1 %vm857_vm0, %v5404_v31 }
  0xc5   :  { %5007 = vmatmul.mubr.msk.bf16.gmra.mrb[88].mxu1 %vm857_vm0, %v5405_v32 }
  0xc6   :  { %5010 = vmatprep.mubr.msk.bf16.mxu1 %vm857_vm0, %v5406_v33 }
  0xcd   :  { %5011 = vmatmul.mubr.msk.bf16.gmra.mrb[92].mxu1 %vm857_vm0, %v5407_v34 }
  0xce   :  { %5014 = vmatprep.mubr.msk.bf16.mxu1 %vm857_vm0, %v5408_v35  ;;  %v5423_v35 = vld [vmem:[%s8852_s1 + $0x1f8] sm:$0xff]  }
  0xd5   :  { %5015 = vmatmul.mubr.msk.bf16.gmra.mrb[96].mxu1 %vm857_vm0, %v5409_v36 }
  0xd6   :  { %5018 = vmatprep.mubr.msk.bf16.mxu1 %vm857_vm0, %v5410_v37 }
  0xdd   :  { %5019 = vmatmul.mubr.msk.bf16.gmra.mrb[100].mxu1 %vm857_vm0, %v5411_v38 }
  0xde   :  { %5022 = vmatprep.mubr.msk.bf16.mxu1 %vm857_vm0, %v5412_v39 }
  0xe5   :  { %5023 = vmatmul.mubr.msk.bf16.gmra.mrb[104].mxu1 %vm857_vm0, %v5413_v40 }
  0xe6   :  { %5026 = vmatprep.mubr.msk.bf16.mxu1 %vm857_vm0, %v5414_v41 }
  0xe8   :  { %v6194_v42 = vpop.f32.mrb[0].mxu1 }
  0xe9   :  { %9145 = vst [vmem:[#allocation5_spill] sm:$0xff] %v6194_v42  ;;  %v6196_v43 = vpop.f32.mrb[1].mxu1 }
  0xea   :  { %9146 = vst [vmem:[#allocation6_spill] sm:$0xff] %v6196_v43  ;;  %v6201_v45 = vpop.f32.mrb[2].mxu1 }
  0xeb   :  { %9147 = vst [vmem:[#allocation7_spill] sm:$0xff] %v6201_v45  ;;  %v6206_v47 = vpop.f32.mrb[3].mxu1 }
  0xec   :  { %9148 = vst [vmem:[#allocation8_spill] sm:$0xff] %v6206_v47 }
  0xed   :  { %v6208_v48 = vpop.f32.mrb[0].mxu0  ;;  %5027 = vmatmul.mubr.msk.bf16.gmra.mrb[108].mxu1 %vm857_vm0, %v5415_v44 }
  0xee   :  { %v1596_v49 = vmul.f32 %v6208_v48, %v6206_v47  ;;  %v6212_v50 = vpop.f32.mrb[1].mxu0  ;;  %5030 = vmatprep.mubr.msk.bf16.mxu1 %vm857_vm0, %v5416_v46 }
  0xef   :  { %v1595_v51 = vmul.f32 %v6196_v43, %v6212_v50 }
  0xf0   :  { %v6220_v53 = vpop.f32.mrb[4].mxu1 }
  0xf1   :  { %v6218_v52 = vpop.f32.mrb[2].mxu0  ;;  %9149 = vst [vmem:[#allocation9_spill] sm:$0xff] %v6220_v53  ;;  %5062 = vmatprep.mubr.msk.f32.mxu0 %vm1731_vm2, %v1595_v51  ;;  %v6227_v56 = vpop.f32.mrb[5].mxu1 }
  0xf2   :  { %v1598_v54 = vmul.f32 %v6201_v45, %v6218_v52  ;;  %v6225_v55 = vpop.f32.mrb[3].mxu0  ;;  %9150 = vst [vmem:[#allocation10_spill] sm:$0xff] %v6227_v56  ;;  %5063 = vmatmul.mubr.msk.f32.vlgmr.msra.gmra.mrb[32].mxu0 %vm1731_vm2, %v1596_v49  ;;  %v6235_v59 = vpop.f32.mrb[6].mxu1 }
  0xf3   :  { %v1597_v58 = vmul.f32 %v6194_v42, %v6225_v55  ;;  %9151 = vst [vmem:[#allocation11_spill] sm:$0xff] %v6235_v59  ;;  %v6240_v61 = vpop.f32.mrb[7].mxu1 }
  0xf4   :  { %9152 = vst [vmem:[#allocation12_spill] sm:$0xff] %v6240_v61 }
  0xf5   :  { %v6242_v62 = vpop.f32.mrb[4].mxu0  ;;  %5065 = vmatprep.mubr.msk.f32.mxu0 %vm1731_vm2, %v1597_v58  ;;  %5031 = vmatmul.mubr.msk.bf16.gmra.mrb[112].mxu1 %vm857_vm0, %v5417_v57 }
  0xf6   :  { %v1600_v63 = vmul.f32 %v6242_v62, %v6240_v61  ;;  %v6247_v0 = vpop.f32.mrb[5].mxu0  ;;  %5066 = vmatmul.mubr.msk.f32.gmra.mrb[34].mxu0 %vm1731_vm2, %v1598_v54  ;;  %5034 = vmatprep.mubr.msk.bf16.mxu1 %vm857_vm0, %v5418_v60 }
  0xf7   :  { %v1599_v1 = vmul.f32 %v6227_v56, %v6247_v0 }
  0xf8   :  { %v6256_v3 = vpop.f32.mrb[8].mxu1 }
  0xf9   :  { %v6254_v2 = vpop.f32.mrb[6].mxu0  ;;  %9153 = vst [vmem:[#allocation13_spill] sm:$0xff] %v6256_v3  ;;  %5068 = vmatprep.mubr.msk.f32.mxu0 %vm1731_vm2, %v1599_v1  ;;  %v6263_v6 = vpop.f32.mrb[9].mxu1 }
  0xfa   :  { %v1602_v4 = vmul.f32 %v6235_v59, %v6254_v2  ;;  %v6261_v5 = vpop.f32.mrb[7].mxu0  ;;  %9154 = vst [vmem:[#allocation14_spill] sm:$0xff] %v6263_v6  ;;  %5069 = vmatmul.mubr.msk.f32.gmra.mrb[36].mxu0 %vm1731_vm2, %v1600_v63  ;;  %v6271_v9 = vpop.f32.mrb[10].mxu1 }
  0xfb   :  { %v1601_v8 = vmul.f32 %v6220_v53, %v6261_v5  ;;  %9155 = vst [vmem:[#allocation15_spill] sm:$0xff] %v6271_v9  ;;  %v6276_v11 = vpop.f32.mrb[11].mxu1 }
  0xfc   :  { %9156 = vst [vmem:[#allocation16_spill] sm:$0xff] %v6276_v11 }
  0xfd   :  { %v6278_v12 = vpop.f32.mrb[8].mxu0  ;;  %5071 = vmatprep.mubr.msk.f32.mxu0 %vm1731_vm2, %v1601_v8  ;;  %5035 = vmatmul.mubr.msk.bf16.gmra.mrb[116].mxu1 %vm857_vm0, %v5419_v7 }
  0xfe   :  { %v1604_v13 = vmul.f32 %v6278_v12, %v6276_v11  ;;  %v6283_v14 = vpop.f32.mrb[9].mxu0  ;;  %5072 = vmatmul.mubr.msk.f32.gmra.mrb[38].mxu0 %vm1731_vm2, %v1602_v4  ;;  %5038 = vmatprep.mubr.msk.bf16.mxu1 %vm857_vm0, %v5420_v10 }
  0xff   :  { %v1603_v15 = vmul.f32 %v6263_v6, %v6283_v14 }
 0x100   :  { %v6292_v17 = vpop.f32.mrb[12].mxu1 }
 0x101   :  { %v6290_v16 = vpop.f32.mrb[10].mxu0  ;;  %9157 = vst [vmem:[#allocation17_spill] sm:$0xff] %v6292_v17  ;;  %5074 = vmatprep.mubr.msk.f32.mxu0 %vm1731_vm2, %v1603_v15  ;;  %v6299_v20 = vpop.f32.mrb[13].mxu1 }
 0x102   :  { %v1606_v18 = vmul.f32 %v6271_v9, %v6290_v16  ;;  %v6297_v19 = vpop.f32.mrb[11].mxu0  ;;  %9158 = vst [vmem:[#allocation18_spill] sm:$0xff] %v6299_v20  ;;  %5075 = vmatmul.mubr.msk.f32.gmra.mrb[40].mxu0 %vm1731_vm2, %v1604_v13  ;;  %v6307_v23 = vpop.f32.mrb[14].mxu1 }
 0x103   :  { %v1605_v22 = vmul.f32 %v6256_v3, %v6297_v19  ;;  %9159 = vst [vmem:[#allocation19_spill] sm:$0xff] %v6307_v23  ;;  %v6312_v25 = vpop.f32.mrb[15].mxu1  ;;  %v3888_v3 = vld [vmem:[%s8857_s6 + $0x18] sm:$0xff] }
 0x104   :  { %9160 = vst [vmem:[#allocation20_spill] sm:$0xff] %v6312_v25 }
 0x105   :  { %v6314_v26 = vpop.f32.mrb[12].mxu0  ;;  %5077 = vmatprep.mubr.msk.f32.mxu0 %vm1731_vm2, %v1605_v22  ;;  %5039 = vmatmul.mubr.msk.bf16.gmra.mrb[120].mxu1 %vm857_vm0, %v5421_v21 }
 0x106   :  { %v1608_v27 = vmul.f32 %v6314_v26, %v6312_v25  ;;  %v6319_v28 = vpop.f32.mrb[13].mxu0  ;;  %5078 = vmatmul.mubr.msk.f32.gmra.mrb[42].mxu0 %vm1731_vm2, %v1606_v18  ;;  %5042 = vmatprep.mubr.msk.bf16.mxu1 %vm857_vm0, %v5422_v24 }
 0x107   :  { %v1607_v29 = vmul.f32 %v6299_v20, %v6319_v28 }
 0x108   :  { %v6328_v31 = vpop.f32.mrb[16].mxu1 }
 0x109   :  { %v6326_v30 = vpop.f32.mrb[14].mxu0  ;;  %9161 = vst [vmem:[#allocation21_spill] sm:$0xff] %v6328_v31  ;;  %5080 = vmatprep.mubr.msk.f32.mxu0 %vm1731_vm2, %v1607_v29  ;;  %v6335_v34 = vpop.f32.mrb[17].mxu1 }
 0x10a   :  { %v1610_v32 = vmul.f32 %v6307_v23, %v6326_v30  ;;  %v6333_v33 = vpop.f32.mrb[15].mxu0  ;;  %9162 = vst [vmem:[#allocation22_spill] sm:$0xff] %v6335_v34  ;;  %5081 = vmatmul.mubr.msk.f32.gmra.mrb[44].mxu0 %vm1731_vm2, %v1608_v27  ;;  %v6343_v37 = vpop.f32.mrb[18].mxu1 }
 0x10b   :  { %v1609_v36 = vmul.f32 %v6292_v17, %v6333_v33  ;;  %9163 = vst [vmem:[#allocation23_spill] sm:$0xff] %v6343_v37  ;;  %v6345_v38 = vpop.f32.mrb[19].mxu1 }
 0x10c   :  { %9164 = vst [vmem:[#allocation24_spill] sm:$0xff] %v6345_v38 }
 0x10d   :  { %v6347_v39 = vpop.f32.mrb[16].mxu0  ;;  %5083 = vmatprep.mubr.msk.f32.mxu0 %vm1731_vm2, %v1609_v36  ;;  %5043 = vmatmul.mubr.msk.bf16.gmra.mrb[124].mxu1 %vm857_vm0, %v5423_v35 }
 0x10e   :  { %v1612_v40 = vmul.f32 %v6347_v39, %v6345_v38  ;;  %v6352_v41 = vpop.f32.mrb[17].mxu0  ;;  %5084 = vmatmul.mubr.msk.f32.gmra.mrb[46].mxu0 %vm1731_vm2, %v1610_v32 }
 0x10f   :  { %v1611_v44 = vmul.f32 %v6335_v34, %v6352_v41 }
 0x110   :  { %v6360_v49 = vpop.f32.mrb[20].mxu1 }
 0x111   :  { %v6358_v46 = vpop.f32.mrb[18].mxu0  ;;  %9165 = vst [vmem:[#allocation25_spill] sm:$0xff] %v6360_v49  ;;  %5086 = vmatprep.mubr.msk.f32.mxu0 %vm1731_vm2, %v1611_v44  ;;  %v6367_v57 = vpop.f32.mrb[21].mxu1 }
 0x112   :  { %v1614_v51 = vmul.f32 %v6343_v37, %v6358_v46  ;;  %v6365_v54 = vpop.f32.mrb[19].mxu0  ;;  %9166 = vst [vmem:[#allocation26_spill] sm:$0xff] %v6367_v57  ;;  %5087 = vmatmul.mubr.msk.f32.gmra.mrb[48].mxu0 %vm1731_vm2, %v1612_v40  ;;  %v6372_v60 = vpop.f32.mrb[22].mxu1 }
 0x113   :  { %v1613_v58 = vmul.f32 %v6328_v31, %v6365_v54  ;;  %9167 = vst [vmem:[#allocation27_spill] sm:$0xff] %v6372_v60  ;;  %v6374_v63 = vpop.f32.mrb[23].mxu1 }
 0x114   :  { %9168 = vst [vmem:[#allocation28_spill] sm:$0xff] %v6374_v63 }
 0x115   :  { %v6376_v1 = vpop.f32.mrb[20].mxu0  ;;  %5089 = vmatprep.mubr.msk.f32.mxu0 %vm1731_vm2, %v1613_v58 }
 0x116   :  { %v1616_v4 = vmul.f32 %v6376_v1, %v6374_v63  ;;  %v6381_v7 = vpop.f32.mrb[21].mxu0  ;;  %5090 = vmatmul.mubr.msk.f32.gmra.mrb[50].mxu0 %vm1731_vm2, %v1614_v51 }
 0x117   :  { %v1615_v8 = vmul.f32 %v6367_v57, %v6381_v7 }
 0x118   :  { %v6388_v13 = vpop.f32.mrb[24].mxu1 }
 0x119   :  { %v6386_v10 = vpop.f32.mrb[22].mxu0  ;;  %9169 = vst [vmem:[#allocation29_spill] sm:$0xff] %v6388_v13  ;;  %5092 = vmatprep.mubr.msk.f32.mxu0 %vm1731_vm2, %v1615_v8  ;;  %v6395_v21 = vpop.f32.mrb[25].mxu1 }
 0x11a   :  { %v1618_v15 = vmul.f32 %v6372_v60, %v6386_v10  ;;  %v6393_v18 = vpop.f32.mrb[23].mxu0  ;;  %9170 = vst [vmem:[#allocation30_spill] sm:$0xff] %v6395_v21  ;;  %5093 = vmatmul.mubr.msk.f32.gmra.mrb[52].mxu0 %vm1731_vm2, %v1616_v4  ;;  %v6400_v24 = vpop.f32.mrb[26].mxu1 }
 0x11b   :  { %v1617_v22 = vmul.f32 %v6360_v49, %v6393_v18  ;;  %9171 = vst [vmem:[#allocation31_spill] sm:$0xff] %v6400_v24  ;;  %v6402_v27 = vpop.f32.mrb[27].mxu1 }
 0x11c   :  { %9172 = vst [vmem:[#allocation32_spill] sm:$0xff] %v6402_v27 }
 0x11d   :  { %v6404_v29 = vpop.f32.mrb[24].mxu0  ;;  %5095 = vmatprep.mubr.msk.f32.mxu0 %vm1731_vm2, %v1617_v22 }
 0x11e   :  { %v1620_v32 = vmul.f32 %v6404_v29, %v6402_v27  ;;  %v6409_v35 = vpop.f32.mrb[25].mxu0  ;;  %5096 = vmatmul.mubr.msk.f32.gmra.mrb[54].mxu0 %vm1731_vm2, %v1618_v15 }
 0x11f   :  { %v1619_v36 = vmul.f32 %v6395_v21, %v6409_v35 }
 0x120   :  { %v6416_v44 = vpop.f32.mrb[28].mxu1 }
 0x121   :  { %v6414_v40 = vpop.f32.mrb[26].mxu0  ;;  %9173 = vst [vmem:[#allocation33_spill] sm:$0xff] %v6416_v44  ;;  %5098 = vmatprep.mubr.msk.f32.mxu0 %vm1731_vm2, %v1619_v36  ;;  %v6423_v4 = vpop.f32.mrb[29].mxu1 }
 0x122   :  { %v1622_v51 = vmul.f32 %v6400_v24, %v6414_v40  ;;  %v6421_v58 = vpop.f32.mrb[27].mxu0  ;;  %9174 = vst [vmem:[#allocation34_spill] sm:$0xff] %v6423_v4  ;;  %5099 = vmatmul.mubr.msk.f32.gmra.mrb[56].mxu0 %vm1731_vm2, %v1620_v32  ;;  %v6428_v15 = vpop.f32.mrb[30].mxu1 }
 0x123   :  { %v1621_v8 = vmul.f32 %v6388_v13, %v6421_v58  ;;  %9175 = vst [vmem:[#allocation35_spill] sm:$0xff] %v6428_v15  ;;  %v6430_v22 = vpop.f32.mrb[31].mxu1 }
 0x124   :  { %9176 = vst [vmem:[#allocation36_spill] sm:$0xff] %v6430_v22 }
 0x125   :  { %v6432_v27 = vpop.f32.mrb[28].mxu0  ;;  %5101 = vmatprep.mubr.msk.f32.mxu0 %vm1731_vm2, %v1621_v8 }
 0x126   :  { %v1624_v36 = vmul.f32 %v6432_v27, %v6430_v22  ;;  %v6437_v24 = vpop.f32.mrb[29].mxu0  ;;  %5102 = vmatmul.mubr.msk.f32.gmra.mrb[58].mxu0 %vm1731_vm2, %v1622_v51 }
 0x127   :  { %v1623_v32 = vmul.f32 %v6423_v4, %v6437_v24 }
 0x128   :  { %v6444_v13 = vpop.f32.mrb[32].mxu1 }
 0x129   :  { %v6442_v21 = vpop.f32.mrb[30].mxu0  ;;  %9177 = vst [vmem:[#allocation37_spill] sm:$0xff] %v6444_v13  ;;  %5104 = vmatprep.mubr.msk.f32.mxu0 %vm1731_vm2, %v1623_v32  ;;  %v1629_v8 = vmul.f32 %v6444_v13, %v6225_v55  ;;  %v6453_v49 = vpop.f32.mrb[33].mxu1 }
 0x12a   :  { %v1626_v60 = vmul.f32 %v6428_v15, %v6442_v21  ;;  %v6451_v22 = vpop.f32.mrb[31].mxu0  ;;  %9178 = vst [vmem:[#allocation38_spill] sm:$0xff] %v6453_v49  ;;  %5105 = vmatmul.mubr.msk.f32.gmra.mrb[60].mxu0 %vm1731_vm2, %v1624_v36  ;;  %v1627_v4 = vmul.f32 %v6453_v49, %v6212_v50  ;;  %v6460_v63 = vpop.f32.mrb[34].mxu1  ;;  %v3885_v36 = vld [vmem:[%s8857_s6] sm:$0xff] }
 0x12b   :  { %v1625_v51 = vmul.f32 %v6416_v44, %v6451_v22  ;;  %9179 = vst [vmem:[#allocation39_spill] sm:$0xff] %v6460_v63  ;;  %v1630_v32 = vmul.f32 %v6460_v63, %v6218_v52  ;;  %v6464_v15 = vpop.f32.mrb[35].mxu1  ;;  %v3886_v44 = vld [vmem:[%s8857_s6 + $0x8] sm:$0xff] }
 0x12c   :  { %9180 = vst [vmem:[#allocation40_spill] sm:$0xff] %v6464_v15  ;;  %v1628_v57 = vmul.f32 %v6208_v48, %v6464_v15  ;;  %v5342_v37 = vpack.c.bf16 %v3886_v44, %v3885_v36 }
 0x12d   :  { %5107 = vmatprep.mubr.msk.f32.mxu0 %vm1731_vm2, %v1625_v51 }
 0x12e   :  { %5108 = vmatmul.mubr.msk.f32.gmra.mrb[62].mxu0 %vm1731_vm2, %v1626_v60  ;;  %5343 = vmatprep.subr.bf16.mxu1 %v5342_v37 }
 0x12f   :  { %5110 = vmatprep.mubr.msk.f32.mxu0 %vm1731_vm2, %v1627_v4  ;;  %5345 = vmatpush3.bf16.msra.mxu1 %v5342_v37 }
 0x130   :  { %v6477_v31 = vpop.f32.mrb[36].mxu1 }
 0x131   :  { %9181 = vst [vmem:[#allocation41_spill] sm:$0xff] %v6477_v31  ;;  %v1633_v51 = vmul.f32 %v6477_v31, %v6261_v5  ;;  %v6481_v38 = vpop.f32.mrb[37].mxu1 }
 0x132   :  { %9182 = vst [vmem:[#allocation42_spill] sm:$0xff] %v6481_v38  ;;  %5111 = vmatmul.mubr.msk.f32.gmra.mrb[64].mxu0 %vm1731_vm2, %v1628_v57  ;;  %v1631_v34 = vmul.f32 %v6481_v38, %v6247_v0  ;;  %v6486_v23 = vpop.f32.mrb[38].mxu1 }
 0x133   :  { %9183 = vst [vmem:[#allocation43_spill] sm:$0xff] %v6486_v23  ;;  %5113 = vmatprep.mubr.msk.f32.mxu0 %vm1731_vm2, %v1629_v8  ;;  %v1634_v60 = vmul.f32 %v6486_v23, %v6254_v2  ;;  %v6491_v44 = vpop.f32.mrb[39].mxu1 }
 0x134   :  { %9184 = vst [vmem:[#allocation44_spill] sm:$0xff] %v6491_v44  ;;  %v1632_v37 = vmul.f32 %v6242_v62, %v6491_v44 }
 0x136   :  { %5114 = vmatmul.mubr.msk.f32.gmra.mrb[66].mxu0 %vm1731_vm2, %v1630_v32 }
 0x137   :  { %5116 = vmatprep.mubr.msk.f32.mxu0 %vm1731_vm2, %v1631_v34 }
 0x138   :  { %v6497_v57 = vpop.f32.mrb[40].mxu1 }
 0x139   :  { %9185 = vst [vmem:[#allocation45_spill] sm:$0xff] %v6497_v57  ;;  %v1637_v4 = vmul.f32 %v6497_v57, %v6297_v19  ;;  %v6501_v36 = vpop.f32.mrb[41].mxu1 }
 0x13a   :  { %9186 = vst [vmem:[#allocation46_spill] sm:$0xff] %v6501_v36  ;;  %5117 = vmatmul.mubr.msk.f32.gmra.mrb[68].mxu0 %vm1731_vm2, %v1632_v37  ;;  %v1635_v8 = vmul.f32 %v6501_v36, %v6283_v14  ;;  %v6506_v17 = vpop.f32.mrb[42].mxu1 }
 0x13b   :  { %9187 = vst [vmem:[#allocation47_spill] sm:$0xff] %v6506_v17  ;;  %5119 = vmatprep.mubr.msk.f32.mxu0 %vm1731_vm2, %v1633_v51  ;;  %v1638_v32 = vmul.f32 %v6506_v17, %v6290_v16  ;;  %v6511_v34 = vpop.f32.mrb[43].mxu1 }
 0x13c   :  { %9188 = vst [vmem:[#allocation48_spill] sm:$0xff] %v6511_v34  ;;  %v1636_v25 = vmul.f32 %v6278_v12, %v6511_v34 }
 0x13e   :  { %5120 = vmatmul.mubr.msk.f32.gmra.mrb[70].mxu0 %vm1731_vm2, %v1634_v60 }
 0x13f   :  { %5122 = vmatprep.mubr.msk.f32.mxu0 %vm1731_vm2, %v1635_v8 }
 0x140   :  { %v6517_v37 = vpop.f32.mrb[44].mxu1 }
 0x141   :  { %9189 = vst [vmem:[#allocation49_spill] sm:$0xff] %v6517_v37  ;;  %v1641_v20 = vmul.f32 %v6517_v37, %v6333_v33  ;;  %v6521_v9 = vpop.f32.mrb[45].mxu1 }
 0x142   :  { %9190 = vst [vmem:[#allocation50_spill] sm:$0xff] %v6521_v9  ;;  %5123 = vmatmul.mubr.msk.f32.gmra.mrb[72].mxu0 %vm1731_vm2, %v1636_v25  ;;  %v1639_v51 = vmul.f32 %v6521_v9, %v6319_v28  ;;  %v6526_v17 = vpop.f32.mrb[46].mxu1 }
 0x143   :  { %9191 = vst [vmem:[#allocation51_spill] sm:$0xff] %v6526_v17  ;;  %5125 = vmatprep.mubr.msk.f32.mxu0 %vm1731_vm2, %v1637_v4  ;;  %v1642_v60 = vmul.f32 %v6526_v17, %v6326_v30  ;;  %v6531_v8 = vpop.f32.mrb[47].mxu1 }
 0x144   :  { %9192 = vst [vmem:[#allocation52_spill] sm:$0xff] %v6531_v8  ;;  %v1640_v57 = vmul.f32 %v6314_v26, %v6531_v8 }
 0x146   :  { %5126 = vmatmul.mubr.msk.f32.gmra.mrb[74].mxu0 %vm1731_vm2, %v1638_v32 }
 0x147   :  { %5128 = vmatprep.mubr.msk.f32.mxu0 %vm1731_vm2, %v1639_v51 }
 0x148   :  { %v6537_v25 = vpop.f32.mrb[48].mxu1 }
 0x149   :  { %9193 = vst [vmem:[#allocation53_spill] sm:$0xff] %v6537_v25  ;;  %v1645_v37 = vmul.f32 %v6537_v25, %v6365_v54  ;;  %v6541_v9 = vpop.f32.mrb[49].mxu1 }
 0x14a   :  { %9194 = vst [vmem:[#allocation54_spill] sm:$0xff] %v6541_v9  ;;  %5129 = vmatmul.mubr.msk.f32.gmra.mrb[76].mxu0 %vm1731_vm2, %v1640_v57  ;;  %v1643_v4 = vmul.f32 %v6541_v9, %v6352_v41  ;;  %v6546_v17 = vpop.f32.mrb[50].mxu1 }
 0x14b   :  { %9195 = vst [vmem:[#allocation55_spill] sm:$0xff] %v6546_v17  ;;  %5131 = vmatprep.mubr.msk.f32.mxu0 %vm1731_vm2, %v1641_v20  ;;  %v1646_v32 = vmul.f32 %v6546_v17, %v6358_v46  ;;  %v6551_v51 = vpop.f32.mrb[51].mxu1 }
 0x14c   :  { %9196 = vst [vmem:[#allocation56_spill] sm:$0xff] %v6551_v51  ;;  %v1644_v8 = vmul.f32 %v6347_v39, %v6551_v51 }
 0x14e   :  { %5132 = vmatmul.mubr.msk.f32.gmra.mrb[78].mxu0 %vm1731_vm2, %v1642_v60 }
 0x14f   :  { %5134 = vmatprep.mubr.msk.f32.mxu0 %vm1731_vm2, %v1643_v4 }
 0x150   :  { %v6557_v57 = vpop.f32.mrb[52].mxu1 }
 0x151   :  { %9197 = vst [vmem:[#allocation57_spill] sm:$0xff] %v6557_v57  ;;  %v1649_v25 = vmul.f32 %v6557_v57, %v6393_v18  ;;  %v6561_v9 = vpop.f32.mrb[53].mxu1 }
 0x152   :  { %9198 = vst [vmem:[#allocation58_spill] sm:$0xff] %v6561_v9  ;;  %5135 = vmatmul.mubr.msk.f32.gmra.mrb[80].mxu0 %vm1731_vm2, %v1644_v8  ;;  %v1647_v20 = vmul.f32 %v6561_v9, %v6381_v7  ;;  %v6566_v17 = vpop.f32.mrb[54].mxu1 }
 0x153   :  { %9199 = vst [vmem:[#allocation59_spill] sm:$0xff] %v6566_v17  ;;  %5137 = vmatprep.mubr.msk.f32.mxu0 %vm1731_vm2, %v1645_v37  ;;  %v1650_v60 = vmul.f32 %v6566_v17, %v6386_v10  ;;  %v6571_v4 = vpop.f32.mrb[55].mxu1 }
 0x154   :  { %9200 = vst [vmem:[#allocation60_spill] sm:$0xff] %v6571_v4  ;;  %v1648_v51 = vmul.f32 %v6376_v1, %v6571_v4 }
 0x156   :  { %5138 = vmatmul.mubr.msk.f32.gmra.mrb[82].mxu0 %vm1731_vm2, %v1646_v32 }
 0x157   :  { %5140 = vmatprep.mubr.msk.f32.mxu0 %vm1731_vm2, %v1647_v20 }
 0x158   :  { %v6577_v8 = vpop.f32.mrb[56].mxu1 }
 0x159   :  { %9201 = vst [vmem:[#allocation61_spill] sm:$0xff] %v6577_v8  ;;  %v1653_v57 = vmul.f32 %v6577_v8, %v6421_v58  ;;  %v6581_v9 = vpop.f32.mrb[57].mxu1 }
 0x15a   :  { %9202 = vst [vmem:[#allocation62_spill] sm:$0xff] %v6581_v9  ;;  %5141 = vmatmul.mubr.msk.f32.gmra.mrb[84].mxu0 %vm1731_vm2, %v1648_v51  ;;  %v1651_v37 = vmul.f32 %v6581_v9, %v6409_v35  ;;  %v6586_v17 = vpop.f32.mrb[58].mxu1 }
 0x15b   :  { %9203 = vst [vmem:[#allocation63_spill] sm:$0xff] %v6586_v17  ;;  %5143 = vmatprep.mubr.msk.f32.mxu0 %vm1731_vm2, %v1649_v25  ;;  %v1654_v32 = vmul.f32 %v6586_v17, %v6414_v40  ;;  %v6591_v20 = vpop.f32.mrb[59].mxu1 }
 0x15c   :  { %9204 = vst [vmem:[#allocation64_spill] sm:$0xff] %v6591_v20  ;;  %v1652_v4 = vmul.f32 %v6404_v29, %v6591_v20 }
 0x15e   :  { %5144 = vmatmul.mubr.msk.f32.gmra.mrb[86].mxu0 %vm1731_vm2, %v1650_v60 }
 0x15f   :  { %5146 = vmatprep.mubr.msk.f32.mxu0 %vm1731_vm2, %v1651_v37 }
 0x160   :  { %v6597_v51 = vpop.f32.mrb[60].mxu1 }
 0x161   :  { %9205 = vst [vmem:[#allocation65_spill] sm:$0xff] %v6597_v51  ;;  %v1657_v8 = vmul.f32 %v6597_v51, %v6451_v22  ;;  %v6601_v9 = vpop.f32.mrb[61].mxu1 }
 0x162   :  { %9206 = vst [vmem:[#allocation66_spill] sm:$0xff] %v6601_v9  ;;  %5147 = vmatmul.mubr.msk.f32.gmra.mrb[88].mxu0 %vm1731_vm2, %v1652_v4  ;;  %v1655_v25 = vmul.f32 %v6601_v9, %v6437_v24  ;;  %v6606_v17 = vpop.f32.mrb[62].mxu1 }
 0x163   :  { %9207 = vst [vmem:[#allocation67_spill] sm:$0xff] %v6606_v17  ;;  %5149 = vmatprep.mubr.msk.f32.mxu0 %vm1731_vm2, %v1653_v57  ;;  %v1658_v60 = vmul.f32 %v6606_v17, %v6442_v21  ;;  %v6611_v37 = vpop.f32.mrb[63].mxu1 }
 0x164   :  { %9208 = vst [vmem:[#allocation68_spill] sm:$0xff] %v6611_v37  ;;  %v1656_v20 = vmul.f32 %v6432_v27, %v6611_v37 }
 0x166   :  { %5150 = vmatmul.mubr.msk.f32.gmra.mrb[90].mxu0 %vm1731_vm2, %v1654_v32 }
 0x167   :  { %5152 = vmatprep.mubr.msk.f32.mxu0 %vm1731_vm2, %v1655_v25 }
 0x168   :  { %v6617_v4 = vpop.f32.mrb[64].mxu1 }
 0x169   :  { %9209 = vst [vmem:[#allocation69_spill] sm:$0xff] %v6617_v4  ;;  %v1661_v51 = vmul.f32 %v6617_v4, %v6225_v55  ;;  %v6621_v9 = vpop.f32.mrb[65].mxu1 }
 0x16a   :  { %9210 = vst [vmem:[#allocation70_spill] sm:$0xff] %v6621_v9  ;;  %5153 = vmatmul.mubr.msk.f32.gmra.mrb[92].mxu0 %vm1731_vm2, %v1656_v20  ;;  %v1659_v57 = vmul.f32 %v6621_v9, %v6212_v50  ;;  %v6626_v17 = vpop.f32.mrb[66].mxu1  ;;  %v3887_v20 = vld [vmem:[%s8857_s6 + $0x10] sm:$0xff] }
 0x16b   :  { %9211 = vst [vmem:[#allocation71_spill] sm:$0xff] %v6626_v17  ;;  %5155 = vmatprep.mubr.msk.f32.mxu0 %vm1731_vm2, %v1657_v8  ;;  %v1662_v32 = vmul.f32 %v6626_v17, %v6218_v52  ;;  %v6631_v25 = vpop.f32.mrb[67].mxu1  ;;  %v5346_v8 = vpack.c.bf16 %v3888_v3, %v3887_v20 }
 0x16c   :  { %9212 = vst [vmem:[#allocation72_spill] sm:$0xff] %v6631_v25  ;;  %v1660_v37 = vmul.f32 %v6208_v48, %v6631_v25 }
 0x16d   :  { %5347 = vmatprep.subr.bf16.mxu1 %v5346_v8 }
 0x16e   :  { %5156 = vmatmul.mubr.msk.f32.gmra.mrb[94].mxu0 %vm1731_vm2, %v1658_v60  ;;  %5349 = vmatpush3.bf16.msra.mxu1 %v5346_v8 }
 0x16f   :  { %5158 = vmatprep.mubr.msk.f32.mxu0 %vm1731_vm2, %v1659_v57 }
 0x170   :  { %v6643_v34 = vpop.f32.mrb[68].mxu1 }
 0x171   :  { %9213 = vst [vmem:[#allocation73_spill] sm:$0xff] %v6643_v34  ;;  %v1665_v11 = vmul.f32 %v6643_v34, %v6261_v5  ;;  %v6647_v36 = vpop.f32.mrb[69].mxu1 }
 0x172   :  { %9214 = vst [vmem:[#allocation74_spill] sm:$0xff] %v6647_v36  ;;  %5159 = vmatmul.mubr.msk.f32.gmra.mrb[96].mxu0 %vm1731_vm2, %v1660_v37  ;;  %v1663_v60 = vmul.f32 %v6647_v36, %v6247_v0  ;;  %v6652_v6 = vpop.f32.mrb[70].mxu1 }
 0x173   :  { %9215 = vst [vmem:[#allocation75_spill] sm:$0xff] %v6652_v6  ;;  %5161 = vmatprep.mubr.msk.f32.mxu0 %vm1731_vm2, %v1661_v51  ;;  %v1666_v3 = vmul.f32 %v6652_v6, %v6254_v2  ;;  %v6657_v57 = vpop.f32.mrb[71].mxu1 }
 0x174   :  { %9216 = vst [vmem:[#allocation76_spill] sm:$0xff] %v6657_v57  ;;  %v1664_v20 = vmul.f32 %v6242_v62, %v6657_v57 }
 0x176   :  { %5162 = vmatmul.mubr.msk.f32.gmra.mrb[98].mxu0 %vm1731_vm2, %v1662_v32 }
 0x177   :  { %5164 = vmatprep.mubr.msk.f32.mxu0 %vm1731_vm2, %v1663_v60 }
 0x178   :  { %v6663_v37 = vpop.f32.mrb[72].mxu1 }
 0x179   :  { %9217 = vst [vmem:[#allocation77_spill] sm:$0xff] %v6663_v37  ;;  %v1669_v8 = vmul.f32 %v6663_v37, %v6297_v19  ;;  %v6667_v23 = vpop.f32.mrb[73].mxu1 }
 0x17a   :  { %9218 = vst [vmem:[#allocation78_spill] sm:$0xff] %v6667_v23  ;;  %5165 = vmatmul.mubr.msk.f32.gmra.mrb[100].mxu0 %vm1731_vm2, %v1664_v20  ;;  %v1667_v51 = vmul.f32 %v6667_v23, %v6283_v14  ;;  %v6672_v6 = vpop.f32.mrb[74].mxu1 }
 0x17b   :  { %9219 = vst [vmem:[#allocation79_spill] sm:$0xff] %v6672_v6  ;;  %5167 = vmatprep.mubr.msk.f32.mxu0 %vm1731_vm2, %v1665_v11  ;;  %v1670_v32 = vmul.f32 %v6672_v6, %v6290_v16  ;;  %v6677_v60 = vpop.f32.mrb[75].mxu1 }
 0x17c   :  { %9220 = vst [vmem:[#allocation80_spill] sm:$0xff] %v6677_v60  ;;  %v1668_v59 = vmul.f32 %v6278_v12, %v6677_v60 }
 0x17e   :  { %5168 = vmatmul.mubr.msk.f32.gmra.mrb[102].mxu0 %vm1731_vm2, %v1666_v3 }
 0x17f   :  { %5170 = vmatprep.mubr.msk.f32.mxu0 %vm1731_vm2, %v1667_v51 }
 0x180   :  { %v6683_v20 = vpop.f32.mrb[76].mxu1 }
 0x181   :  { %9221 = vst [vmem:[#allocation81_spill] sm:$0xff] %v6683_v20  ;;  %v1673_v37 = vmul.f32 %v6683_v20, %v6333_v33  ;;  %v6687_v23 = vpop.f32.mrb[77].mxu1 }
 0x182   :  { %9222 = vst [vmem:[#allocation82_spill] sm:$0xff] %v6687_v23  ;;  %5171 = vmatmul.mubr.msk.f32.gmra.mrb[104].mxu0 %vm1731_vm2, %v1668_v59  ;;  %v1671_v11 = vmul.f32 %v6687_v23, %v6319_v28  ;;  %v6692_v6 = vpop.f32.mrb[78].mxu1 }
 0x183   :  { %9223 = vst [vmem:[#allocation83_spill] sm:$0xff] %v6692_v6  ;;  %5173 = vmatprep.mubr.msk.f32.mxu0 %vm1731_vm2, %v1669_v8  ;;  %v1674_v3 = vmul.f32 %v6692_v6, %v6326_v30  ;;  %v6697_v51 = vpop.f32.mrb[79].mxu1 }
 0x184   :  { %9224 = vst [vmem:[#allocation84_spill] sm:$0xff] %v6697_v51  ;;  %v1672_v60 = vmul.f32 %v6314_v26, %v6697_v51 }
 0x186   :  { %5174 = vmatmul.mubr.msk.f32.gmra.mrb[106].mxu0 %vm1731_vm2, %v1670_v32 }
 0x187   :  { %5176 = vmatprep.mubr.msk.f32.mxu0 %vm1731_vm2, %v1671_v11 }
 0x188   :  { %v6703_v59 = vpop.f32.mrb[80].mxu1 }
 0x189   :  { %9225 = vst [vmem:[#allocation85_spill] sm:$0xff] %v6703_v59  ;;  %v1677_v20 = vmul.f32 %v6703_v59, %v6365_v54  ;;  %v6707_v23 = vpop.f32.mrb[81].mxu1 }
 0x18a   :  { %9226 = vst [vmem:[#allocation86_spill] sm:$0xff] %v6707_v23  ;;  %5177 = vmatmul.mubr.msk.f32.gmra.mrb[108].mxu0 %vm1731_vm2, %v1672_v60  ;;  %v1675_v8 = vmul.f32 %v6707_v23, %v6352_v41  ;;  %v6712_v6 = vpop.f32.mrb[82].mxu1 }
 0x18b   :  { %9227 = vst [vmem:[#allocation87_spill] sm:$0xff] %v6712_v6  ;;  %5179 = vmatprep.mubr.msk.f32.mxu0 %vm1731_vm2, %v1673_v37  ;;  %v1678_v32 = vmul.f32 %v6712_v6, %v6358_v46  ;;  %v6717_v11 = vpop.f32.mrb[83].mxu1 }
 0x18c   :  { %9228 = vst [vmem:[#allocation88_spill] sm:$0xff] %v6717_v11  ;;  %v1676_v51 = vmul.f32 %v6347_v39, %v6717_v11 }
 0x18e   :  { %5180 = vmatmul.mubr.msk.f32.gmra.mrb[110].mxu0 %vm1731_vm2, %v1674_v3 }
 0x18f   :  { %5182 = vmatprep.mubr.msk.f32.mxu0 %vm1731_vm2, %v1675_v8 }
 0x190   :  { %v6723_v60 = vpop.f32.mrb[84].mxu1 }
 0x191   :  { %9229 = vst [vmem:[#allocation89_spill] sm:$0xff] %v6723_v60  ;;  %v1681_v59 = vmul.f32 %v6723_v60, %v6393_v18  ;;  %v6727_v23 = vpop.f32.mrb[85].mxu1 }
 0x192   :  { %9230 = vst [vmem:[#allocation90_spill] sm:$0xff] %v6727_v23  ;;  %5183 = vmatmul.mubr.msk.f32.gmra.mrb[112].mxu0 %vm1731_vm2, %v1676_v51  ;;  %v1679_v37 = vmul.f32 %v6727_v23, %v6381_v7  ;;  %v6732_v6 = vpop.f32.mrb[86].mxu1 }
 0x193   :  { %9231 = vst [vmem:[#allocation91_spill] sm:$0xff] %v6732_v6  ;;  %5185 = vmatprep.mubr.msk.f32.mxu0 %vm1731_vm2, %v1677_v20  ;;  %v1682_v3 = vmul.f32 %v6732_v6, %v6386_v10  ;;  %v6737_v8 = vpop.f32.mrb[87].mxu1 }
 0x194   :  { %9232 = vst [vmem:[#allocation92_spill] sm:$0xff] %v6737_v8  ;;  %v1680_v11 = vmul.f32 %v6376_v1, %v6737_v8 }
 0x196   :  { %5186 = vmatmul.mubr.msk.f32.gmra.mrb[114].mxu0 %vm1731_vm2, %v1678_v32 }
 0x197   :  { %5188 = vmatprep.mubr.msk.f32.mxu0 %vm1731_vm2, %v1679_v37 }
 0x198   :  { %v6743_v51 = vpop.f32.mrb[88].mxu1 }
 0x199   :  { %9233 = vst [vmem:[#allocation93_spill] sm:$0xff] %v6743_v51  ;;  %v1685_v60 = vmul.f32 %v6743_v51, %v6421_v58  ;;  %v6747_v23 = vpop.f32.mrb[89].mxu1 }
 0x19a   :  { %9234 = vst [vmem:[#allocation94_spill] sm:$0xff] %v6747_v23  ;;  %5189 = vmatmul.mubr.msk.f32.gmra.mrb[116].mxu0 %vm1731_vm2, %v1680_v11  ;;  %v1683_v20 = vmul.f32 %v6747_v23, %v6409_v35  ;;  %v6752_v6 = vpop.f32.mrb[90].mxu1 }
 0x19b   :  { %9235 = vst [vmem:[#allocation95_spill] sm:$0xff] %v6752_v6  ;;  %5191 = vmatprep.mubr.msk.f32.mxu0 %vm1731_vm2, %v1681_v59  ;;  %v1686_v32 = vmul.f32 %v6752_v6, %v6414_v40  ;;  %v6757_v37 = vpop.f32.mrb[91].mxu1 }
 0x19c   :  { %9236 = vst [vmem:[#allocation96_spill] sm:$0xff] %v6757_v37  ;;  %v1684_v8 = vmul.f32 %v6404_v29, %v6757_v37 }
 0x19e   :  { %5192 = vmatmul.mubr.msk.f32.gmra.mrb[118].mxu0 %vm1731_vm2, %v1682_v3 }
 0x19f   :  { %5194 = vmatprep.mubr.msk.f32.mxu0 %vm1731_vm2, %v1683_v20 }
 0x1a0   :  { %v6763_v11 = vpop.f32.mrb[92].mxu1 }
 0x1a1   :  { %9237 = vst [vmem:[#allocation97_spill] sm:$0xff] %v6763_v11  ;;  %v1689_v51 = vmul.f32 %v6763_v11, %v6451_v22  ;;  %v6767_v23 = vpop.f32.mrb[93].mxu1 }
 0x1a2   :  { %9238 = vst [vmem:[#allocation98_spill] sm:$0xff] %v6767_v23  ;;  %5195 = vmatmul.mubr.msk.f32.gmra.mrb[120].mxu0 %vm1731_vm2, %v1684_v8  ;;  %v1687_v59 = vmul.f32 %v6767_v23, %v6437_v24  ;;  %v6772_v6 = vpop.f32.mrb[94].mxu1 }
 0x1a3   :  { %9239 = vst [vmem:[#allocation99_spill] sm:$0xff] %v6772_v6  ;;  %5197 = vmatprep.mubr.msk.f32.mxu0 %vm1731_vm2, %v1685_v60  ;;  %v1690_v3 = vmul.f32 %v6772_v6, %v6442_v21  ;;  %v6777_v20 = vpop.f32.mrb[95].mxu1 }
 0x1a4   :  { %9240 = vst [vmem:[#allocation100_spill] sm:$0xff] %v6777_v20  ;;  %v1688_v37 = vmul.f32 %v6432_v27, %v6777_v20 }
 0x1a6   :  { %5198 = vmatmul.mubr.msk.f32.gmra.mrb[122].mxu0 %vm1731_vm2, %v1686_v32 }
 0x1a7   :  { %5200 = vmatprep.mubr.msk.f32.mxu0 %vm1731_vm2, %v1687_v59 }
 0x1a8   :  { %v6783_v8 = vpop.f32.mrb[96].mxu1 }
 0x1a9   :  { %9241 = vst [vmem:[#allocation101_spill] sm:$0xff] %v6783_v8  ;;  %v1693_v11 = vmul.f32 %v6783_v8, %v6225_v55  ;;  %v6787_v23 = vpop.f32.mrb[97].mxu1  ;;  %v3890_v55 = vld [vmem:[%s8857_s6 + $0x28] sm:$0xff] }
 0x1aa   :  { %9242 = vst [vmem:[#allocation102_spill] sm:$0xff] %v6787_v23  ;;  %5201 = vmatmul.mubr.msk.f32.gmra.mrb[124].mxu0 %vm1731_vm2, %v1688_v37  ;;  %v1691_v60 = vmul.f32 %v6787_v23, %v6212_v50  ;;  %v6792_v6 = vpop.f32.mrb[98].mxu1  ;;  %v3889_v50 = vld [vmem:[%s8857_s6 + $0x20] sm:$0xff] }
 0x1ab   :  { %9243 = vst [vmem:[#allocation103_spill] sm:$0xff] %v6792_v6  ;;  %5203 = vmatprep.mubr.msk.f32.mxu0 %vm1731_vm2, %v1689_v51  ;;  %v1694_v32 = vmul.f32 %v6792_v6, %v6218_v52  ;;  %v6797_v59 = vpop.f32.mrb[99].mxu1  ;;  %v5350_v52 = vpack.c.bf16 %v3890_v55, %v3889_v50 }
 0x1ac   :  { %9244 = vst [vmem:[#allocation104_spill] sm:$0xff] %v6797_v59  ;;  %v1692_v20 = vmul.f32 %v6208_v48, %v6797_v59 }
 0x1ad   :  { %5351 = vmatprep.subr.bf16.mxu1 %v5350_v52 }
 0x1ae   :  { %5204 = vmatmul.mubr.msk.f32.gmra.mrb[126].mxu0 %vm1731_vm2, %v1690_v3  ;;  %5353 = vmatpush3.bf16.msra.mxu1 %v5350_v52 }
 0x1af   :  { %5206 = vmatprep.mubr.msk.f32.mxu0 %vm1731_vm2, %v1691_v60 }
 0x1b0   :  { %v6809_v51 = vpop.f32.mrb[100].mxu1 }
 0x1b1   :  { %9245 = vst [vmem:[#allocation105_spill] sm:$0xff] %v6809_v51  ;;  %v1697_v37 = vmul.f32 %v6809_v51, %v6261_v5  ;;  %v6813_v34 = vpop.f32.mrb[101].mxu1 }
 0x1b2   :  { %9246 = vst [vmem:[#allocation106_spill] sm:$0xff] %v6813_v34  ;;  %5207 = vmatmul.mubr.msk.f32.gmra.mrb[128].mxu0 %vm1731_vm2, %v1692_v20  ;;  %v1695_v48 = vmul.f32 %v6813_v34, %v6247_v0  ;;  %v6818_v3 = vpop.f32.mrb[102].mxu1 }
 0x1b3   :  { %9247 = vst [vmem:[#allocation107_spill] sm:$0xff] %v6818_v3  ;;  %5209 = vmatprep.mubr.msk.f32.mxu0 %vm1731_vm2, %v1693_v11  ;;  %v1698_v60 = vmul.f32 %v6818_v3, %v6254_v2  ;;  %v6823_v31 = vpop.f32.mrb[103].mxu1 }
 0x1b4   :  { %9248 = vst [vmem:[#allocation108_spill] sm:$0xff] %v6823_v31  ;;  %v1696_v5 = vmul.f32 %v6242_v62, %v6823_v31 }
 0x1b6   :  { %5210 = vmatmul.mubr.msk.f32.gmra.mrb[130].mxu0 %vm1731_vm2, %v1694_v32 }
 0x1b7   :  { %5212 = vmatprep.mubr.msk.f32.mxu0 %vm1731_vm2, %v1695_v48 }
 0x1b8   :  { %v6829_v20 = vpop.f32.mrb[104].mxu1 }
 0x1b9   :  { %9249 = vst [vmem:[#allocation109_spill] sm:$0xff] %v6829_v20  ;;  %v1701_v0 = vmul.f32 %v6829_v20, %v6297_v19  ;;  %v6833_v11 = vpop.f32.mrb[105].mxu1 }
 0x1ba   :  { %9250 = vst [vmem:[#allocation110_spill] sm:$0xff] %v6833_v11  ;;  %5213 = vmatmul.mubr.msk.f32.gmra.mrb[132].mxu0 %vm1731_vm2, %v1696_v5  ;;  %v1699_v2 = vmul.f32 %v6833_v11, %v6283_v14  ;;  %v6838_v50 = vpop.f32.mrb[106].mxu1 }
 0x1bb   :  { %9251 = vst [vmem:[#allocation111_spill] sm:$0xff] %v6838_v50  ;;  %5215 = vmatprep.mubr.msk.f32.mxu0 %vm1731_vm2, %v1697_v37  ;;  %v1702_v62 = vmul.f32 %v6838_v50, %v6290_v16  ;;  %v6843_v32 = vpop.f32.mrb[107].mxu1 }
 0x1bc   :  { %9252 = vst [vmem:[#allocation112_spill] sm:$0xff] %v6843_v32  ;;  %v1700_v55 = vmul.f32 %v6278_v12, %v6843_v32 }
 0x1be   :  { %5216 = vmatmul.mubr.msk.f32.gmra.mrb[134].mxu0 %vm1731_vm2, %v1698_v60 }
 0x1bf   :  { %5218 = vmatprep.mubr.msk.f32.mxu0 %vm1731_vm2, %v1699_v2 }
 0x1c0   :  { %v6849_v19 = vpop.f32.mrb[108].mxu1 }
 0x1c1   :  { %9253 = vst [vmem:[#allocation113_spill] sm:$0xff] %v6849_v19  ;;  %v1705_v14 = vmul.f32 %v6849_v19, %v6333_v33  ;;  %v6853_v52 = vpop.f32.mrb[109].mxu1 }
 0x1c2   :  { %9254 = vst [vmem:[#allocation114_spill] sm:$0xff] %v6853_v52  ;;  %5219 = vmatmul.mubr.msk.f32.gmra.mrb[136].mxu0 %vm1731_vm2, %v1700_v55  ;;  %v1703_v16 = vmul.f32 %v6853_v52, %v6319_v28  ;;  %v6858_v37 = vpop.f32.mrb[110].mxu1 }
 0x1c3   :  { %9255 = vst [vmem:[#allocation115_spill] sm:$0xff] %v6858_v37  ;;  %5221 = vmatprep.mubr.msk.f32.mxu0 %vm1731_vm2, %v1701_v0  ;;  %v1706_v12 = vmul.f32 %v6858_v37, %v6326_v30  ;;  %v6863_v48 = vpop.f32.mrb[111].mxu1 }
 0x1c4   :  { %9256 = vst [vmem:[#allocation116_spill] sm:$0xff] %v6863_v48  ;;  %v1704_v60 = vmul.f32 %v6314_v26, %v6863_v48 }
 0x1c5   :  { %v6867_v33 = vpop.f32.mrb[32].mxu0 }
 0x1c6   :  { %v6869_v5 = vpop.f32.mrb[33].mxu0  ;;  %5222 = vmatmul.mubr.msk.f32.gmra.mrb[138].mxu0 %vm1731_vm2, %v1702_v62 }
 0x1c7   :  { %5224 = vmatprep.mubr.msk.f32.mxu0 %vm1731_vm2, %v1703_v16 }
 0x1c8   :  { %v6873_v28 = vpop.f32.mrb[112].mxu1 }
 0x1c9   :  { %9257 = vst [vmem:[#allocation117_spill] sm:$0xff] %v6873_v28  ;;  %v6875_v2 = vpop.f32.mrb[34].mxu0  ;;  %v1709_v30 = vmul.f32 %v6873_v28, %v6365_v54  ;;  %v6879_v0 = vpop.f32.mrb[113].mxu1 }
 0x1ca   :  { %9258 = vst [vmem:[#allocation118_spill] sm:$0xff] %v6879_v0  ;;  %v6881_v55 = vpop.f32.mrb[35].mxu0  ;;  %5225 = vmatmul.mubr.msk.f32.gmra.mrb[140].mxu0 %vm1731_vm2, %v1704_v60  ;;  %v1707_v26 = vmul.f32 %v6879_v0, %v6352_v41  ;;  %v6886_v37 = vpop.f32.mrb[114].mxu1 }
 0x1cb   :  { %9259 = vst [vmem:[#allocation119_spill] sm:$0xff] %v6886_v37  ;;  %5227 = vmatprep.mubr.msk.f32.mxu0 %vm1731_vm2, %v1705_v14  ;;  %v1710_v62 = vmul.f32 %v6886_v37, %v6358_v46  ;;  %v6891_v16 = vpop.f32.mrb[115].mxu1 }
 0x1cc   :  { %9260 = vst [vmem:[#allocation120_spill] sm:$0xff] %v6891_v16  ;;  %v1708_v54 = vmul.f32 %v6347_v39, %v6891_v16 }
 0x1cd   :  { %v6895_v28 = vpop.f32.mrb[36].mxu0 }
 0x1ce   :  { %v6897_v19 = vpop.f32.mrb[37].mxu0  ;;  %5228 = vmatmul.mubr.msk.f32.gmra.mrb[142].mxu0 %vm1731_vm2, %v1706_v12 }
 0x1cf   :  { %5230 = vmatprep.mubr.msk.f32.mxu0 %vm1731_vm2, %v1707_v26 }
 0x1d0   :  { %v6901_v41 = vpop.f32.mrb[116].mxu1 }
 0x1d1   :  { %9261 = vst [vmem:[#allocation121_spill] sm:$0xff] %v6901_v41  ;;  %v6903_v14 = vpop.f32.mrb[38].mxu0  ;;  %v1713_v46 = vmul.f32 %v6901_v41, %v6393_v18  ;;  %v6907_v60 = vpop.f32.mrb[117].mxu1 }
 0x1d2   :  { %9262 = vst [vmem:[#allocation122_spill] sm:$0xff] %v6907_v60  ;;  %v6909_v37 = vpop.f32.mrb[39].mxu0  ;;  %5231 = vmatmul.mubr.msk.f32.gmra.mrb[144].mxu0 %vm1731_vm2, %v1708_v54  ;;  %v1711_v39 = vmul.f32 %v6907_v60, %v6381_v7  ;;  %v6914_v12 = vpop.f32.mrb[118].mxu1  ;;  %v6929_v7 = vstv %s2821_s28 }
 0x1d3   :  { %9263 = vst [vmem:[#allocation123_spill] sm:$0xff] %v6914_v12  ;;  %5233 = vmatprep.mubr.msk.f32.mxu0 %vm1731_vm2, %v1709_v30  ;;  %v1714_v26 = vmul.f32 %v6914_v12, %v6386_v10  ;;  %v6919_v16 = vpop.f32.mrb[119].mxu1  ;;  %v7050_v53 = vadd.f32 %v6867_v33, %v6929_v7  ;;  %v7057_v31 = vadd.f32 %v6929_v7, %v6869_v5 }
 0x1d4   :  { %9264 = vst [vmem:[#allocation124_spill] sm:$0xff] %v6919_v16  ;;  %v1712_v18 = vmul.f32 %v6376_v1, %v6919_v16  ;;  %v7068_v33 = vadd.f32 %v6875_v2, %v6929_v7  ;;  %v7075_v5 = vadd.f32 %v6929_v7, %v6881_v55  ;;  %v7086_v2 = vadd.f32 %v6895_v28, %v6929_v7 }
 0x1d5   :  { %v6923_v41 = vpop.f32.mrb[40].mxu0  ;;  %9290 = vst [vmem:[#allocation150_spill] sm:$0xff] %v7057_v31  ;;  %v7093_v55 = vadd.f32 %v6929_v7, %v6897_v19  ;;  %v7104_v28 = vadd.f32 %v6903_v14, %v6929_v7  ;;  %v7111_v19 = vadd.f32 %v6929_v7, %v6909_v37 }
 0x1d6   :  { %v6925_v0 = vpop.f32.mrb[41].mxu0  ;;  %5234 = vmatmul.mubr.msk.f32.gmra.mrb[146].mxu0 %vm1731_vm2, %v1710_v62  ;;  %9293 = vst [vmem:[#allocation153_spill] sm:$0xff] %v7075_v5  ;;  %v7122_v14 = vadd.f32 %v6923_v41, %v6929_v7 }
 0x1d7   :  { %5236 = vmatprep.mubr.msk.f32.mxu0 %vm1731_vm2, %v1711_v39  ;;  %9296 = vst [vmem:[#allocation156_spill] sm:$0xff] %v7093_v55  ;;  %9299 = vst [vmem:[#allocation159_spill] sm:$0xff] %v7111_v19  ;;  %v7129_v37 = vadd.f32 %v6929_v7, %v6925_v0 }
 0x1d8   :  { %v6931_v54 = vpop.f32.mrb[120].mxu1 }
 0x1d9   :  { %9265 = vst [vmem:[#allocation125_spill] sm:$0xff] %v6931_v54  ;;  %v5079_v30 = vpop.f32.mrb[42].mxu0  ;;  %v1717_v10 = vmul.f32 %v6931_v54, %v6421_v58  ;;  %v6938_v1 = vpop.f32.mrb[121].mxu1  ;;  %9302 = vst [vmem:[#allocation162_spill] sm:$0xff] %v7129_v37 }
 0x1da   :  { %v6936_v12 = vadd.f32 %v5079_v30, %v6929_v7  ;;  %9266 = vst [vmem:[#allocation126_spill] sm:$0xff] %v6938_v1  ;;  %v2232_v16 = vpop.f32.mrb[43].mxu0  ;;  %5237 = vmatmul.mubr.msk.f32.gmra.mrb[148].mxu0 %vm1731_vm2, %v1712_v18  ;;  %v1715_v62 = vmul.f32 %v6938_v1, %v6409_v35  ;;  %v6946_v60 = vpop.f32.mrb[122].mxu1 }
 0x1db   :  { %v6944_v39 = vadd.f32 %v6929_v7, %v2232_v16  ;;  %9268 = vst [vmem:[#allocation128_spill] sm:$0xff] %v6946_v60  ;;  %5239 = vmatprep.mubr.msk.f32.mxu0 %vm1731_vm2, %v1713_v46  ;;  %v1718_v58 = vmul.f32 %v6946_v60, %v6414_v40  ;;  %v6951_v30 = vpop.f32.mrb[123].mxu1 }
 0x1dc   :  { %9269 = vst [vmem:[#allocation129_spill] sm:$0xff] %v6951_v30  ;;  %v1716_v54 = vmul.f32 %v6404_v29, %v6951_v30 }
 0x1dd   :  { %9267 = vst [vmem:[#allocation127_spill] sm:$0xff] %v6944_v39  ;;  %v5082_v48 = vpop.f32.mrb[44].mxu0 }
 0x1de   :  { %v6956_v18 = vadd.f32 %v5082_v48, %v6929_v7  ;;  %v2242_v35 = vpop.f32.mrb[45].mxu0  ;;  %5240 = vmatmul.mubr.msk.f32.gmra.mrb[150].mxu0 %vm1731_vm2, %v1714_v26 }
 0x1df   :  { %v6960_v16 = vadd.f32 %v6929_v7, %v2242_v35  ;;  %5242 = vmatprep.mubr.msk.f32.mxu0 %vm1731_vm2, %v1715_v62 }
 0x1e0   :  { %v6963_v46 = vpop.f32.mrb[124].mxu1 }
 0x1e1   :  { %9270 = vst [vmem:[#allocation130_spill] sm:$0xff] %v6960_v16  ;;  %9271 = vst [vmem:[#allocation131_spill] sm:$0xff] %v6963_v46  ;;  %v5085_v40 = vpop.f32.mrb[46].mxu0  ;;  %v1721_v60 = vmul.f32 %v6963_v46, %v6451_v22  ;;  %v6970_v30 = vpop.f32.mrb[125].mxu1 }
 0x1e2   :  { %v6968_v29 = vadd.f32 %v5085_v40, %v6929_v7  ;;  %9272 = vst [vmem:[#allocation132_spill] sm:$0xff] %v6970_v30  ;;  %v2252_v48 = vpop.f32.mrb[47].mxu0  ;;  %5243 = vmatmul.mubr.msk.f32.gmra.mrb[152].mxu0 %vm1731_vm2, %v1716_v54  ;;  %v1719_v26 = vmul.f32 %v6970_v30, %v6437_v24  ;;  %v6978_v62 = vpop.f32.mrb[126].mxu1 }
 0x1e3   :  { %v6976_v35 = vadd.f32 %v6929_v7, %v2252_v48  ;;  %9274 = vst [vmem:[#allocation134_spill] sm:$0xff] %v6978_v62  ;;  %5245 = vmatprep.mubr.msk.f32.mxu0 %vm1731_vm2, %v1717_v10  ;;  %v1722_v22 = vmul.f32 %v6978_v62, %v6442_v21  ;;  %v6983_v40 = vpop.f32.mrb[127].mxu1 }
 0x1e4   :  { %9275 = vst [vmem:[#allocation135_spill] sm:$0xff] %v6983_v40  ;;  %v1720_v46 = vmul.f32 %v6432_v27, %v6983_v40 }
 0x1e5   :  { %9273 = vst [vmem:[#allocation133_spill] sm:$0xff] %v6976_v35  ;;  %v5088_v1 = vpop.f32.mrb[48].mxu0 }
 0x1e6   :  { %v6988_v54 = vadd.f32 %v5088_v1, %v6929_v7  ;;  %v2262_v24 = vpop.f32.mrb[49].mxu0  ;;  %5246 = vmatmul.mubr.msk.f32.gmra.mrb[154].mxu0 %vm1731_vm2, %v1718_v58 }
 0x1e7   :  { %v6992_v48 = vadd.f32 %v6929_v7, %v2262_v24  ;;  %5248 = vmatprep.mubr.msk.f32.mxu0 %vm1731_vm2, %v1719_v26 }
 0x1e9   :  { %9276 = vst [vmem:[#allocation136_spill] sm:$0xff] %v6992_v48  ;;  %v5091_v10 = vpop.f32.mrb[50].mxu0 }
 0x1ea   :  { %v6996_v21 = vadd.f32 %v5091_v10, %v6929_v7  ;;  %v2272_v62 = vpop.f32.mrb[51].mxu0  ;;  %5249 = vmatmul.mubr.msk.f32.gmra.mrb[156].mxu0 %vm1731_vm2, %v1720_v46  ;;  %v3891_v10 = vld [vmem:[%s8857_s6 + $0x30] sm:$0xff]  ;;  %v3892_v46 = vld [vmem:[%s8857_s6 + $0x38] sm:$0xff]  ;;  %s4547_s6 = sld [smem:[#allocation2 + $0x1]] }
 0x1eb   :  { %v7000_v27 = vadd.f32 %v6929_v7, %v2272_v62  ;;  %5251 = vmatprep.mubr.msk.f32.mxu0 %vm1731_vm2, %v1721_v60  ;;  %v5354_v60 = vpack.c.bf16 %v3892_v46, %v3891_v10 }
 0x1ed   :  { %9277 = vst [vmem:[#allocation137_spill] sm:$0xff] %v7000_v27  ;;  %v5094_v1 = vpop.f32.mrb[52].mxu0  ;;  %5355 = vmatprep.subr.bf16.mxu1 %v5354_v60 }
 0x1ee   :  { %v7004_v58 = vadd.f32 %v5094_v1, %v6929_v7  ;;  %v2282_v24 = vpop.f32.mrb[53].mxu0  ;;  %5252 = vmatmul.mubr.msk.f32.gmra.mrb[158].mxu0 %vm1731_vm2, %v1722_v22  ;;  %5357 = vmatpush3.bf16.msra.mxu1 %v5354_v60 }
 0x1ef   :  { %v7008_v26 = vadd.f32 %v6929_v7, %v2282_v24 }
 0x1f0   :  { %v7046_v51 = vstv %s4547_s6 }
 0x1f1   :  { %9278 = vst [vmem:[#allocation138_spill] sm:$0xff] %v7008_v26  ;;  %v5097_v62 = vpop.f32.mrb[54].mxu0 }
 0x1f2   :  { %v7017_v40 = vadd.f32 %v5097_v62, %v6929_v7  ;;  %v2292_v1 = vpop.f32.mrb[55].mxu0 }
 0x1f3   :  { %v7020_v30 = vadd.f32 %v6929_v7, %v2292_v1 }
 0x1f4   :  { %9279 = vst [vmem:[#allocation139_spill] sm:$0xff] %v7017_v40 }
 0x1f5   :  { %9280 = vst [vmem:[#allocation140_spill] sm:$0xff] %v7020_v30  ;;  %v5100_v22 = vpop.f32.mrb[56].mxu0 }
 0x1f6   :  { %v7023_v24 = vadd.f32 %v5100_v22, %v6929_v7  ;;  %v2302_v52 = vpop.f32.mrb[57].mxu0 }
 0x1f7   :  { %v7026_v50 = vadd.f32 %v6929_v7, %v2302_v52 }
 0x1f8   :  { %9281 = vst [vmem:[#allocation141_spill] sm:$0xff] %v7023_v24 }
 0x1f9   :  { %9282 = vst [vmem:[#allocation142_spill] sm:$0xff] %v7026_v50  ;;  %v5103_v20 = vpop.f32.mrb[58].mxu0 }
 0x1fa   :  { %v7029_v10 = vadd.f32 %v5103_v20, %v6929_v7  ;;  %v2312_v46 = vpop.f32.mrb[59].mxu0 }
 0x1fb   :  { %v7032_v62 = vadd.f32 %v6929_v7, %v2312_v46 }
 0x1fc   :  { %9283 = vst [vmem:[#allocation143_spill] sm:$0xff] %v7029_v10 }
 0x1fd   :  { %9284 = vst [vmem:[#allocation144_spill] sm:$0xff] %v7032_v62  ;;  %v5106_v1 = vpop.f32.mrb[60].mxu0 }
 0x1fe   :  { %v7035_v60 = vadd.f32 %v5106_v1, %v6929_v7  ;;  %v2322_v32 = vpop.f32.mrb[61].mxu0 }
 0x1ff   :  { %v7038_v22 = vadd.f32 %v6929_v7, %v2322_v32 }
 0x200   :  { %9285 = vst [vmem:[#allocation145_spill] sm:$0xff] %v7035_v60 }
 0x201   :  { %9286 = vst [vmem:[#allocation146_spill] sm:$0xff] %v7038_v22  ;;  %v5109_v11 = vpop.f32.mrb[62].mxu0 }
 0x202   :  { %v7041_v52 = vadd.f32 %v5109_v11, %v6929_v7  ;;  %v2332_v3 = vpop.f32.mrb[63].mxu0 }
 0x203   :  { %v7044_v20 = vadd.f32 %v6929_v7, %v2332_v3 }
 0x204   :  { %9287 = vst [vmem:[#allocation147_spill] sm:$0xff] %v7041_v52 }
 0x205   :  { %9288 = vst [vmem:[#allocation148_spill] sm:$0xff] %v7044_v20  ;;  %v5112_v46 = vpop.f32.mrb[64].mxu0 }
 0x206   :  { %v7053_v1 = vadd.f32 %v5112_v46, %v7046_v51  ;;  %v2342_v32 = vpop.f32.mrb[65].mxu0 }
 0x207   :  { %v7060_v11 = vadd.f32 %v7046_v51, %v2342_v32 }
 0x208   :  { %9289 = vst [vmem:[#allocation149_spill] sm:$0xff] %v7053_v1 }
 0x209   :  { %9291 = vst [vmem:[#allocation151_spill] sm:$0xff] %v7060_v11  ;;  %v5115_v44 = vpop.f32.mrb[66].mxu0 }
 0x20a   :  { %v7071_v46 = vadd.f32 %v5115_v44, %v7046_v51  ;;  %v2352_v61 = vpop.f32.mrb[67].mxu0 }
 0x20b   :  { %v7078_v32 = vadd.f32 %v7046_v51, %v2352_v61 }
 0x20c   :  { %9292 = vst [vmem:[#allocation152_spill] sm:$0xff] %v7071_v46 }
 0x20d   :  { %9294 = vst [vmem:[#allocation154_spill] sm:$0xff] %v7078_v32  ;;  %v5118_v34 = vpop.f32.mrb[68].mxu0 }
 0x20e   :  { %v7089_v44 = vadd.f32 %v5118_v34, %v7046_v51  ;;  %v2362_v36 = vpop.f32.mrb[69].mxu0 }
 0x20f   :  { %v7096_v61 = vadd.f32 %v7046_v51, %v2362_v36 }
 0x210   :  { %9295 = vst [vmem:[#allocation155_spill] sm:$0xff] %v7089_v44 }
 0x211   :  { %9297 = vst [vmem:[#allocation157_spill] sm:$0xff] %v7096_v61  ;;  %v5121_v38 = vpop.f32.mrb[70].mxu0 }
 0x212   :  { %v7107_v34 = vadd.f32 %v5121_v38, %v7046_v51  ;;  %v2372_v56 = vpop.f32.mrb[71].mxu0 }
 0x213   :  { %v7114_v36 = vadd.f32 %v7046_v51, %v2372_v56 }
 0x214   :  { %9298 = vst [vmem:[#allocation158_spill] sm:$0xff] %v7107_v34 }
 0x215   :  { %9300 = vst [vmem:[#allocation160_spill] sm:$0xff] %v7114_v36  ;;  %v5124_v6 = vpop.f32.mrb[72].mxu0 }
 0x216   :  { %v7125_v38 = vadd.f32 %v5124_v6, %v7046_v51  ;;  %v2382_v17 = vpop.f32.mrb[73].mxu0 }
 0x217   :  { %v7132_v56 = vadd.f32 %v7046_v51, %v2382_v17 }
 0x218   :  { %9301 = vst [vmem:[#allocation161_spill] sm:$0xff] %v7125_v38 }
 0x219   :  { %9303 = vst [vmem:[#allocation163_spill] sm:$0xff] %v7132_v56  ;;  %v5127_v63 = vpop.f32.mrb[74].mxu0 }
 0x21a   :  { %v7139_v41 = vadd.f32 %v5127_v63, %v7046_v51  ;;  %v2392_v6 = vpop.f32.mrb[75].mxu0 }
 0x21b   :  { %v7142_v45 = vadd.f32 %v7046_v51, %v2392_v6 }
 0x21c   :  { %9304 = vst [vmem:[#allocation164_spill] sm:$0xff] %v7139_v41 }
 0x21d   :  { %9305 = vst [vmem:[#allocation165_spill] sm:$0xff] %v7142_v45  ;;  %v5130_v7 = vpop.f32.mrb[76].mxu0 }
 0x21e   :  { %v7149_v3 = vadd.f32 %v5130_v7, %v7046_v51  ;;  %v2402_v8 = vpop.f32.mrb[77].mxu0 }
 0x21f   :  { %v7152_v57 = vadd.f32 %v7046_v51, %v2402_v8 }
 0x220   :  { %9306 = vst [vmem:[#allocation166_spill] sm:$0xff] %v7149_v3 }
 0x221   :  { %9307 = vst [vmem:[#allocation167_spill] sm:$0xff] %v7152_v57  ;;  %v5133_v4 = vpop.f32.mrb[78].mxu0 }
 0x222   :  { %v7159_v0 = vadd.f32 %v5133_v4, %v7046_v51  ;;  %v2412_v13 = vpop.f32.mrb[79].mxu0 }
 0x223   :  { %v7162_v17 = vadd.f32 %v7046_v51, %v2412_v13 }
 0x224   :  { %9308 = vst [vmem:[#allocation168_spill] sm:$0xff] %v7159_v0 }
 0x225   :  { %9309 = vst [vmem:[#allocation169_spill] sm:$0xff] %v7162_v17  ;;  %v5136_v42 = vpop.f32.mrb[80].mxu0 }
 0x226   :  { %v7169_v63 = vadd.f32 %v5136_v42, %v7046_v51  ;;  %v2422_v23 = vpop.f32.mrb[81].mxu0 }
 0x227   :  { %v7172_v6 = vadd.f32 %v7046_v51, %v2422_v23 }
 0x228   :  { %9310 = vst [vmem:[#allocation170_spill] sm:$0xff] %v7169_v63 }
 0x229   :  { %9311 = vst [vmem:[#allocation171_spill] sm:$0xff] %v7172_v6  ;;  %v5139_v9 = vpop.f32.mrb[82].mxu0 }
 0x22a   :  { %v7179_v7 = vadd.f32 %v5139_v9, %v7046_v51  ;;  %v2432_v49 = vpop.f32.mrb[83].mxu0 }
 0x22b   :  { %v7182_v8 = vadd.f32 %v7046_v51, %v2432_v49 }
 0x22c   :  { %9312 = vst [vmem:[#allocation172_spill] sm:$0xff] %v7179_v7 }
 0x22d   :  { %9313 = vst [vmem:[#allocation173_spill] sm:$0xff] %v7182_v8  ;;  %v5142_v43 = vpop.f32.mrb[84].mxu0 }
 0x22e   :  { %v7189_v4 = vadd.f32 %v5142_v43, %v7046_v51  ;;  %v2442_v59 = vpop.f32.mrb[85].mxu0 }
 0x22f   :  { %v7192_v13 = vadd.f32 %v7046_v51, %v2442_v59 }
 0x230   :  { %9314 = vst [vmem:[#allocation174_spill] sm:$0xff] %v7189_v4 }
 0x231   :  { %9315 = vst [vmem:[#allocation175_spill] sm:$0xff] %v7192_v13  ;;  %v5145_v25 = vpop.f32.mrb[86].mxu0 }
 0x232   :  { %v7199_v42 = vadd.f32 %v5145_v25, %v7046_v51  ;;  %v2452_v15 = vpop.f32.mrb[87].mxu0 }
 0x233   :  { %v7202_v23 = vadd.f32 %v7046_v51, %v2452_v15 }
 0x234   :  { %9316 = vst [vmem:[#allocation176_spill] sm:$0xff] %v7199_v42 }
 0x235   :  { %9317 = vst [vmem:[#allocation177_spill] sm:$0xff] %v7202_v23  ;;  %v5148_v47 = vpop.f32.mrb[88].mxu0 }
 0x236   :  { %v7209_v9 = vadd.f32 %v5148_v47, %v7046_v51  ;;  %v2462_v4 = vpop.f32.mrb[89].mxu0 }
 0x237   :  { %v7212_v49 = vadd.f32 %v7046_v51, %v2462_v4 }
 0x238   :  { %9318 = vst [vmem:[#allocation178_spill] sm:$0xff] %v7209_v9 }
 0x239   :  { %9319 = vst [vmem:[#allocation179_spill] sm:$0xff] %v7212_v49  ;;  %v5151_v13 = vpop.f32.mrb[90].mxu0 }
 0x23a   :  { %v7219_v43 = vadd.f32 %v5151_v13, %v7046_v51  ;;  %v2472_v42 = vpop.f32.mrb[91].mxu0 }
 0x23b   :  { %v7222_v59 = vadd.f32 %v7046_v51, %v2472_v42 }
 0x23c   :  { %9320 = vst [vmem:[#allocation180_spill] sm:$0xff] %v7219_v43 }
 0x23d   :  { %9321 = vst [vmem:[#allocation181_spill] sm:$0xff] %v7222_v59  ;;  %v5154_v23 = vpop.f32.mrb[92].mxu0 }
 0x23e   :  { %v7229_v25 = vadd.f32 %v5154_v23, %v7046_v51  ;;  %v2482_v15 = vpop.f32.mrb[93].mxu0  ;;  %v7244_v23 = vstv %s4548_s0 }
 0x23f   :  { %v7232_v49 = vadd.f32 %v7046_v51, %v2482_v15  ;;  %v9328_v15 = vmax.f32 %v7057_v31, %v7060_v11  ;;  %v9331_v11 = vmax.f32 %v7075_v5, %v7078_v32  ;;  %v9334_v32 = vmax.f32 %v7093_v55, %v7096_v61 }
 0x240   :  { %9322 = vst [vmem:[#allocation182_spill] sm:$0xff] %v7229_v25  ;;  %v9337_v61 = vmax.f32 %v7111_v19, %v7114_v36  ;;  %v9340_v36 = vmax.f32 %v7129_v37, %v7132_v56  ;;  %v9343_v56 = vmax.f32 %v6944_v39, %v7142_v45  ;;  %v9346_v45 = vmax.f32 %v6960_v16, %v7152_v57 }
 0x241   :  { %9323 = vst [vmem:[#allocation183_spill] sm:$0xff] %v7232_v49  ;;  %v5157_v50 = vpop.f32.mrb[94].mxu0  ;;  %v9349_v57 = vmax.f32 %v6976_v35, %v7162_v17  ;;  %v9352_v17 = vmax.f32 %v6992_v48, %v7172_v6  ;;  %v9357_v6 = vmax.f32 %v7000_v27, %v7182_v8 }
 0x242   :  { %v7239_v47 = vadd.f32 %v5157_v50, %v7046_v51  ;;  %v2492_v43 = vpop.f32.mrb[95].mxu0 }
 0x243   :  { %v7242_v4 = vadd.f32 %v7046_v51, %v2492_v43  ;;  %v9327_v51 = vmax.f32 %v7050_v53, %v7053_v1  ;;  %v9330_v1 = vmax.f32 %v7068_v33, %v7071_v46  ;;  %v9333_v46 = vmax.f32 %v7086_v2, %v7089_v44 }
 0x244   :  { %9324 = vst [vmem:[#allocation184_spill] sm:$0xff] %v7239_v47  ;;  %v9336_v44 = vmax.f32 %v7104_v28, %v7107_v34  ;;  %v9339_v34 = vmax.f32 %v7122_v14, %v7125_v38  ;;  %v9342_v38 = vmax.f32 %v6936_v12, %v7139_v41  ;;  %v9345_v41 = vmax.f32 %v6956_v18, %v7149_v3 }
 0x245   :  { %9325 = vst [vmem:[#allocation185_spill] sm:$0xff] %v7242_v4  ;;  %v5160_v13 = vpop.f32.mrb[96].mxu0  ;;  %v9348_v3 = vmax.f32 %v6968_v29, %v7159_v0  ;;  %v9351_v0 = vmax.f32 %v6988_v54, %v7169_v63  ;;  %v9356_v63 = vmax.f32 %v6996_v21, %v7179_v7 }
 0x246   :  { %v7251_v25 = vadd.f32 %v5160_v13, %v7244_v23  ;;  %v2502_v42 = vpop.f32.mrb[97].mxu0 }
 0x247   :  { %v7254_v50 = vadd.f32 %v7244_v23, %v2502_v42 }
 0x248   :  { %v7260_v43 = vmax.f32 %v9327_v51, %v7251_v25 }
 0x249   :  { %9326 = vst [vmem:[#allocation186_spill] sm:$0xff] %v7254_v50  ;;  %v7266_v47 = vmax.f32 %v9328_v15, %v7254_v50  ;;  %v5163_v59 = vpop.f32.mrb[98].mxu0 }
 0x24a   :  { %v7269_v13 = vadd.f32 %v5163_v59, %v7244_v23  ;;  %v2512_v4 = vpop.f32.mrb[99].mxu0 }
 0x24b   :  { %v7272_v42 = vadd.f32 %v7244_v23, %v2512_v4 }
 0x24c   :  { %v7278_v51 = vmax.f32 %v9330_v1, %v7269_v13 }
 0x24d   :  { %9329 = vst [vmem:[#allocation187_spill] sm:$0xff] %v7272_v42  ;;  %v7284_v15 = vmax.f32 %v9331_v11, %v7272_v42  ;;  %v5166_v50 = vpop.f32.mrb[100].mxu0 }
 0x24e   :  { %v7287_v59 = vadd.f32 %v5166_v50, %v7244_v23  ;;  %v2522_v31 = vpop.f32.mrb[101].mxu0 }
 0x24f   :  { %v7290_v4 = vadd.f32 %v7244_v23, %v2522_v31 }
 0x250   :  { %v7296_v1 = vmax.f32 %v9333_v46, %v7287_v59 }
 0x251   :  { %9332 = vst [vmem:[#allocation188_spill] sm:$0xff] %v7290_v4  ;;  %v7302_v11 = vmax.f32 %v9334_v32, %v7290_v4  ;;  %v5169_v42 = vpop.f32.mrb[102].mxu0 }
 0x252   :  { %v7305_v50 = vadd.f32 %v5169_v42, %v7244_v23  ;;  %v2532_v5 = vpop.f32.mrb[103].mxu0 }
 0x253   :  { %v7308_v31 = vadd.f32 %v7244_v23, %v2532_v5 }
 0x254   :  { %v7314_v46 = vmax.f32 %v9336_v44, %v7305_v50 }
 0x255   :  { %9335 = vst [vmem:[#allocation189_spill] sm:$0xff] %v7308_v31  ;;  %v7320_v32 = vmax.f32 %v9337_v61, %v7308_v31  ;;  %v5172_v4 = vpop.f32.mrb[104].mxu0 }
 0x256   :  { %v7323_v42 = vadd.f32 %v5172_v4, %v7244_v23  ;;  %v2542_v55 = vpop.f32.mrb[105].mxu0 }
 0x257   :  { %v7326_v5 = vadd.f32 %v7244_v23, %v2542_v55 }
 0x258   :  { %v7332_v44 = vmax.f32 %v9339_v34, %v7323_v42 }
 0x259   :  { %9338 = vst [vmem:[#allocation190_spill] sm:$0xff] %v7326_v5  ;;  %v7338_v61 = vmax.f32 %v9340_v36, %v7326_v5  ;;  %v5175_v31 = vpop.f32.mrb[106].mxu0 }
 0x25a   :  { %v7341_v4 = vadd.f32 %v5175_v31, %v7244_v23  ;;  %v2552_v19 = vpop.f32.mrb[107].mxu0 }
 0x25b   :  { %v7344_v55 = vadd.f32 %v7244_v23, %v2552_v19 }
 0x25c   :  { %v7350_v34 = vmax.f32 %v9342_v38, %v7341_v4 }
 0x25d   :  { %9341 = vst [vmem:[#allocation191_spill] sm:$0xff] %v7344_v55  ;;  %v7356_v36 = vmax.f32 %v9343_v56, %v7344_v55  ;;  %v5178_v5 = vpop.f32.mrb[108].mxu0 }
 0x25e   :  { %v7359_v31 = vadd.f32 %v5178_v5, %v7244_v23  ;;  %v2562_v37 = vpop.f32.mrb[109].mxu0 }
 0x25f   :  { %v7362_v19 = vadd.f32 %v7244_v23, %v2562_v37 }
 0x260   :  { %v7368_v38 = vmax.f32 %v9345_v41, %v7359_v31 }
 0x261   :  { %9344 = vst [vmem:[#allocation192_spill] sm:$0xff] %v7362_v19  ;;  %v7374_v56 = vmax.f32 %v9346_v45, %v7362_v19  ;;  %v5181_v55 = vpop.f32.mrb[110].mxu0 }
 0x262   :  { %v7377_v5 = vadd.f32 %v5181_v55, %v7244_v23  ;;  %v2572_v39 = vpop.f32.mrb[111].mxu0 }
 0x263   :  { %v7380_v37 = vadd.f32 %v7244_v23, %v2572_v39 }
 0x264   :  { %v7386_v41 = vmax.f32 %v9348_v3, %v7377_v5 }
 0x265   :  { %9347 = vst [vmem:[#allocation193_spill] sm:$0xff] %v7380_v37  ;;  %v7392_v45 = vmax.f32 %v9349_v57, %v7380_v37  ;;  %v5184_v19 = vpop.f32.mrb[112].mxu0 }
 0x266   :  { %v7395_v55 = vadd.f32 %v5184_v19, %v7244_v23  ;;  %v2582_v16 = vpop.f32.mrb[113].mxu0 }
 0x267   :  { %v7398_v39 = vadd.f32 %v7244_v23, %v2582_v16 }
 0x268   :  { %v7404_v3 = vmax.f32 %v9351_v0, %v7395_v55 }
 0x269   :  { %9350 = vst [vmem:[#allocation194_spill] sm:$0xff] %v7398_v39  ;;  %v7410_v57 = vmax.f32 %v9352_v17, %v7398_v39  ;;  %v5187_v37 = vpop.f32.mrb[114].mxu0 }
 0x26a   :  { %v7413_v19 = vadd.f32 %v5187_v37, %v7244_v23  ;;  %v2592_v35 = vpop.f32.mrb[115].mxu0 }
 0x26b   :  { %9353 = vst [vmem:[#allocation195_spill] sm:$0xff] %v7410_v57  ;;  %v7416_v16 = vadd.f32 %v7244_v23, %v2592_v35  ;;  %v9361_v57 = vld [vmem:[#allocation174_spill] sm:$0xff] }
 0x26c   :  { %9354 = vst [vmem:[#allocation196_spill] sm:$0xff] %v7413_v19  ;;  %v7422_v0 = vmax.f32 %v9356_v63, %v7413_v19  ;;  %v9362_v7 = vmax.f32 %v7004_v58, %v9361_v57  ;;  %v9363_v19 = vld [vmem:[#allocation175_spill] sm:$0xff] }
 0x26d   :  { %9355 = vst [vmem:[#allocation197_spill] sm:$0xff] %v7416_v16  ;;  %v7428_v17 = vmax.f32 %v9357_v6, %v7416_v16  ;;  %v5190_v39 = vpop.f32.mrb[116].mxu0  ;;  %v9364_v8 = vmax.f32 %v7008_v26, %v9363_v19 }
 0x26e   :  { %v7431_v37 = vadd.f32 %v5190_v39, %v7244_v23  ;;  %v2602_v48 = vpop.f32.mrb[117].mxu0 }
 0x26f   :  { %9358 = vst [vmem:[#allocation198_spill] sm:$0xff] %v7428_v17  ;;  %v7434_v35 = vadd.f32 %v7244_v23, %v2602_v48  ;;  %v9368_v17 = vld [vmem:[#allocation176_spill] sm:$0xff] }
 0x270   :  { %9359 = vst [vmem:[#allocation199_spill] sm:$0xff] %v7431_v37  ;;  %v7440_v63 = vmax.f32 %v9362_v7, %v7431_v37  ;;  %v9369_v57 = vmax.f32 %v7017_v40, %v9368_v17  ;;  %v9371_v37 = vld [vmem:[#allocation177_spill] sm:$0xff]  ;;  %v9376_v17 = vmax.f32 %v7023_v24, %v7209_v9  ;;  %v9379_v40 = vld [vmem:[#allocation179_spill] sm:$0xff]  ;;  %v9384_v9 = vld [vmem:[#allocation180_spill] sm:$0xff] }
 0x271   :  { %9360 = vst [vmem:[#allocation200_spill] sm:$0xff] %v7434_v35  ;;  %v7446_v6 = vmax.f32 %v9364_v8, %v7434_v35  ;;  %v5193_v16 = vpop.f32.mrb[118].mxu0  ;;  %v9372_v19 = vmax.f32 %v7020_v30, %v9371_v37  ;;  %v9392_v24 = vld [vmem:[#allocation182_spill] sm:$0xff] }
 0x272   :  { %v7449_v39 = vadd.f32 %v5193_v16, %v7244_v23  ;;  %v2612_v27 = vpop.f32.mrb[119].mxu0 }
 0x273   :  { %9365 = vst [vmem:[#allocation201_spill] sm:$0xff] %v7446_v6  ;;  %v7452_v48 = vadd.f32 %v7244_v23, %v2612_v27 }
 0x274   :  { %9366 = vst [vmem:[#allocation202_spill] sm:$0xff] %v7449_v39  ;;  %v7458_v7 = vmax.f32 %v9369_v57, %v7449_v39  ;;  %v9378_v39 = vld [vmem:[#allocation142_spill] sm:$0xff] }
 0x275   :  { %9367 = vst [vmem:[#allocation203_spill] sm:$0xff] %v7452_v48  ;;  %v7464_v8 = vmax.f32 %v9372_v19, %v7452_v48  ;;  %v5196_v35 = vpop.f32.mrb[120].mxu0  ;;  %v9380_v37 = vmax.f32 %v9378_v39, %v9379_v40  ;;  %v9387_v40 = vld [vmem:[#allocation181_spill] sm:$0xff] }
 0x276   :  { %9370 = vst [vmem:[#allocation204_spill] sm:$0xff] %v7458_v7  ;;  %v7467_v16 = vadd.f32 %v5196_v35, %v7244_v23  ;;  %v2622_v26 = vpop.f32.mrb[121].mxu0  ;;  %v9419_v7 = vld [vmem:[#allocation104_spill] sm:$0xff] }
 0x277   :  { %9373 = vst [vmem:[#allocation205_spill] sm:$0xff] %v7464_v8  ;;  %v7470_v27 = vadd.f32 %v7244_v23, %v2622_v26 }
 0x278   :  { %9374 = vst [vmem:[#allocation206_spill] sm:$0xff] %v7467_v16  ;;  %v7476_v57 = vmax.f32 %v9376_v17, %v7467_v16  ;;  %v9385_v17 = vmax.f32 %v7029_v10, %v9384_v9  ;;  %v9393_v9 = vmax.f32 %v7035_v60, %v9392_v24 }
 0x279   :  { %9375 = vst [vmem:[#allocation207_spill] sm:$0xff] %v7470_v27  ;;  %v7482_v19 = vmax.f32 %v9380_v37, %v7470_v27  ;;  %v5199_v48 = vpop.f32.mrb[122].mxu0  ;;  %v9388_v37 = vmax.f32 %v7032_v62, %v9387_v40  ;;  %v9395_v40 = vmax.f32 %v7038_v22, %v7232_v49 }
 0x27a   :  { %9377 = vst [vmem:[#allocation208_spill] sm:$0xff] %v7476_v57  ;;  %v7485_v35 = vadd.f32 %v5199_v48, %v7244_v23  ;;  %v2632_v30 = vpop.f32.mrb[123].mxu0 }
 0x27b   :  { %9381 = vst [vmem:[#allocation209_spill] sm:$0xff] %v7482_v19  ;;  %v7488_v26 = vadd.f32 %v7244_v23, %v2632_v30 }
 0x27c   :  { %9382 = vst [vmem:[#allocation210_spill] sm:$0xff] %v7485_v35  ;;  %v7494_v16 = vmax.f32 %v9385_v17, %v7485_v35 }
 0x27d   :  { %9383 = vst [vmem:[#allocation211_spill] sm:$0xff] %v7488_v26  ;;  %v7500_v27 = vmax.f32 %v9388_v37, %v7488_v26  ;;  %v5202_v39 = vpop.f32.mrb[124].mxu0 }
 0x27e   :  { %9386 = vst [vmem:[#allocation212_spill] sm:$0xff] %v7494_v16  ;;  %v7503_v48 = vadd.f32 %v5202_v39, %v7244_v23  ;;  %v2642_v19 = vpop.f32.mrb[125].mxu0 }
 0x27f   :  { %9389 = vst [vmem:[#allocation213_spill] sm:$0xff] %v7500_v27  ;;  %v7506_v30 = vadd.f32 %v7244_v23, %v2642_v19  ;;  %v7526_v27 = vstv %s4549_s11 }
 0x280   :  { %9390 = vst [vmem:[#allocation214_spill] sm:$0xff] %v7503_v48  ;;  %v7512_v17 = vmax.f32 %v9393_v9, %v7503_v48  ;;  %v9399_v9 = vld [vmem:[#allocation184_spill] sm:$0xff] }
 0x281   :  { %9391 = vst [vmem:[#allocation215_spill] sm:$0xff] %v7506_v30  ;;  %v7518_v37 = vmax.f32 %v9395_v40, %v7506_v30  ;;  %v5205_v26 = vpop.f32.mrb[126].mxu0  ;;  %v9400_v48 = vmax.f32 %v7041_v52, %v9399_v9  ;;  %v9402_v40 = vld [vmem:[#allocation185_spill] sm:$0xff] }
 0x282   :  { %9394 = vst [vmem:[#allocation216_spill] sm:$0xff] %v7512_v17  ;;  %v7521_v39 = vadd.f32 %v5205_v26, %v7244_v23  ;;  %v2652_v62 = vpop.f32.mrb[127].mxu0  ;;  %v9403_v30 = vmax.f32 %v7044_v20, %v9402_v40 }
 0x283   :  { %9396 = vst [vmem:[#allocation217_spill] sm:$0xff] %v7518_v37  ;;  %v7524_v19 = vadd.f32 %v7244_v23, %v2652_v62 }
 0x284   :  { %9397 = vst [vmem:[#allocation218_spill] sm:$0xff] %v7521_v39  ;;  %v7532_v24 = vmax.f32 %v9400_v48, %v7521_v39  ;;  %v9405_v39 = vld [vmem:[#allocation149_spill] sm:$0xff] }
 0x285   :  { %9398 = vst [vmem:[#allocation219_spill] sm:$0xff] %v7524_v19  ;;  %v7538_v49 = vmax.f32 %v9403_v30, %v7524_v19  ;;  %v5208_v26 = vpop.f32.mrb[128].mxu0  ;;  %v9406_v19 = vld [vmem:[#allocation150_spill] sm:$0xff] }
 0x286   :  { %9401 = vst [vmem:[#allocation220_spill] sm:$0xff] %v7532_v24  ;;  %v2990_v22 = vadd.f32 %v5208_v26, %v7526_v27  ;;  %v2662_v37 = vpop.f32.mrb[129].mxu0  ;;  %v9408_v24 = vld [vmem:[#allocation186_spill] sm:$0xff] }
 0x287   :  { %9404 = vst [vmem:[#allocation221_spill] sm:$0xff] %v7538_v49  ;;  %v2989_v62 = vadd.f32 %v7526_v27, %v2662_v37  ;;  %v9407_v49 = vld [vmem:[#allocation151_spill] sm:$0xff] }
 0x288   :  { %v3022_v23 = vmax.f32 %v7260_v43, %v2990_v22 }
 0x289   :  { %v3021_v60 = vmax.f32 %v7266_v47, %v2989_v62  ;;  %v5211_v17 = vpop.f32.mrb[130].mxu0 }
 0x28a   :  { %v3054_v48 = vsub.f32 %v7050_v53, %v3022_v23  ;;  %v3246_v9 = vsub.f32 %v9405_v39, %v3022_v23  ;;  %v3438_v52 = vsub.f32 %v7251_v25, %v3022_v23  ;;  %v3630_v40 = vsub.f32 %v2990_v22, %v3022_v23  ;;  %v2672_v30 = vpop.f32.mrb[131].mxu0 }
 0x28b   :  { %v3053_v20 = vsub.f32 %v9406_v19, %v3021_v60  ;;  %v3245_v26 = vsub.f32 %v9407_v49, %v3021_v60  ;;  %v3437_v35 = vsub.f32 %v9408_v24, %v3021_v60  ;;  %v3629_v37 = vsub.f32 %v2989_v62, %v3021_v60 }
 0x28c   :  { %v3087_v10 = vmul.f32 1.442695, %v3054_v48  ;;  %v3279_v43 = vmul.f32 1.442695, %v3246_v9  ;;  %v3471_v16 = vmul.f32 1.442695, %v3438_v52  ;;  %v2992_v47 = vadd.f32 %v5211_v17, %v7526_v27 }
 0x28d   :  { %v3663_v57 = vmul.f32 1.442695, %v3630_v40  ;;  %v3085_v53 = vmul.f32 1.442695, %v3053_v20  ;;  %v2991_v39 = vadd.f32 %v7526_v27, %v2672_v30  ;;  %v3277_v25 = vmul.f32 1.442695, %v3245_v26 }
 0x28e   :  { %5424 = vpow2.f32 %v3087_v10  ;;  %v3469_v22 = vmul.f32 1.442695, %v3437_v35  ;;  %v3024_v23 = vmax.f32 %v7278_v51, %v2992_v47  ;;  %v5214_v19 = vpop.f32.mrb[132].mxu0  ;;  %v3661_v49 = vmul.f32 1.442695, %v3629_v37  ;;  %v9409_v17 = vld [vmem:[#allocation152_spill] sm:$0xff] }
 0x28f   :  { %5426 = vpow2.f32 %v3279_v43  ;;  %v3023_v24 = vmax.f32 %v7284_v15, %v2991_v39  ;;  %v2994_v60 = vadd.f32 %v5214_v19, %v7526_v27  ;;  %v2682_v9 = vpop.f32.mrb[133].mxu0  ;;  %v9410_v35 = vld [vmem:[#allocation153_spill] sm:$0xff]  ;;  %v9411_v51 = vld [vmem:[#allocation154_spill] sm:$0xff] }
 0x290   :  { %5428 = vpow2.f32 %v3471_v16  ;;  %v3056_v52 = vsub.f32 %v7068_v33, %v3024_v23  ;;  %v3248_v20 = vsub.f32 %v9409_v17, %v3024_v23  ;;  %v3440_v40 = vsub.f32 %v7269_v13, %v3024_v23  ;;  %v9412_v33 = vld [vmem:[#allocation187_spill] sm:$0xff] }
 0x291   :  { %5430 = vpow2.f32 %v3663_v57  ;;  %v3632_v10 = vsub.f32 %v2992_v47, %v3024_v23  ;;  %v3055_v62 = vsub.f32 %v9410_v35, %v3023_v24  ;;  %v3247_v48 = vsub.f32 %v9411_v51, %v3023_v24  ;;  %v5217_v30 = vpop.f32.mrb[134].mxu0 }
 0x292   :  { %5432 = vpow2.f32 %v3085_v53  ;;  %v3091_v26 = vmul.f32 1.442695, %v3056_v52  ;;  %v3283_v15 = vmul.f32 1.442695, %v3248_v20  ;;  %v3475_v37 = vmul.f32 1.442695, %v3440_v40 }
 0x293   :  { %5434 = vpow2.f32 %v3277_v25  ;;  %v3667_v43 = vmul.f32 1.442695, %v3632_v10  ;;  %v3089_v16 = vmul.f32 1.442695, %v3055_v62  ;;  %v3281_v19 = vmul.f32 1.442695, %v3247_v48 }
 0x294   :  { %5436 = vpow2.f32 %v3469_v22  ;;  %v3439_v17 = vsub.f32 %v9412_v33, %v3023_v24  ;;  %v3631_v8 = vsub.f32 %v2991_v39, %v3023_v24  ;;  %v3026_v13 = vmax.f32 %v7296_v1, %v2994_v60  ;;  %v2692_v57 = vpop.f32.mrb[135].mxu0  ;;  %v9413_v1 = vld [vmem:[#allocation155_spill] sm:$0xff] }
 0x295   :  { %5438 = vpow2.f32 %v3661_v49  ;;  %v7563_v47 = vadd.f32 %v7526_v27, %v2682_v9  ;;  %v7566_v53 = vadd.f32 %v5217_v30, %v7526_v27  ;;  %v7569_v23 = vadd.f32 %v7526_v27, %v2692_v57  ;;  %v7571_v25 = vpop.f32.mrb[136].mxu0  ;;  %v9417_v57 = vld [vmem:[#allocation156_spill] sm:$0xff] }
 0x296   :  { %5440 = vpow2.f32 %v3091_v26  ;;  %v3473_v22 = vmul.f32 1.442695, %v3439_v17  ;;  %v3665_v52 = vmul.f32 1.442695, %v3631_v8  ;;  %v3058_v39 = vsub.f32 %v7086_v2, %v3026_v13  ;;  %v7574_v24 = vpop.f32.mrb[137].mxu0  ;;  %v9414_v2 = vld [vmem:[#allocation8_spill] sm:$0xff] }
 0x297   :  { %5442 = vpow2.f32 %v3283_v15  ;;  %v3250_v49 = vsub.f32 %v9413_v1, %v3026_v13  ;;  %v3442_v9 = vsub.f32 %v7287_v59, %v3026_v13  ;;  %v3634_v20 = vsub.f32 %v2994_v60, %v3026_v13  ;;  %v9415_v15 = vld [vmem:[#allocation40_spill] sm:$0xff]  ;;  %v9418_v1 = vld [vmem:[#allocation157_spill] sm:$0xff] }
 0x298   :  { %v5425_v40 = vpop.eup %5424  ;;  %5444 = vpow2.f32 %v3475_v37  ;;  %v3095_v10 = vmul.f32 1.442695, %v3058_v39  ;;  %v3025_v35 = vmax.f32 %v7302_v11, %v7563_v47  ;;  %v7582_v62 = vmax.f32 %v7314_v46, %v7566_v53  ;;  %v9416_v13 = vld [vmem:[#allocation72_spill] sm:$0xff] }
 0x299   :  { %v5427_v8 = vpop.eup %5426  ;;  %v3182_v51 = vmul.f32 %v5425_v40, %v9414_v2  ;;  %5446 = vpow2.f32 %v3667_v43  ;;  %v3287_v48 = vmul.f32 1.442695, %v3250_v49  ;;  %v3479_v30 = vmul.f32 1.442695, %v3442_v9  ;;  %v7585_v26 = vpop.f32.mrb[138].mxu0 }
 0x29a   :  { %v5429_v59 = vpop.eup %5428  ;;  %v3342_v60 = vadd.f32 %v5427_v8, %v5425_v40  ;;  %v3374_v37 = vmul.f32 %v5427_v8, %v9415_v15  ;;  %5448 = vpow2.f32 %v3089_v16  ;;  %v3671_v33 = vmul.f32 1.442695, %v3634_v20  ;;  %v7588_v17 = vpop.f32.mrb[139].mxu0  ;;  %v9420_v15 = vld [vmem:[#allocation188_spill] sm:$0xff] }
 0x29b   :  { %v5431_v11 = vpop.eup %5430  ;;  %v3566_v46 = vmul.f32 %v5429_v59, %v9416_v13  ;;  %5450 = vpow2.f32 %v3281_v19  ;;  %v3057_v39 = vsub.f32 %v9417_v57, %v3025_v35  ;;  %v3249_v43 = vsub.f32 %v9418_v1, %v3025_v35 }
 0x29c   :  { %v7593_v49 = vpop.eup %5432  ;;  %v3406_v9 = vadd.f32 %v3374_v37, %v3182_v51  ;;  %v3534_v2 = vadd.f32 %v5429_v59, %v3342_v60  ;;  %v3758_v40 = vmul.f32 %v5431_v11, %v9419_v7  ;;  %5452 = vpow2.f32 %v3473_v22 }
 0x29d   :  { %v7596_v8 = vpop.eup %5434  ;;  %5454 = vpow2.f32 %v3665_v52  ;;  %v3093_v16 = vmul.f32 1.442695, %v3057_v39  ;;  %v3285_v20 = vmul.f32 1.442695, %v3249_v43  ;;  %v3441_v6 = vsub.f32 %v9420_v15, %v3025_v35  ;;  %v7599_v13 = vpop.f32.mrb[140].mxu0 }
 0x29e   :  { %v7601_v19 = vpop.eup %5436  ;;  %v3598_v57 = vadd.f32 %v3566_v46, %v3406_v9  ;;  %v3726_v1 = vadd.f32 %v5431_v11, %v3534_v2  ;;  %v3341_v51 = vadd.f32 %v7596_v8, %v7593_v49  ;;  %5456 = vpow2.f32 %v3095_v10  ;;  %v7605_v59 = vpop.f32.mrb[141].mxu0  ;;  %v9422_v10 = vld [vmem:[#allocation158_spill] sm:$0xff] }
 0x29f   :  { %v7607_v7 = vpop.eup %5438  ;;  %5458 = vpow2.f32 %v3287_v48  ;;  %v3477_v22 = vmul.f32 1.442695, %v3441_v6  ;;  %v3633_v52 = vsub.f32 %v7563_v47, %v3025_v35  ;;  %v3060_v60 = vsub.f32 %v7104_v28, %v7582_v62 }
 0x2a0   :  { %v7612_v37 = vpop.eup %5440  ;;  %v7614_v39 = vadd.f32 %v3758_v40, %v3598_v57  ;;  %5460 = vrcp.f32 %v3726_v1  ;;  %v3533_v11 = vadd.f32 %v7601_v19, %v3341_v51  ;;  %v3252_v46 = vsub.f32 %v9422_v10, %v7582_v62  ;;  %v9429_v10 = vld [vmem:[#allocation160_spill] sm:$0xff] }
 0x2a1   :  { %9421 = vst [vmem:[#allocation149_spill] sm:$0xff] %v7612_v37  ;;  %v7619_v43 = vpop.eup %5442  ;;  %5462 = vpow2.f32 %v3479_v30  ;;  %v3669_v48 = vmul.f32 1.442695, %v3633_v52  ;;  %v3099_v6 = vmul.f32 1.442695, %v3060_v60  ;;  %v3444_v47 = vsub.f32 %v7305_v50, %v7582_v62  ;;  %v7623_v35 = vpop.f32.mrb[142].mxu0 }
 0x2a2   :  { %9423 = vst [vmem:[#allocation150_spill] sm:$0xff] %v7619_v43  ;;  %v7625_v28 = vpop.eup %5444  ;;  %v3725_v9 = vadd.f32 %v7607_v7, %v3533_v11  ;;  %v3344_v2 = vadd.f32 %v7619_v43, %v7612_v37  ;;  %5464 = vpow2.f32 %v3671_v33  ;;  %v3291_v40 = vmul.f32 1.442695, %v3252_v46  ;;  %v7630_v15 = vpop.f32.mrb[143].mxu0 }
 0x2a3   :  { %9424 = vst [vmem:[#allocation151_spill] sm:$0xff] %v7625_v28  ;;  %v7632_v57 = vpop.eup %5446  ;;  %5466 = vpow2.f32 %v3093_v16  ;;  %v3483_v30 = vmul.f32 1.442695, %v3444_v47  ;;  %v3636_v50 = vsub.f32 %v7566_v53, %v7582_v62  ;;  %v3027_v1 = vmax.f32 %v7320_v32, %v7569_v23  ;;  %v9428_v53 = vld [vmem:[#allocation159_spill] sm:$0xff] }
 0x2a4   :  { %9425 = vst [vmem:[#allocation186_spill] sm:$0xff] %v7632_v57  ;;  %v7638_v51 = vpop.eup %5448  ;;  %5468 = vrcp.f32 %v3725_v9  ;;  %v3536_v52 = vadd.f32 %v7625_v28, %v3344_v2  ;;  %v2998_v33 = vadd.f32 %v7571_v25, %v7526_v27  ;;  %v7645_v60 = vadd.f32 %v7526_v27, %v7574_v24  ;;  %v9431_v24 = vld [vmem:[#allocation189_spill] sm:$0xff] }
 0x2a5   :  { %9426 = vst [vmem:[#allocation152_spill] sm:$0xff] %v7638_v51  ;;  %v7647_v16 = vpop.eup %5450  ;;  %5470 = vpow2.f32 %v3285_v20  ;;  %v3675_v11 = vmul.f32 1.442695, %v3636_v50  ;;  %v3059_v62 = vsub.f32 %v9428_v53, %v3027_v1  ;;  %v3251_v32 = vsub.f32 %v9429_v10, %v3027_v1  ;;  %v7651_v46 = vpop.f32.mrb[144].mxu0 }
 0x2a6   :  { %9427 = vst [vmem:[#allocation153_spill] sm:$0xff] %v7647_v16  ;;  %v7653_v47 = vpop.eup %5452  ;;  %v3728_v9 = vadd.f32 %v7632_v57, %v3536_v52  ;;  %v3343_v25 = vadd.f32 %v7647_v16, %v7638_v51  ;;  %5472 = vpow2.f32 %v3477_v22  ;;  %v3443_v2 = vsub.f32 %v9431_v24, %v3027_v1  ;;  %v7659_v28 = vpop.f32.mrb[145].mxu0 }
 0x2a7   :  { %9430 = vst [vmem:[#allocation154_spill] sm:$0xff] %v7653_v47  ;;  %v7661_v20 = vpop.eup %5454  ;;  %5474 = vpow2.f32 %v3669_v48  ;;  %v3097_v50 = vmul.f32 1.442695, %v3059_v62  ;;  %v3289_v53 = vmul.f32 1.442695, %v3251_v32  ;;  %v3635_v10 = vsub.f32 %v7569_v23, %v3027_v1 }
 0x2a8   :  { %9432 = vst [vmem:[#allocation187_spill] sm:$0xff] %v7661_v20  ;;  %v7664_v43 = vpop.eup %5456  ;;  %5476 = vrcp.f32 %v3728_v9  ;;  %v3535_v52 = vadd.f32 %v7653_v47, %v3343_v25  ;;  %v3481_v57 = vmul.f32 1.442695, %v3443_v2  ;;  %v3030_v37 = vmax.f32 %v7332_v44, %v2998_v33 }
 0x2a9   :  { %9433 = vst [vmem:[#allocation155_spill] sm:$0xff] %v7664_v43  ;;  %v7668_v22 = vpop.eup %5458  ;;  %5478 = vpow2.f32 %v3099_v6  ;;  %v3673_v24 = vmul.f32 1.442695, %v3635_v10  ;;  %v3029_v16 = vmax.f32 %v7338_v61, %v7645_v60  ;;  %v7674_v48 = vadd.f32 %v7585_v26, %v7526_v27  ;;  %v7676_v23 = vpop.f32.mrb[146].mxu0  ;;  %v9436_v61 = vld [vmem:[#allocation161_spill] sm:$0xff] }
 0x2aa   :  { %9434 = vst [vmem:[#allocation8_spill] sm:$0xff] %v7668_v22  ;;  %v7678_v1 = vpop.eup %5460  ;;  %v3727_v62 = vadd.f32 %v7661_v20, %v3535_v52  ;;  %v3346_v44 = vadd.f32 %v7668_v22, %v7664_v43  ;;  %5480 = vpow2.f32 %v3291_v40  ;;  %v3062_v6 = vsub.f32 %v7122_v14, %v3030_v37  ;;  %v7684_v32 = vpop.f32.mrb[147].mxu0  ;;  %v9438_v22 = vld [vmem:[#allocation162_spill] sm:$0xff] }
 0x2ab   :  { %v7686_v9 = vpop.eup %5462  ;;  %5482 = vpow2.f32 %v3483_v30  ;;  %v3254_v26 = vsub.f32 %v9436_v61, %v3030_v37  ;;  %v3446_v25 = vsub.f32 %v7323_v42, %v3030_v37  ;;  %v3638_v2 = vsub.f32 %v2998_v33, %v3030_v37  ;;  %v9440_v37 = vld [vmem:[#allocation163_spill] sm:$0xff] }
 0x2ac   :  { %9435 = vst [vmem:[#allocation40_spill] sm:$0xff] %v7686_v9  ;;  %v7690_v10 = vpop.eup %5464  ;;  %5484 = vrcp.f32 %v3727_v62  ;;  %v3538_v52 = vadd.f32 %v7686_v9, %v3346_v44  ;;  %v3103_v20 = vmul.f32 1.442695, %v3062_v6  ;;  %v3061_v40 = vsub.f32 %v9438_v22, %v3029_v16  ;;  %v9442_v22 = vld [vmem:[#allocation190_spill] sm:$0xff] }
 0x2ad   :  { %9437 = vst [vmem:[#allocation72_spill] sm:$0xff] %v7690_v10  ;;  %v7694_v43 = vpop.eup %5466  ;;  %5486 = vpow2.f32 %v3675_v11  ;;  %v3295_v14 = vmul.f32 1.442695, %v3254_v26  ;;  %v3487_v47 = vmul.f32 1.442695, %v3446_v25  ;;  %v3253_v33 = vsub.f32 %v9440_v37, %v3029_v16  ;;  %v7700_v62 = vpop.f32.mrb[148].mxu0 }
 0x2ae   :  { %9439 = vst [vmem:[#allocation156_spill] sm:$0xff] %v7694_v43  ;;  %v3679_v51 = vmul.f32 1.442695, %v3638_v2  ;;  %v7696_v30 = vpop.eup %5468  ;;  %v3730_v61 = vadd.f32 %v7690_v10, %v3538_v52  ;;  %5488 = vpow2.f32 %v3097_v50  ;;  %v3101_v42 = vmul.f32 1.442695, %v3061_v40  ;;  %v7708_v25 = vpop.f32.mrb[149].mxu0 }
 0x2af   :  { %v7702_v44 = vpop.eup %5470  ;;  %5490 = vpow2.f32 %v3289_v53  ;;  %v3445_v6 = vsub.f32 %v9442_v22, %v3029_v16  ;;  %v3637_v11 = vsub.f32 %v7645_v60, %v3029_v16  ;;  %v3032_v26 = vmax.f32 %v7350_v34, %v7674_v48  ;;  %v9446_v10 = vld [vmem:[#allocation164_spill] sm:$0xff] }
 0x2b0   :  { %9441 = vst [vmem:[#allocation157_spill] sm:$0xff] %v7702_v44  ;;  %v7710_v2 = vpop.eup %5472  ;;  %5492 = vrcp.f32 %v3730_v61  ;;  %v3345_v50 = vadd.f32 %v7702_v44, %v7694_v43  ;;  %v3293_v52 = vmul.f32 1.442695, %v3253_v33  ;;  %v2999_v40 = vadd.f32 %v7526_v27, %v7588_v17 }
 0x2b1   :  { %9443 = vst [vmem:[#allocation104_spill] sm:$0xff] %v7710_v2  ;;  %v7716_v53 = vpop.eup %5474  ;;  %5494 = vpow2.f32 %v3481_v57  ;;  %v3485_v37 = vmul.f32 1.442695, %v3445_v6  ;;  %v3677_v60 = vmul.f32 1.442695, %v3637_v11  ;;  %v3064_v16 = vsub.f32 %v6936_v12, %v3032_v26  ;;  %v7719_v34 = vpop.f32.mrb[150].mxu0 }
 0x2b2   :  { %9444 = vst [vmem:[#allocation188_spill] sm:$0xff] %v7716_v53  ;;  %v7721_v22 = vpop.eup %5476  ;;  %v3537_v61 = vadd.f32 %v7710_v2, %v3345_v50  ;;  %5496 = vpow2.f32 %v3673_v24  ;;  %v3256_v9 = vsub.f32 %v9446_v10, %v3032_v26  ;;  %v3448_v33 = vsub.f32 %v7341_v4, %v3032_v26  ;;  %v7726_v44 = vpop.f32.mrb[151].mxu0 }
 0x2b3   :  { %9445 = vst [vmem:[#allocation158_spill] sm:$0xff] %v7721_v22  ;;  %v7728_v17 = vpop.eup %5478  ;;  %5498 = vpow2.f32 %v3103_v20  ;;  %v3107_v57 = vmul.f32 1.442695, %v3064_v16  ;;  %v3640_v6 = vsub.f32 %v7674_v48, %v3032_v26  ;;  %v3031_v12 = vmax.f32 %v7356_v36, %v2999_v40  ;;  %v9450_v20 = vld [vmem:[#allocation127_spill] sm:$0xff]  ;;  %v9451_v26 = vld [vmem:[#allocation165_spill] sm:$0xff] }
 0x2b4   :  { %9447 = vst [vmem:[#allocation159_spill] sm:$0xff] %v7728_v17  ;;  %v7732_v11 = vpop.eup %5480  ;;  %v3729_v22 = vadd.f32 %v7716_v53, %v3537_v61  ;;  %5500 = vpow2.f32 %v3295_v14  ;;  %v3299_v24 = vmul.f32 1.442695, %v3256_v9  ;;  %v3491_v50 = vmul.f32 1.442695, %v3448_v33  ;;  %v9452_v14 = vld [vmem:[#allocation191_spill] sm:$0xff] }
 0x2b5   :  { %9448 = vst [vmem:[#allocation160_spill] sm:$0xff] %v7732_v11  ;;  %v7735_v10 = vpop.eup %5482  ;;  %v3348_v4 = vadd.f32 %v7732_v11, %v7728_v17  ;;  %5502 = vpow2.f32 %v3487_v47  ;;  %v7739_v2 = vmul.f32 1.442695, %v3640_v6  ;;  %v3063_v16 = vsub.f32 %v9450_v20, %v3031_v12  ;;  %v7742_v48 = vpop.f32.mrb[152].mxu0 }
 0x2b6   :  { %9449 = vst [vmem:[#allocation189_spill] sm:$0xff] %v7735_v10  ;;  %v7744_v36 = vpop.eup %5484  ;;  %5504 = vrcp.f32 %v3729_v22  ;;  %v3255_v61 = vsub.f32 %v9451_v26, %v3031_v12  ;;  %v3447_v9 = vsub.f32 %v9452_v14, %v3031_v12  ;;  %v3639_v33 = vsub.f32 %v2999_v40, %v3031_v12  ;;  %v7748_v53 = vpop.f32.mrb[153].mxu0 }
 0x2b7   :  { %v7750_v43 = vpop.eup %5486  ;;  %v3540_v47 = vadd.f32 %v7735_v10, %v3348_v4  ;;  %5506 = vpow2.f32 %v3679_v51  ;;  %v3105_v6 = vmul.f32 1.442695, %v3063_v16  ;;  %v3002_v20 = vadd.f32 %v7599_v13, %v7526_v27 }
 0x2b8   :  { %9453 = vst [vmem:[#allocation161_spill] sm:$0xff] %v7750_v43  ;;  %v7755_v11 = vpop.eup %5488  ;;  %5508 = vpow2.f32 %v3101_v42  ;;  %v3297_v22 = vmul.f32 1.442695, %v3255_v61  ;;  %v7757_v17 = vmul.f32 1.442695, %v3447_v9  ;;  %v3001_v51 = vadd.f32 %v7526_v27, %v7605_v59  ;;  %v9458_v9 = vld [vmem:[#allocation166_spill] sm:$0xff] }
 0x2b9   :  { %9454 = vst [vmem:[#allocation162_spill] sm:$0xff] %v7755_v11  ;;  %v7759_v26 = vmul.f32 1.442695, %v3639_v33  ;;  %v7761_v40 = vpop.eup %5490  ;;  %v3732_v12 = vadd.f32 %v7750_v43, %v3540_v47  ;;  %5510 = vpow2.f32 %v3293_v52  ;;  %v3034_v4 = vmax.f32 %v7368_v38, %v3002_v20  ;;  %v7767_v16 = vpop.f32.mrb[154].mxu0 }
 0x2ba   :  { %9455 = vst [vmem:[#allocation163_spill] sm:$0xff] %v7761_v40  ;;  %v7769_v13 = vpop.eup %5492  ;;  %v3347_v42 = vadd.f32 %v7761_v40, %v7755_v11  ;;  %5512 = vpow2.f32 %v3485_v37  ;;  %v3004_v61 = vadd.f32 %v7623_v35, %v7526_v27  ;;  %v7777_v14 = vadd.f32 %v7526_v27, %v7630_v15  ;;  %v7779_v52 = vpop.f32.mrb[155].mxu0 }
 0x2bb   :  { %9456 = vst [vmem:[#allocation190_spill] sm:$0xff] %v7769_v13  ;;  %9457 = vst [vmem:[#allocation164_spill] sm:$0xff] %v7779_v52  ;;  %v7781_v38 = vpop.eup %5494  ;;  %5514 = vrcp.f32 %v3732_v12  ;;  %v3066_v59 = vsub.f32 %v6956_v18, %v3034_v4  ;;  %v3258_v33 = vsub.f32 %v9458_v9, %v3034_v4  ;;  %v3450_v47 = vsub.f32 %v7359_v31, %v3034_v4  ;;  %v9461_v9 = vld [vmem:[#allocation130_spill] sm:$0xff] }
 0x2bc   :  { %v7786_v43 = vpop.eup %5496  ;;  %v3539_v37 = vadd.f32 %v7781_v38, %v3347_v42  ;;  %5516 = vpow2.f32 %v3677_v60  ;;  %v3642_v35 = vsub.f32 %v3002_v20, %v3034_v4  ;;  %v3033_v15 = vmax.f32 %v7374_v56, %v3001_v51  ;;  %v9465_v4 = vld [vmem:[#allocation192_spill] sm:$0xff] }
 0x2bd   :  { %v7790_v10 = vpop.eup %5498  ;;  %5518 = vpow2.f32 %v3107_v57  ;;  %v3111_v52 = vmul.f32 1.442695, %v3066_v59  ;;  %v3303_v13 = vmul.f32 1.442695, %v3258_v33  ;;  %v3495_v12 = vmul.f32 1.442695, %v3450_v47 }
 0x2be   :  { %9459 = vst [vmem:[#allocation127_spill] sm:$0xff] %v7790_v10  ;;  %v7792_v40 = vpop.eup %5500  ;;  %v3731_v18 = vadd.f32 %v7786_v43, %v3539_v37  ;;  %5520 = vpow2.f32 %v3299_v24  ;;  %v7795_v31 = vmul.f32 1.442695, %v3642_v35  ;;  %v3065_v11 = vsub.f32 %v9461_v9, %v3033_v15  ;;  %v7798_v42 = vpop.f32.mrb[156].mxu0  ;;  %v9464_v57 = vld [vmem:[#allocation167_spill] sm:$0xff] }
 0x2bf   :  { %9460 = vst [vmem:[#allocation165_spill] sm:$0xff] %v7792_v40  ;;  %9462 = vst [vmem:[#allocation191_spill] sm:$0xff] %v7798_v42  ;;  %v7800_v60 = vpop.eup %5502  ;;  %v3350_v56 = vadd.f32 %v7792_v40, %v7790_v10  ;;  %5522 = vpow2.f32 %v3491_v50  ;;  %v3257_v20 = vsub.f32 %v9464_v57, %v3033_v15  ;;  %v3449_v59 = vsub.f32 %v9465_v4, %v3033_v15  ;;  %v7806_v33 = vpop.f32.mrb[157].mxu0 }
 0x2c0   :  { %9463 = vst [vmem:[#allocation166_spill] sm:$0xff] %v7800_v60  ;;  %v7808_v47 = vpop.eup %5504  ;;  %5524 = vrcp.f32 %v3731_v18  ;;  %v3109_v24 = vmul.f32 1.442695, %v3065_v11  ;;  %v3641_v37 = vsub.f32 %v3001_v51, %v3033_v15  ;;  %v3036_v35 = vmax.f32 %v7386_v41, %v3004_v61  ;;  %v9468_v51 = vld [vmem:[#allocation168_spill] sm:$0xff] }
 0x2c1   :  { %v7811_v9 = vpop.eup %5506  ;;  %v3542_v42 = vadd.f32 %v7800_v60, %v3350_v56  ;;  %5526 = vpow2.f32 %v7739_v2  ;;  %v3301_v50 = vmul.f32 1.442695, %v3257_v20  ;;  %v7815_v40 = vmul.f32 1.442695, %v3449_v59  ;;  %v7817_v57 = vpop.f32.mrb[158].mxu0 }
 0x2c2   :  { %9466 = vst [vmem:[#allocation130_spill] sm:$0xff] %v7811_v9  ;;  %9467 = vst [vmem:[#allocation167_spill] sm:$0xff] %v7817_v57  ;;  %v7819_v4 = vpop.eup %5508  ;;  %5528 = vpow2.f32 %v3105_v6  ;;  %v7821_v10 = vmul.f32 1.442695, %v3641_v37  ;;  %v3068_v11 = vsub.f32 %v6968_v29, %v3036_v35  ;;  %v3260_v41 = vsub.f32 %v9468_v51, %v3036_v35  ;;  %v7825_v15 = vpop.f32.mrb[159].mxu0 }
 0x2c3   :  { %9469 = vst [vmem:[#allocation192_spill] sm:$0xff] %v7825_v15  ;;  %v7827_v18 = vpop.eup %5510  ;;  %v3734_v2 = vadd.f32 %v7811_v9, %v3542_v42  ;;  %5530 = vpow2.f32 %v3297_v22  ;;  %v3452_v56 = vsub.f32 %v7377_v5, %v3036_v35  ;;  %v3644_v20 = vsub.f32 %v3004_v61, %v3036_v35 }
 0x2c4   :  { %v7831_v59 = vpop.eup %5512  ;;  %v3349_v6 = vadd.f32 %v7827_v18, %v7819_v4  ;;  %5532 = vpow2.f32 %v7757_v17  ;;  %v3115_v29 = vmul.f32 1.442695, %v3068_v11  ;;  %v7836_v37 = vmul.f32 1.442695, %v3260_v41  ;;  %v9471_v41 = vld [vmem:[#allocation133_spill] sm:$0xff] }
 0x2c5   :  { %v7838_v51 = vpop.eup %5514  ;;  %5534 = vrcp.f32 %v3734_v2  ;;  %v7840_v15 = vmul.f32 1.442695, %v3452_v56  ;;  %v7842_v42 = vmul.f32 1.442695, %v3644_v20  ;;  %v3035_v5 = vmax.f32 %v7392_v45, %v7777_v14  ;;  %v9472_v56 = vld [vmem:[#allocation169_spill] sm:$0xff] }
 0x2c6   :  { %v7846_v22 = vpop.eup %5516  ;;  %v3541_v61 = vadd.f32 %v7831_v59, %v3349_v6  ;;  %5536 = vpow2.f32 %v7759_v26  ;;  %v3006_v17 = vadd.f32 %v7651_v46, %v7526_v27  ;;  %v3005_v35 = vadd.f32 %v7526_v27, %v7659_v28  ;;  %v9473_v45 = vld [vmem:[#allocation193_spill] sm:$0xff] }
 0x2c7   :  { %v7854_v11 = vpop.eup %5518  ;;  %5538 = vpow2.f32 %v3111_v52  ;;  %v3067_v2 = vsub.f32 %v9471_v41, %v3035_v5  ;;  %v3259_v20 = vsub.f32 %v9472_v56, %v3035_v5  ;;  %v3451_v57 = vsub.f32 %v9473_v45, %v3035_v5 }
 0x2c8   :  { %9470 = vst [vmem:[#allocation168_spill] sm:$0xff] %v7854_v11  ;;  %v7859_v9 = vpop.eup %5520  ;;  %v3733_v6 = vadd.f32 %v7846_v22, %v3541_v61  ;;  %5540 = vpow2.f32 %v3303_v13  ;;  %v3643_v26 = vsub.f32 %v7777_v14, %v3035_v5  ;;  %v3038_v46 = vmax.f32 %v7404_v3, %v3006_v17  ;;  %v9477_v5 = vld [vmem:[#allocation170_spill] sm:$0xff] }
 0x2c9   :  { %9474 = vst [vmem:[#allocation133_spill] sm:$0xff] %v7859_v9  ;;  %v7864_v60 = vpop.eup %5522  ;;  %v3352_v28 = vadd.f32 %v7859_v9, %v7854_v11  ;;  %5542 = vpow2.f32 %v3495_v12  ;;  %v3113_v52 = vmul.f32 1.442695, %v3067_v2  ;;  %v7868_v41 = vmul.f32 1.442695, %v3259_v20 }
 0x2ca   :  { %9475 = vst [vmem:[#allocation169_spill] sm:$0xff] %v7864_v60  ;;  %v7870_v56 = vpop.eup %5524  ;;  %5544 = vrcp.f32 %v3733_v6  ;;  %v7872_v45 = vmul.f32 1.442695, %v3451_v57  ;;  %v7874_v61 = vmul.f32 1.442695, %v3643_v26  ;;  %v3070_v13 = vsub.f32 %v6988_v54, %v3038_v46  ;;  %v9478_v26 = vld [vmem:[#allocation195_spill] sm:$0xff] }
 0x2cb   :  { %v7877_v14 = vpop.eup %5526  ;;  %v3544_v3 = vadd.f32 %v7864_v60, %v3352_v28  ;;  %5546 = vpow2.f32 %v7795_v31  ;;  %v3262_v12 = vsub.f32 %v9477_v5, %v3038_v46  ;;  %v3454_v2 = vsub.f32 %v7395_v55, %v3038_v46 }
 0x2cc   :  { %9476 = vst [vmem:[#allocation193_spill] sm:$0xff] %v7877_v14  ;;  %v7883_v20 = vpop.eup %5528  ;;  %5548 = vpow2.f32 %v3109_v24  ;;  %v7885_v6 = vmul.f32 1.442695, %v3070_v13  ;;  %v3646_v57 = vsub.f32 %v3006_v17, %v3038_v46  ;;  %v3037_v9 = vmax.f32 %v9478_v26, %v3005_v35  ;;  %v9480_v17 = vld [vmem:[#allocation136_spill] sm:$0xff] }
 0x2cd   :  { %v7888_v11 = vpop.eup %5530  ;;  %v3736_v54 = vadd.f32 %v7877_v14, %v3544_v3  ;;  %5550 = vpow2.f32 %v3301_v50  ;;  %v7891_v28 = vmul.f32 1.442695, %v3262_v12  ;;  %v7893_v31 = vmul.f32 1.442695, %v3454_v2  ;;  %v9481_v3 = vld [vmem:[#allocation171_spill] sm:$0xff]  ;;  %v9482_v12 = vld [vmem:[#allocation194_spill] sm:$0xff] }
 0x2ce   :  { %9479 = vst [vmem:[#allocation170_spill] sm:$0xff] %v7888_v11  ;;  %v7895_v5 = vpop.eup %5532  ;;  %v3351_v55 = vadd.f32 %v7888_v11, %v7883_v20  ;;  %5552 = vpow2.f32 %v7815_v40  ;;  %v7900_v24 = vmul.f32 1.442695, %v3646_v57  ;;  %v3069_v46 = vsub.f32 %v9480_v17, %v3037_v9 }
 0x2cf   :  { %v7903_v13 = vpop.eup %5534  ;;  %5554 = vrcp.f32 %v3736_v54  ;;  %v3261_v50 = vsub.f32 %v9481_v3, %v3037_v9  ;;  %v3453_v26 = vsub.f32 %v9482_v12, %v3037_v9  ;;  %v3645_v2 = vsub.f32 %v3005_v35, %v3037_v9 }
 0x2d0   :  { %v7907_v14 = vpop.eup %5536  ;;  %v3543_v60 = vadd.f32 %v7895_v5, %v3351_v55  ;;  %5556 = vpow2.f32 %v7821_v10  ;;  %v7911_v11 = vmul.f32 1.442695, %v3069_v46  ;;  %v3008_v40 = vadd.f32 %v7676_v23, %v7526_v27 }
 0x2d1   :  { %9483 = vst [vmem:[#allocation195_spill] sm:$0xff] %v7907_v14  ;;  %v7915_v57 = vpop.eup %5538  ;;  %5558 = vpow2.f32 %v3115_v29  ;;  %v7917_v54 = vmul.f32 1.442695, %v3261_v50  ;;  %v7919_v17 = vmul.f32 1.442695, %v3453_v26  ;;  %v3007_v23 = vadd.f32 %v7526_v27, %v7684_v32  ;;  %v9487_v50 = vld [vmem:[#allocation6_spill] sm:$0xff] }
 0x2d2   :  { %9484 = vst [vmem:[#allocation136_spill] sm:$0xff] %v7915_v57  ;;  %v7921_v3 = vmul.f32 1.442695, %v3645_v2  ;;  %v7923_v9 = vpop.eup %5540  ;;  %v3735_v35 = vadd.f32 %v7907_v14, %v3543_v60  ;;  %5560 = vpow2.f32 %v7836_v37  ;;  %v3040_v10 = vmax.f32 %v7422_v0, %v3008_v40  ;;  %v9488_v32 = vld [vmem:[#allocation172_spill] sm:$0xff] }
 0x2d3   :  { %9485 = vst [vmem:[#allocation171_spill] sm:$0xff] %v7923_v9  ;;  %v7930_v55 = vpop.eup %5542  ;;  %v3354_v29 = vadd.f32 %v7923_v9, %v7915_v57  ;;  %5562 = vpow2.f32 %v7840_v15  ;;  %v3010_v46 = vadd.f32 %v7700_v62, %v7526_v27  ;;  %v7939_v60 = vmul.f32 %v7593_v49, %v9487_v50  ;;  %v9489_v26 = vld [vmem:[#allocation196_spill] sm:$0xff]  ;;  %v9491_v9 = vld [vmem:[#allocation198_spill] sm:$0xff] }
 0x2d4   :  { %9486 = vst [vmem:[#allocation194_spill] sm:$0xff] %v7930_v55  ;;  %v7941_v37 = vpop.eup %5544  ;;  %5564 = vrcp.f32 %v3735_v35  ;;  %v3072_v0 = vsub.f32 %v6996_v21, %v3040_v10  ;;  %v3264_v12 = vsub.f32 %v9488_v32, %v3040_v10  ;;  %v3456_v2 = vsub.f32 %v9489_v26, %v3040_v10 }
 0x2d5   :  { %v7946_v14 = vpop.eup %5546  ;;  %v3546_v15 = vadd.f32 %v7930_v55, %v3354_v29  ;;  %5566 = vpow2.f32 %v7842_v42  ;;  %v3648_v62 = vsub.f32 %v3008_v40, %v3040_v10  ;;  %v3039_v57 = vmax.f32 %v9491_v9, %v3007_v23  ;;  %v9493_v42 = vld [vmem:[#allocation137_spill] sm:$0xff] }
 0x2d6   :  { %9490 = vst [vmem:[#allocation6_spill] sm:$0xff] %v7946_v14  ;;  %v7951_v49 = vpop.eup %5548  ;;  %5568 = vpow2.f32 %v3113_v52  ;;  %v7953_v50 = vmul.f32 1.442695, %v3072_v0  ;;  %v7955_v35 = vmul.f32 1.442695, %v3264_v12  ;;  %v9494_v10 = vld [vmem:[#allocation173_spill] sm:$0xff] }
 0x2d7   :  { %v7957_v21 = vmul.f32 1.442695, %v3456_v2  ;;  %v7959_v32 = vpop.eup %5550  ;;  %v3738_v26 = vadd.f32 %v7946_v14, %v3546_v15  ;;  %5570 = vpow2.f32 %v7868_v41  ;;  %v7963_v29 = vmul.f32 1.442695, %v3648_v62  ;;  %v9495_v12 = vld [vmem:[#allocation197_spill] sm:$0xff] }
 0x2d8   :  { %9492 = vst [vmem:[#allocation172_spill] sm:$0xff] %v7959_v32  ;;  %v3071_v40 = vsub.f32 %v9493_v42, %v3039_v57  ;;  %v7966_v9 = vpop.eup %5552  ;;  %v3353_v52 = vadd.f32 %v7959_v32, %v7951_v49  ;;  %5572 = vpow2.f32 %v7872_v45  ;;  %v3263_v0 = vsub.f32 %v9494_v10, %v3039_v57 }
 0x2d9   :  { %v3455_v2 = vsub.f32 %v9495_v12, %v3039_v57  ;;  %v7973_v55 = vpop.eup %5554  ;;  %5574 = vrcp.f32 %v3738_v26  ;;  %v3647_v41 = vsub.f32 %v3007_v23, %v3039_v57  ;;  %v3042_v62 = vmax.f32 %v7440_v63, %v3010_v46  ;;  %v9498_v23 = vld [vmem:[#allocation174_spill] sm:$0xff] }
 0x2da   :  { %9496 = vst [vmem:[#allocation196_spill] sm:$0xff] %v7973_v55  ;;  %v7975_v15 = vmul.f32 1.442695, %v3071_v40  ;;  %v7978_v42 = vpop.eup %5556  ;;  %v3545_v14 = vadd.f32 %v7966_v9, %v3353_v52  ;;  %5576 = vpow2.f32 %v7874_v61  ;;  %v7982_v32 = vmul.f32 1.442695, %v3263_v0  ;;  %v9500_v61 = vld [vmem:[#allocation199_spill] sm:$0xff] }
 0x2db   :  { %v7984_v45 = vmul.f32 1.442695, %v3455_v2  ;;  %v7986_v10 = vpop.eup %5558  ;;  %5578 = vpow2.f32 %v7885_v6  ;;  %v7989_v26 = vmul.f32 1.442695, %v3647_v41  ;;  %v3074_v57 = vsub.f32 %v7004_v58, %v3042_v62 }
 0x2dc   :  { %9497 = vst [vmem:[#allocation198_spill] sm:$0xff] %v7986_v10  ;;  %v3266_v63 = vsub.f32 %v9498_v23, %v3042_v62  ;;  %v7993_v40 = vpop.eup %5560  ;;  %v3737_v52 = vadd.f32 %v7978_v42, %v3545_v14  ;;  %5580 = vpow2.f32 %v7891_v28  ;;  %v3458_v0 = vsub.f32 %v9500_v61, %v3042_v62  ;;  %v9502_v61 = vld [vmem:[#allocation38_spill] sm:$0xff] }
 0x2dd   :  { %9499 = vst [vmem:[#allocation137_spill] sm:$0xff] %v7993_v40  ;;  %v3650_v12 = vsub.f32 %v3010_v46, %v3042_v62  ;;  %v7998_v2 = vpop.eup %5562  ;;  %v3356_v6 = vadd.f32 %v7993_v40, %v7986_v10  ;;  %5582 = vpow2.f32 %v7893_v31  ;;  %v8003_v41 = vmul.f32 1.442695, %v3074_v57  ;;  %v9504_v31 = vld [vmem:[#allocation70_spill] sm:$0xff] }
 0x2de   :  { %9501 = vst [vmem:[#allocation173_spill] sm:$0xff] %v7998_v2  ;;  %v8005_v58 = vmul.f32 1.442695, %v3266_v63  ;;  %v8007_v23 = vpop.eup %5564  ;;  %5584 = vrcp.f32 %v3737_v52  ;;  %v8009_v14 = vmul.f32 1.442695, %v3458_v0  ;;  %v3373_v46 = vmul.f32 %v7596_v8, %v9502_v61  ;;  %v9505_v63 = vld [vmem:[#allocation102_spill] sm:$0xff] }
 0x2df   :  { %v8011_v28 = vmul.f32 1.442695, %v3650_v12  ;;  %v8015_v62 = vpop.eup %5566  ;;  %v3548_v40 = vadd.f32 %v7998_v2, %v3356_v6  ;;  %5586 = vpow2.f32 %v7900_v24  ;;  %v3565_v57 = vmul.f32 %v7601_v19, %v9504_v31  ;;  %v9509_v61 = vld [vmem:[#allocation152_spill] sm:$0xff]  ;;  %v9515_v2 = vld [vmem:[#allocation69_spill] sm:$0xff] }
 0x2e0   :  { %9503 = vst [vmem:[#allocation197_spill] sm:$0xff] %v8015_v62  ;;  %v3757_v10 = vmul.f32 %v7607_v7, %v9505_v63  ;;  %v8023_v52 = vpop.eup %5568  ;;  %5588 = vpow2.f32 %v7911_v11  ;;  %v3405_v0 = vadd.f32 %v3373_v46, %v7939_v60  ;;  %v3009_v8 = vadd.f32 %v7526_v27, %v7708_v25  ;;  %v9508_v7 = vld [vmem:[#allocation5_spill] sm:$0xff] }
 0x2e1   :  { %9506 = vst [vmem:[#allocation174_spill] sm:$0xff] %v8023_v52  ;;  %v3854_v12 = vmul.f32 %v7678_v1, %v7614_v39  ;;  %v8031_v6 = vpop.eup %5570  ;;  %v3740_v24 = vadd.f32 %v8015_v62, %v3548_v40  ;;  %5590 = vpow2.f32 %v7917_v54  ;;  %v3012_v19 = vadd.f32 %v7719_v34, %v7526_v27  ;;  %v9510_v1 = vld [vmem:[#allocation201_spill] sm:$0xff]  ;;  %v9512_v54 = vld [vmem:[#allocation204_spill] sm:$0xff] }
 0x2e2   :  { %9507 = vst [vmem:[#allocation199_spill] sm:$0xff] %v8031_v6  ;;  %v3183_v11 = vmul.f32 %v9509_v61, %v9508_v7  ;;  %v8039_v31 = vpop.eup %5572  ;;  %v3355_v25 = vadd.f32 %v8031_v6, %v8023_v52  ;;  %5592 = vpow2.f32 %v7919_v17  ;;  %v3597_v39 = vadd.f32 %v3565_v57, %v3405_v0  ;;  %v9513_v63 = vld [vmem:[#allocation37_spill] sm:$0xff]  ;;  %v9516_v7 = vld [vmem:[#allocation154_spill] sm:$0xff] }
 0x2e3   :  { %v3041_v60 = vmax.f32 %v9510_v1, %v3009_v8  ;;  %v8045_v46 = vpop.eup %5574  ;;  %5594 = vrcp.f32 %v3740_v24  ;;  %v3044_v40 = vmax.f32 %v9512_v54, %v3012_v19  ;;  %v9514_v34 = vld [vmem:[#allocation153_spill] sm:$0xff]  ;;  %v3567_v61 = vmul.f32 %v9516_v7, %v9515_v2  ;;  %v9517_v57 = vld [vmem:[#allocation138_spill] sm:$0xff]  ;;  %v9518_v24 = vld [vmem:[#allocation175_spill] sm:$0xff] }
 0x2e4   :  { %9511 = vst [vmem:[#allocation38_spill] sm:$0xff] %v8045_v46  ;;  %v3375_v62 = vmul.f32 %v9514_v34, %v9513_v63  ;;  %v8052_v55 = vpop.eup %5576  ;;  %v3547_v6 = vadd.f32 %v8039_v31, %v3355_v25  ;;  %5596 = vpow2.f32 %v7921_v3  ;;  %v3789_v17 = vadd.f32 %v3757_v10, %v3597_v39  ;;  %v9519_v46 = vld [vmem:[#allocation200_spill] sm:$0xff] }
 0x2e5   :  { %v3073_v0 = vsub.f32 %v9517_v57, %v3041_v60  ;;  %v8057_v1 = vpop.eup %5578  ;;  %5598 = vpow2.f32 %v7953_v50  ;;  %v3265_v54 = vsub.f32 %v9518_v24, %v3041_v60  ;;  %v3457_v63 = vsub.f32 %v9519_v46, %v3041_v60  ;;  %v9522_v46 = vld [vmem:[#allocation176_spill] sm:$0xff] }
 0x2e6   :  { %v3649_v34 = vsub.f32 %v3009_v8, %v3041_v60  ;;  %v8062_v52 = vpop.eup %5580  ;;  %v3739_v2 = vadd.f32 %v8052_v55, %v3547_v6  ;;  %5600 = vpow2.f32 %v7955_v35  ;;  %v3853_v3 = vmul.f32 %v7696_v30, %v3789_v17  ;;  %v9521_v30 = vld [vmem:[#allocation139_spill] sm:$0xff] }
 0x2e7   :  { %v8067_v10 = vmul.f32 1.442695, %v3073_v0  ;;  %v8069_v25 = vpop.eup %5582  ;;  %v3358_v50 = vadd.f32 %v8062_v52, %v8057_v1  ;;  %5602 = vpow2.f32 %v7957_v21  ;;  %v8074_v39 = vmul.f32 1.442695, %v3265_v54  ;;  %v9524_v21 = vld [vmem:[#allocation202_spill] sm:$0xff] }
 0x2e8   :  { %9520 = vst [vmem:[#allocation70_spill] sm:$0xff] %v8069_v25  ;;  %v8076_v8 = vmul.f32 1.442695, %v3457_v63  ;;  %v8078_v60 = vpop.eup %5584  ;;  %5604 = vrcp.f32 %v3739_v2  ;;  %5270 = vmatprep.mubr.msk.f32.mxu1 %vm1731_vm2, %v3853_v3  ;;  %v8081_v35 = vmul.f32 1.442695, %v3649_v34  ;;  %v3076_v6 = vsub.f32 %v9521_v30, %v3044_v40  ;;  %v9525_v30 = vld [vmem:[#allocation101_spill] sm:$0xff] }
 0x2e9   :  { %v3268_v7 = vsub.f32 %v9522_v46, %v3044_v40  ;;  %v8085_v17 = vpop.eup %5586  ;;  %v3550_v57 = vadd.f32 %v8069_v25, %v3358_v50  ;;  %5606 = vpow2.f32 %v7963_v29  ;;  %5271 = vmatmul.mubr.msk.f32.vlgmr.msra.gmra.mrb[128].mxu1 %vm1731_vm2, %v3854_v12  ;;  %v3460_v0 = vsub.f32 %v9524_v21, %v3044_v40  ;;  %v9528_v46 = vld [vmem:[#allocation7_spill] sm:$0xff]  ;;  %v9537_v25 = vld [vmem:[#allocation186_spill] sm:$0xff] }
 0x2ea   :  { %9523 = vst [vmem:[#allocation102_spill] sm:$0xff] %v8085_v17  ;;  %v3652_v24 = vsub.f32 %v3012_v19, %v3044_v40  ;;  %v8091_v54 = vpop.eup %5588  ;;  %5608 = vpow2.f32 %v7975_v15  ;;  %v8094_v63 = vmul.f32 1.442695, %v3076_v6  ;;  %v3407_v2 = vadd.f32 %v3375_v62, %v3183_v11  ;;  %v9526_v62 = vld [vmem:[#allocation187_spill] sm:$0xff] }
 0x2eb   :  { %v8096_v34 = vmul.f32 1.442695, %v3268_v7  ;;  %v8098_v3 = vpop.eup %5590  ;;  %v3742_v50 = vadd.f32 %v8085_v17, %v3550_v57  ;;  %5610 = vpow2.f32 %v7982_v32  ;;  %v8102_v29 = vmul.f32 1.442695, %v3460_v0  ;;  %v9529_v7 = vld [vmem:[#allocation149_spill] sm:$0xff]  ;;  %v9530_v21 = vld [vmem:[#allocation39_spill] sm:$0xff] }
 0x2ec   :  { %v8104_v12 = vmul.f32 1.442695, %v3652_v24  ;;  %v8106_v19 = vpop.eup %5592  ;;  %v3357_v15 = vadd.f32 %v8098_v3, %v8091_v54  ;;  %5612 = vpow2.f32 %v7984_v45  ;;  %v3599_v40 = vadd.f32 %v3567_v61, %v3407_v2  ;;  %v9531_v0 = vld [vmem:[#allocation150_spill] sm:$0xff]  ;;  %v9532_v2 = vld [vmem:[#allocation71_spill] sm:$0xff] }
 0x2ed   :  { %v3759_v11 = vmul.f32 %v9526_v62, %v9525_v30  ;;  %v8113_v6 = vpop.eup %5594  ;;  %5614 = vrcp.f32 %v3742_v50  ;;  %v3011_v32 = vadd.f32 %v7526_v27, %v7726_v44  ;;  %v3184_v57 = vmul.f32 %v9529_v7, %v9528_v46  ;;  %v9533_v30 = vld [vmem:[#allocation151_spill] sm:$0xff]  ;;  %v9535_v44 = vld [vmem:[#allocation205_spill] sm:$0xff] }
 0x2ee   :  { %9527 = vst [vmem:[#allocation5_spill] sm:$0xff] %v8113_v6  ;;  %v3376_v24 = vmul.f32 %v9531_v0, %v9530_v21  ;;  %v8121_v17 = vpop.eup %5596  ;;  %v3549_v45 = vadd.f32 %v8106_v19, %v3357_v15  ;;  %5616 = vpow2.f32 %v7989_v26  ;;  %v3568_v62 = vmul.f32 %v9533_v30, %v9532_v2  ;;  %v9536_v7 = vld [vmem:[#allocation103_spill] sm:$0xff] }
 0x2ef   :  { %v3791_v61 = vadd.f32 %v3759_v11, %v3599_v40  ;;  %v8127_v50 = vpop.eup %5598  ;;  %5618 = vpow2.f32 %v8003_v41  ;;  %v3043_v6 = vmax.f32 %v9535_v44, %v3011_v32  ;;  %v3760_v21 = vmul.f32 %v9537_v25, %v9536_v7 }
 0x2f0   :  { %9534 = vst [vmem:[#allocation152_spill] sm:$0xff] %v8127_v50  ;;  %v3408_v46 = vadd.f32 %v3376_v24, %v3184_v57  ;;  %v8133_v0 = vpop.eup %5600  ;;  %v3741_v15 = vadd.f32 %v8121_v17, %v3549_v45  ;;  %5620 = vpow2.f32 %v8005_v58  ;;  %v3014_v40 = vadd.f32 %v7742_v48, %v7526_v27  ;;  %v9540_v57 = vld [vmem:[#allocation140_spill] sm:$0xff]  ;;  %v9541_v24 = vld [vmem:[#allocation177_spill] sm:$0xff] }
 0x2f1   :  { %9538 = vst [vmem:[#allocation201_spill] sm:$0xff] %v8133_v0  ;;  %v3855_v26 = vmul.f32 %v7744_v36, %v3791_v61  ;;  %v8140_v11 = vpop.eup %5602  ;;  %v3360_v41 = vadd.f32 %v8133_v0, %v8127_v50  ;;  %5622 = vpow2.f32 %v8009_v14  ;;  %v3075_v25 = vsub.f32 %v9540_v57, %v3043_v6  ;;  %v9542_v36 = vld [vmem:[#allocation203_spill] sm:$0xff] }
 0x2f2   :  { %9539 = vst [vmem:[#allocation204_spill] sm:$0xff] %v8140_v11  ;;  %v3267_v2 = vsub.f32 %v9541_v24, %v3043_v6  ;;  %v8147_v30 = vpop.eup %5604  ;;  %5624 = vrcp.f32 %v3741_v15  ;;  %v3459_v58 = vsub.f32 %v9542_v36, %v3043_v6  ;;  %v3651_v45 = vsub.f32 %v3011_v32, %v3043_v6  ;;  %v9544_v32 = vld [vmem:[#allocation208_spill] sm:$0xff]  ;;  %v9549_v36 = vld [vmem:[#allocation42_spill] sm:$0xff] }
 0x2f3   :  { %5273 = vmatprep.mubr.msk.f32.mxu1 %vm1731_vm2, %v3855_v26  ;;  %v3600_v48 = vadd.f32 %v3568_v62, %v3408_v46  ;;  %v8151_v61 = vpop.eup %5606  ;;  %v3552_v44 = vadd.f32 %v8140_v11, %v3360_v41  ;;  %5626 = vpow2.f32 %v8011_v28  ;;  %v3129_v14 = vmul.f32 1.442695, %v3075_v25  ;;  %v9545_v46 = vld [vmem:[#allocation10_spill] sm:$0xff]  ;;  %v9546_v28 = vld [vmem:[#allocation156_spill] sm:$0xff] }
 0x2f4   :  { %9543 = vst [vmem:[#allocation37_spill] sm:$0xff] %v8151_v61  ;;  %v3321_v7 = vmul.f32 1.442695, %v3267_v2  ;;  %v8155_v57 = vpop.eup %5608  ;;  %5628 = vpow2.f32 %v8067_v10  ;;  %v3513_v24 = vmul.f32 1.442695, %v3459_v58  ;;  %v3046_v62 = vmax.f32 %v9544_v32, %v3014_v40  ;;  %v9548_v2 = vld [vmem:[#allocation158_spill] sm:$0xff] }
 0x2f5   :  { %v8158_v15 = vmul.f32 1.442695, %v3651_v45  ;;  %v3792_v26 = vadd.f32 %v3760_v21, %v3600_v48  ;;  %v8160_v0 = vpop.eup %5610  ;;  %v3744_v6 = vadd.f32 %v8151_v61, %v3552_v44  ;;  %5630 = vpow2.f32 %v8074_v39  ;;  %v9550_v58 = vld [vmem:[#allocation157_spill] sm:$0xff]  ;;  %v9553_v32 = vld [vmem:[#allocation178_spill] sm:$0xff] }
 0x2f6   :  { %v3185_v41 = vmul.f32 %v9546_v28, %v9545_v46  ;;  %v8167_v25 = vpop.eup %5612  ;;  %v3359_v10 = vadd.f32 %v8160_v0, %v8155_v57  ;;  %5632 = vpow2.f32 %v8076_v8  ;;  %v3377_v45 = vmul.f32 %v9550_v58, %v9549_v36  ;;  %v9552_v39 = vld [vmem:[#allocation141_spill] sm:$0xff]  ;;  %v9554_v46 = vld [vmem:[#allocation206_spill] sm:$0xff] }
 0x2f7   :  { %9547 = vst [vmem:[#allocation153_spill] sm:$0xff] %v8167_v25  ;;  %v3856_v21 = vmul.f32 %v9548_v2, %v3792_v26  ;;  %v8175_v48 = vpop.eup %5614  ;;  %5634 = vrcp.f32 %v3744_v6  ;;  %v3078_v44 = vsub.f32 %v9552_v39, %v3046_v62  ;;  %v3270_v61 = vsub.f32 %v9553_v32, %v3046_v62 }
 0x2f8   :  { %9551 = vst [vmem:[#allocation69_spill] sm:$0xff] %v8175_v48  ;;  %v3462_v28 = vsub.f32 %v9554_v46, %v3046_v62  ;;  %v8180_v11 = vpop.eup %5616  ;;  %v3551_v50 = vadd.f32 %v8167_v25, %v3359_v10  ;;  %5636 = vpow2.f32 %v8081_v35  ;;  %v3654_v8 = vsub.f32 %v3014_v40, %v3046_v62  ;;  %v9558_v35 = vld [vmem:[#allocation74_spill] sm:$0xff]  ;;  %v9559_v46 = vld [vmem:[#allocation104_spill] sm:$0xff] }
 0x2f9   :  { %9555 = vst [vmem:[#allocation154_spill] sm:$0xff] %v8180_v11  ;;  %5274 = vmatmul.mubr.msk.f32.gmra.mrb[130].mxu1 %vm1731_vm2, %v3856_v21  ;;  %v3409_v26 = vadd.f32 %v3377_v45, %v3185_v41  ;;  %v8185_v2 = vpop.eup %5618  ;;  %5638 = vpow2.f32 %v8094_v63  ;;  %v3135_v6 = vmul.f32 1.442695, %v3078_v44  ;;  %v3327_v36 = vmul.f32 1.442695, %v3270_v61  ;;  %v9561_v63 = vld [vmem:[#allocation106_spill] sm:$0xff] }
 0x2fa   :  { %9556 = vst [vmem:[#allocation138_spill] sm:$0xff] %v8185_v2  ;;  %v3519_v58 = vmul.f32 1.442695, %v3462_v28  ;;  %v8188_v39 = vpop.eup %5620  ;;  %v3743_v32 = vadd.f32 %v8180_v11, %v3551_v50  ;;  %5640 = vpow2.f32 %v8096_v34  ;;  %v8192_v10 = vmul.f32 1.442695, %v3654_v8  ;;  %v9562_v61 = vld [vmem:[#allocation188_spill] sm:$0xff] }
 0x2fb   :  { %9557 = vst [vmem:[#allocation175_spill] sm:$0xff] %v8188_v39  ;;  %v3569_v21 = vmul.f32 %v9559_v46, %v9558_v35  ;;  %v8196_v40 = vpop.eup %5622  ;;  %v3362_v62 = vadd.f32 %v8188_v39, %v8185_v2  ;;  %5642 = vpow2.f32 %v8102_v29  ;;  %v3761_v41 = vmul.f32 %v9562_v61, %v9561_v63  ;;  %v9564_v44 = vld [vmem:[#allocation12_spill] sm:$0xff]  ;;  %v9565_v28 = vld [vmem:[#allocation155_spill] sm:$0xff]  ;;  %v9568_v63 = vld [vmem:[#allocation209_spill] sm:$0xff] }
 0x2fc   :  { %9560 = vst [vmem:[#allocation200_spill] sm:$0xff] %v8196_v40  ;;  %v3013_v50 = vadd.f32 %v7526_v27, %v7748_v53  ;;  %v8205_v45 = vpop.eup %5624  ;;  %5644 = vrcp.f32 %v3743_v32  ;;  %v3186_v8 = vmul.f32 %v9565_v28, %v9564_v44  ;;  %v9566_v35 = vld [vmem:[#allocation44_spill] sm:$0xff] }
 0x2fd   :  { %9563 = vst [vmem:[#allocation139_spill] sm:$0xff] %v8205_v45  ;;  %v3601_v34 = vadd.f32 %v3569_v21, %v3409_v26  ;;  %v9567_v46 = vld [vmem:[#allocation8_spill] sm:$0xff]  ;;  %v8211_v11 = vpop.eup %5626  ;;  %v3554_v29 = vadd.f32 %v8196_v40, %v3362_v62  ;;  %5646 = vpow2.f32 %v8104_v12  ;;  %v9573_v62 = vld [vmem:[#allocation142_spill] sm:$0xff]  ;;  %v9574_v40 = vld [vmem:[#allocation179_spill] sm:$0xff] }
 0x2fe   :  { %v3378_v48 = vmul.f32 %v9567_v46, %v9566_v35  ;;  %v3045_v61 = vmax.f32 %v9568_v63, %v3013_v50  ;;  %v9569_v39 = vld [vmem:[#allocation76_spill] sm:$0xff]  ;;  %v8218_v45 = vpop.eup %5628  ;;  %5648 = vpow2.f32 %v3129_v14 }
 0x2ff   :  { %v9570_v53 = vld [vmem:[#allocation40_spill] sm:$0xff]  ;;  %v3793_v26 = vadd.f32 %v3761_v41, %v3601_v34  ;;  %v8222_v35 = vpop.eup %5630  ;;  %v3746_v46 = vadd.f32 %v8211_v11, %v3554_v29  ;;  %5650 = vpow2.f32 %v3321_v7 }
 0x300   :  { %v3570_v2 = vmul.f32 %v9570_v53, %v9569_v39  ;;  %v3410_v32 = vadd.f32 %v3378_v48, %v3186_v8  ;;  %v9571_v21 = vld [vmem:[#allocation108_spill] sm:$0xff]  ;;  %v3077_v12 = vsub.f32 %v9573_v62, %v3045_v61  ;;  %v3269_v63 = vsub.f32 %v9574_v40, %v3045_v61  ;;  %v8227_v25 = vpop.eup %5632  ;;  %v9575_v48 = vld [vmem:[#allocation207_spill] sm:$0xff]  ;;  %v9579_v62 = vld [vmem:[#allocation162_spill] sm:$0xff] }
 0x301   :  { %v9572_v44 = vld [vmem:[#allocation72_spill] sm:$0xff]  ;;  %v3361_v39 = vadd.f32 %v8222_v35, %v8218_v45  ;;  %5652 = vpow2.f32 %v3513_v24  ;;  %v3857_v14 = vmul.f32 %v7808_v47, %v3793_v26  ;;  %v3461_v41 = vsub.f32 %v9575_v48, %v3045_v61  ;;  %v8233_v34 = vpop.eup %5634  ;;  %v9585_v48 = vld [vmem:[#allocation73_spill] sm:$0xff] }
 0x302   :  { %v3762_v28 = vmul.f32 %v9572_v44, %v9571_v21  ;;  %9576 = vst [vmem:[#allocation176_spill] sm:$0xff] %v8233_v34  ;;  %5654 = vrcp.f32 %v3746_v46  ;;  %v3133_v8 = vmul.f32 1.442695, %v3077_v12  ;;  %v3325_v29 = vmul.f32 1.442695, %v3269_v63  ;;  %v8235_v53 = vpop.eup %5636  ;;  %v9578_v46 = vld [vmem:[#allocation9_spill] sm:$0xff] }
 0x303   :  { %v3653_v7 = vsub.f32 %v3013_v50, %v3045_v61  ;;  %v3553_v40 = vadd.f32 %v8227_v25, %v3361_v39  ;;  %5656 = vpow2.f32 %v8158_v15  ;;  %5276 = vmatprep.mubr.msk.f32.mxu1 %vm1731_vm2, %v3857_v14  ;;  %v3517_v21 = vmul.f32 1.442695, %v3461_v41  ;;  %v8240_v44 = vpop.eup %5638  ;;  %v9581_v63 = vld [vmem:[#allocation41_spill] sm:$0xff]  ;;  %v9582_v39 = vld [vmem:[#allocation163_spill] sm:$0xff] }
 0x304   :  { %v3602_v24 = vadd.f32 %v3570_v2, %v3410_v32  ;;  %9577 = vst [vmem:[#allocation202_spill] sm:$0xff] %v8240_v44  ;;  %5658 = vpow2.f32 %v3135_v6  ;;  %v3016_v26 = vadd.f32 %v7767_v16, %v7526_v27  ;;  %v3187_v50 = vmul.f32 %v9579_v62, %v9578_v46  ;;  %v8246_v61 = vpop.eup %5640  ;;  %v9584_v32 = vld [vmem:[#allocation212_spill] sm:$0xff] }
 0x305   :  { %v3709_v47 = vmul.f32 1.442695, %v3653_v7  ;;  %9580 = vst [vmem:[#allocation101_spill] sm:$0xff] %v8246_v61  ;;  %v3745_v12 = vadd.f32 %v8235_v53, %v3553_v40  ;;  %5660 = vpow2.f32 %v3327_v36  ;;  %v3379_v14 = vmul.f32 %v9582_v39, %v9581_v63  ;;  %v8251_v2 = vpop.eup %5642  ;;  %v9586_v40 = vld [vmem:[#allocation190_spill] sm:$0xff] }
 0x306   :  { %v3794_v15 = vadd.f32 %v3762_v28, %v3602_v24  ;;  %9583 = vst [vmem:[#allocation187_spill] sm:$0xff] %v8251_v2  ;;  %v3364_v6 = vadd.f32 %v8246_v61, %v8240_v44  ;;  %5662 = vpow2.f32 %v3519_v58  ;;  %v3048_v16 = vmax.f32 %v9584_v32, %v3016_v26  ;;  %v8258_v7 = vpop.eup %5644  ;;  %v9587_v24 = vld [vmem:[#allocation105_spill] sm:$0xff]  ;;  %v9589_v58 = vld [vmem:[#allocation143_spill] sm:$0xff]  ;;  %v9590_v32 = vld [vmem:[#allocation180_spill] sm:$0xff] }
 0x307   :  { %v3571_v41 = vmul.f32 %v7781_v38, %v9585_v48  ;;  %5664 = vrcp.f32 %v3745_v12  ;;  %v3411_v28 = vadd.f32 %v3379_v14, %v3187_v50  ;;  %v3763_v46 = vmul.f32 %v7786_v43, %v9587_v24  ;;  %v8263_v62 = vpop.eup %5646  ;;  %v9591_v12 = vld [vmem:[#allocation210_spill] sm:$0xff] }
 0x308   :  { %v3858_v36 = vmul.f32 %v9586_v40, %v3794_v15  ;;  %9588 = vst [vmem:[#allocation7_spill] sm:$0xff] %v8263_v62  ;;  %v3556_v63 = vadd.f32 %v8251_v2, %v3364_v6  ;;  %5666 = vpow2.f32 %v8192_v10  ;;  %v3080_v39 = vsub.f32 %v9589_v58, %v3048_v16  ;;  %v8269_v38 = vpop.eup %5648 }
 0x309   :  { %v3272_v61 = vsub.f32 %v9590_v32, %v3048_v16  ;;  %5668 = vpow2.f32 %v3133_v8  ;;  %v3464_v50 = vsub.f32 %v9591_v12, %v3048_v16  ;;  %v3656_v15 = vsub.f32 %v3016_v26, %v3048_v16  ;;  %v8273_v43 = vpop.eup %5650  ;;  %v9593_v16 = vld [vmem:[#allocation164_spill] sm:$0xff]  ;;  %v9596_v32 = vld [vmem:[#allocation43_spill] sm:$0xff] }
 0x30a   :  { %5277 = vmatmul.mubr.msk.f32.gmra.mrb[132].mxu1 %vm1731_vm2, %v3858_v36  ;;  %v3603_v14 = vadd.f32 %v3571_v41, %v3411_v28  ;;  %v3748_v48 = vadd.f32 %v8263_v62, %v3556_v63  ;;  %5670 = vpow2.f32 %v3325_v29  ;;  %v3139_v6 = vmul.f32 1.442695, %v3080_v39  ;;  %v9594_v28 = vld [vmem:[#allocation11_spill] sm:$0xff]  ;;  %v9597_v12 = vld [vmem:[#allocation160_spill] sm:$0xff] }
 0x30b   :  { %v3331_v10 = vmul.f32 1.442695, %v3272_v61  ;;  %v8276_v40 = vpop.eup %5652  ;;  %v3363_v24 = vadd.f32 %v8273_v43, %v8269_v38  ;;  %5672 = vpow2.f32 %v3517_v21  ;;  %v3523_v8 = vmul.f32 1.442695, %v3464_v50  ;;  %v9595_v63 = vld [vmem:[#allocation159_spill] sm:$0xff] }
 0x30c   :  { %v3715_v58 = vmul.f32 1.442695, %v3656_v15  ;;  %v8280_v36 = vpop.eup %5654  ;;  %5674 = vrcp.f32 %v3748_v48  ;;  %v3795_v26 = vadd.f32 %v3763_v46, %v3603_v14  ;;  %v3015_v41 = vadd.f32 %v7526_v27, %v9593_v16  ;;  %v9598_v50 = vld [vmem:[#allocation75_spill] sm:$0xff]  ;;  %v9599_v15 = vld [vmem:[#allocation189_spill] sm:$0xff] }
 0x30d   :  { %9592 = vst [vmem:[#allocation149_spill] sm:$0xff] %v8280_v36  ;;  %v3188_v29 = vmul.f32 %v9595_v63, %v9594_v28  ;;  %v8286_v39 = vpop.eup %5656  ;;  %v3555_v61 = vadd.f32 %v8276_v40, %v3363_v24  ;;  %5676 = vpow2.f32 %v3709_v47  ;;  %v3380_v21 = vmul.f32 %v9597_v12, %v9596_v32  ;;  %v9601_v14 = vld [vmem:[#allocation213_spill] sm:$0xff]  ;;  %v9602_v16 = vld [vmem:[#allocation107_spill] sm:$0xff] }
 0x30e   :  { %v3572_v62 = vmul.f32 %v9599_v15, %v9598_v50  ;;  %v8293_v36 = vpop.eup %5658  ;;  %5678 = vpow2.f32 %v3139_v6  ;;  %v3859_v46 = vmul.f32 %v7870_v56, %v3795_v26  ;;  %v3047_v48 = vmax.f32 %v9601_v14, %v3015_v41  ;;  %v9603_v28 = vld [vmem:[#allocation161_spill] sm:$0xff]  ;;  %v9605_v32 = vld [vmem:[#allocation191_spill] sm:$0xff]  ;;  %v9606_v56 = vld [vmem:[#allocation144_spill] sm:$0xff] }
 0x30f   :  { %9600 = vst [vmem:[#allocation39_spill] sm:$0xff] %v8293_v36  ;;  %v3764_v63 = vmul.f32 %v9603_v28, %v9602_v16  ;;  %v8299_v2 = vpop.eup %5660  ;;  %v3747_v47 = vadd.f32 %v8286_v39, %v3555_v61  ;;  %5680 = vpow2.f32 %v3331_v10  ;;  %v3412_v24 = vadd.f32 %v3380_v21, %v3188_v29  ;;  %v9607_v15 = vld [vmem:[#allocation181_spill] sm:$0xff]  ;;  %v9609_v10 = vld [vmem:[#allocation211_spill] sm:$0xff] }
 0x310   :  { %9604 = vst [vmem:[#allocation150_spill] sm:$0xff] %v8299_v2  ;;  %v3018_v12 = vadd.f32 %v9605_v32, %v7526_v27  ;;  %v8304_v50 = vpop.eup %5662  ;;  %v3366_v6 = vadd.f32 %v8299_v2, %v8293_v36  ;;  %5682 = vpow2.f32 %v3523_v8  ;;  %5279 = vmatprep.mubr.msk.f32.mxu1 %vm1731_vm2, %v3859_v46  ;;  %v3079_v26 = vsub.f32 %v9606_v56, %v3047_v48 }
 0x311   :  { %v3271_v14 = vsub.f32 %v9607_v15, %v3047_v48  ;;  %v8311_v16 = vpop.eup %5664  ;;  %5684 = vrcp.f32 %v3747_v47  ;;  %v3463_v29 = vsub.f32 %v9609_v10, %v3047_v48  ;;  %v3655_v61 = vsub.f32 %v3015_v41, %v3047_v48  ;;  %v9610_v15 = vld [vmem:[#allocation216_spill] sm:$0xff]  ;;  %v9612_v48 = vld [vmem:[#allocation46_spill] sm:$0xff] }
 0x312   :  { %9608 = vst [vmem:[#allocation71_spill] sm:$0xff] %v8311_v16  ;;  %v3604_v21 = vadd.f32 %v3572_v62, %v3412_v24  ;;  %v8314_v28 = vpop.eup %5666  ;;  %v3558_v32 = vadd.f32 %v8304_v50, %v3366_v6  ;;  %5686 = vpow2.f32 %v3715_v58  ;;  %v3137_v2 = vmul.f32 1.442695, %v3079_v26  ;;  %v9611_v62 = vld [vmem:[#allocation14_spill] sm:$0xff]  ;;  %v9613_v26 = vld [vmem:[#allocation145_spill] sm:$0xff] }
 0x313   :  { %v3329_v8 = vmul.f32 1.442695, %v3271_v14  ;;  %v8317_v36 = vpop.eup %5668  ;;  %v3521_v46 = vmul.f32 1.442695, %v3463_v29  ;;  %v3713_v56 = vmul.f32 1.442695, %v3655_v61  ;;  %v3050_v44 = vmax.f32 %v9610_v15, %v3018_v12 }
 0x314   :  { %v3796_v34 = vadd.f32 %v3764_v63, %v3604_v21  ;;  %v8320_v16 = vpop.eup %5670  ;;  %v3750_v47 = vadd.f32 %v8314_v28, %v3558_v32  ;;  %5688 = vpow2.f32 %v3137_v2  ;;  %v3189_v41 = vmul.f32 %v7819_v4, %v9611_v62  ;;  %v9615_v2 = vld [vmem:[#allocation182_spill] sm:$0xff] }
 0x315   :  { %v3381_v58 = vmul.f32 %v7827_v18, %v9612_v48  ;;  %v8327_v24 = vpop.eup %5672  ;;  %v3365_v6 = vadd.f32 %v8320_v16, %v8317_v36  ;;  %5690 = vpow2.f32 %v3329_v8  ;;  %v3082_v14 = vsub.f32 %v9613_v26, %v3050_v44  ;;  %v9616_v61 = vld [vmem:[#allocation214_spill] sm:$0xff] }
 0x316   :  { %v3860_v63 = vmul.f32 %v7838_v51, %v3796_v34  ;;  %v8333_v10 = vpop.eup %5674  ;;  %5692 = vrcp.f32 %v3750_v47  ;;  %v3274_v29 = vsub.f32 %v9615_v2, %v3050_v44  ;;  %v3466_v4 = vsub.f32 %v9616_v61, %v3050_v44 }
 0x317   :  { %9614 = vst [vmem:[#allocation151_spill] sm:$0xff] %v8333_v10  ;;  %v3658_v21 = vsub.f32 %v3018_v12, %v3050_v44  ;;  %v8337_v32 = vpop.eup %5676  ;;  %v3557_v18 = vadd.f32 %v8327_v24, %v3365_v6  ;;  %5694 = vpow2.f32 %v3521_v46  ;;  %v3143_v8 = vmul.f32 1.442695, %v3082_v14  ;;  %v9619_v44 = vld [vmem:[#allocation78_spill] sm:$0xff]  ;;  %v9623_v14 = vld [vmem:[#allocation127_spill] sm:$0xff] }
 0x318   :  { %5280 = vmatmul.mubr.msk.f32.gmra.mrb[134].mxu1 %vm1731_vm2, %v3860_v63  ;;  %v3413_v15 = vadd.f32 %v3381_v58, %v3189_v41  ;;  %v8341_v51 = vpop.eup %5678  ;;  %5696 = vpow2.f32 %v3713_v56  ;;  %v3335_v34 = vmul.f32 1.442695, %v3274_v29  ;;  %v3527_v62 = vmul.f32 1.442695, %v3466_v4  ;;  %v9620_v6 = vld [vmem:[#allocation110_spill] sm:$0xff]  ;;  %v9622_v58 = vld [vmem:[#allocation16_spill] sm:$0xff] }
 0x319   :  { %9617 = vst [vmem:[#allocation205_spill] sm:$0xff] %v8341_v51  ;;  %v3719_v47 = vmul.f32 1.442695, %v3658_v21  ;;  %v8343_v48 = vpop.eup %5680  ;;  %v3749_v26 = vadd.f32 %v8337_v32, %v3557_v18  ;;  %5698 = vpow2.f32 %v3143_v8  ;;  %v3573_v12 = vmul.f32 %v7831_v59, %v9619_v44  ;;  %v9624_v59 = vld [vmem:[#allocation48_spill] sm:$0xff]  ;;  %v9625_v4 = vld [vmem:[#allocation165_spill] sm:$0xff]  ;;  %v9627_v18 = vld [vmem:[#allocation166_spill] sm:$0xff] }
 0x31a   :  { %9618 = vst [vmem:[#allocation103_spill] sm:$0xff] %v8343_v48  ;;  %v3765_v46 = vmul.f32 %v7846_v22, %v9620_v6  ;;  %v8350_v63 = vpop.eup %5682  ;;  %v3368_v41 = vadd.f32 %v8343_v48, %v8341_v51  ;;  %5700 = vpow2.f32 %v3335_v34  ;;  %v3017_v56 = vadd.f32 %v7526_v27, %v7806_v33  ;;  %v9626_v22 = vld [vmem:[#allocation80_spill] sm:$0xff]  ;;  %v9629_v6 = vld [vmem:[#allocation217_spill] sm:$0xff]  ;;  %v9631_v10 = vld [vmem:[#allocation130_spill] sm:$0xff] }
 0x31b   :  { %9621 = vst [vmem:[#allocation186_spill] sm:$0xff] %v8350_v63  ;;  %v3190_v2 = vmul.f32 %v9623_v14, %v9622_v58  ;;  %v8358_v29 = vpop.eup %5684  ;;  %5702 = vrcp.f32 %v3749_v26  ;;  %v3605_v61 = vadd.f32 %v3573_v12, %v3413_v15  ;;  %v3382_v21 = vmul.f32 %v9625_v4, %v9624_v59  ;;  %v9630_v48 = vld [vmem:[#allocation112_spill] sm:$0xff]  ;;  %v9632_v15 = vld [vmem:[#allocation167_spill] sm:$0xff] }
 0x31c   :  { %v3574_v8 = vmul.f32 %v9627_v18, %v9626_v22  ;;  %v8364_v44 = vpop.eup %5686  ;;  %v3560_v34 = vadd.f32 %v8350_v63, %v3368_v41  ;;  %5704 = vpow2.f32 %v3527_v62  ;;  %v3049_v33 = vmax.f32 %v9629_v6, %v3017_v56  ;;  %v9633_v22 = vld [vmem:[#allocation146_spill] sm:$0xff]  ;;  %v9634_v51 = vld [vmem:[#allocation183_spill] sm:$0xff] }
 0x31d   :  { %9628 = vst [vmem:[#allocation140_spill] sm:$0xff] %v8364_v44  ;;  %v3766_v58 = vmul.f32 %v9631_v10, %v9630_v48  ;;  %5706 = vpow2.f32 %v3719_v47  ;;  %v3797_v14 = vadd.f32 %v3765_v46, %v3605_v61  ;;  %v3414_v26 = vadd.f32 %v3382_v21, %v3190_v2  ;;  %v9635_v62 = vld [vmem:[#allocation215_spill] sm:$0xff]  ;;  %v9636_v46 = vld [vmem:[#allocation220_spill] sm:$0xff] }
 0x31e   :  { %v3020_v12 = vadd.f32 %v9632_v15, %v7526_v27  ;;  %v8372_v59 = vpop.eup %5688  ;;  %v3752_v4 = vadd.f32 %v8364_v44, %v3560_v34  ;;  %v3081_v18 = vsub.f32 %v9633_v22, %v3049_v33  ;;  %v3273_v41 = vsub.f32 %v9634_v51, %v3049_v33 }
 0x31f   :  { %v3465_v63 = vsub.f32 %v9635_v62, %v3049_v33  ;;  %v8378_v6 = vpop.eup %5690  ;;  %v3861_v10 = vmul.f32 %v7941_v37, %v3797_v14  ;;  %v3657_v47 = vsub.f32 %v3017_v56, %v3049_v33  ;;  %v3606_v48 = vadd.f32 %v3574_v8, %v3414_v26  ;;  %v9638_v37 = vld [vmem:[#allocation147_spill] sm:$0xff]  ;;  %v9640_v14 = vld [vmem:[#allocation184_spill] sm:$0xff] }
 0x320   :  { %v3052_v2 = vmax.f32 %v9636_v46, %v3020_v12  ;;  %v8382_v61 = vpop.eup %5692  ;;  %5708 = vrcp.f32 %v3752_v4  ;;  %v3367_v21 = vadd.f32 %v8378_v6, %v8372_v59  ;;  %v3141_v34 = vmul.f32 1.442695, %v3081_v18  ;;  %v9641_v4 = vld [vmem:[#allocation218_spill] sm:$0xff] }
 0x321   :  { %9637 = vst [vmem:[#allocation177_spill] sm:$0xff] %v8382_v61  ;;  %v3333_v15 = vmul.f32 1.442695, %v3273_v41  ;;  %v8386_v22 = vpop.eup %5694  ;;  %5282 = vmatprep.mubr.msk.f32.mxu1 %vm1731_vm2, %v3861_v10  ;;  %v3525_v51 = vmul.f32 1.442695, %v3465_v63  ;;  %v3798_v44 = vadd.f32 %v3766_v58, %v3606_v48 }
 0x322   :  { %v3717_v62 = vmul.f32 1.442695, %v3657_v47  ;;  %v3084_v56 = vsub.f32 %v9638_v37, %v3052_v2  ;;  %v8390_v8 = vpop.eup %5696  ;;  %v3559_v33 = vadd.f32 %v8386_v22, %v3367_v21  ;;  %5710 = vpow2.f32 %v3141_v34 }
 0x323   :  { %9639 = vst [vmem:[#allocation203_spill] sm:$0xff] %v8390_v8  ;;  %v3276_v26 = vsub.f32 %v9640_v14, %v3052_v2  ;;  %v3468_v46 = vsub.f32 %v9641_v4, %v3052_v2  ;;  %v8395_v18 = vpop.eup %5698  ;;  %5712 = vpow2.f32 %v3333_v15  ;;  %v3862_v41 = vmul.f32 %v7903_v13, %v3798_v44  ;;  %v9645_v14 = vld [vmem:[#allocation13_spill] sm:$0xff]  ;;  %v9651_v4 = vld [vmem:[#allocation195_spill] sm:$0xff] }
 0x324   :  { %9642 = vst [vmem:[#allocation208_spill] sm:$0xff] %v8395_v18  ;;  %v3147_v10 = vmul.f32 1.442695, %v3084_v56  ;;  %v3660_v63 = vsub.f32 %v3020_v12, %v3052_v2  ;;  %v8398_v47 = vpop.eup %5700  ;;  %v3751_v58 = vadd.f32 %v8390_v8, %v3559_v33  ;;  %5714 = vpow2.f32 %v3525_v51  ;;  %v9647_v12 = vld [vmem:[#allocation45_spill] sm:$0xff]  ;;  %v9648_v2 = vld [vmem:[#allocation170_spill] sm:$0xff] }
 0x325   :  { %9643 = vst [vmem:[#allocation10_spill] sm:$0xff] %v8398_v47  ;;  %v3339_v48 = vmul.f32 1.442695, %v3276_v26  ;;  %v3531_v37 = vmul.f32 1.442695, %v3468_v46  ;;  %v8401_v21 = vpop.eup %5702  ;;  %v3370_v34 = vadd.f32 %v8398_v47, %v8395_v18  ;;  %5716 = vpow2.f32 %v3717_v62  ;;  %5283 = vmatmul.mubr.msk.f32.gmra.mrb[136].mxu1 %vm1731_vm2, %v3862_v41  ;;  %v9649_v56 = vld [vmem:[#allocation77_spill] sm:$0xff] }
 0x326   :  { %9644 = vst [vmem:[#allocation156_spill] sm:$0xff] %v8401_v21  ;;  %v3723_v15 = vmul.f32 1.442695, %v3660_v63  ;;  %v3191_v13 = vmul.f32 %v7883_v20, %v9645_v14  ;;  %v8408_v44 = vpop.eup %5704  ;;  %5718 = vrcp.f32 %v3751_v58  ;;  %v3383_v51 = vmul.f32 %v9648_v2, %v9647_v12  ;;  %v9650_v26 = vld [vmem:[#allocation109_spill] sm:$0xff]  ;;  %v9652_v41 = vld [vmem:[#allocation192_spill] sm:$0xff]  ;;  %v9653_v63 = vld [vmem:[#allocation15_spill] sm:$0xff] }
 0x327   :  { %9646 = vst [vmem:[#allocation158_spill] sm:$0xff] %v8408_v44  ;;  %v3575_v33 = vmul.f32 %v7895_v5, %v9649_v56  ;;  %v3767_v46 = vmul.f32 %v9651_v4, %v9650_v26  ;;  %v8416_v47 = vpop.eup %5706  ;;  %v3562_v62 = vadd.f32 %v8408_v44, %v3370_v34  ;;  %5720 = vpow2.f32 %v3147_v10  ;;  %v9654_v14 = vld [vmem:[#allocation168_spill] sm:$0xff]  ;;  %v9655_v12 = vld [vmem:[#allocation47_spill] sm:$0xff]  ;;  %v9656_v2 = vld [vmem:[#allocation133_spill] sm:$0xff] }
 0x328   :  { %v3019_v20 = vadd.f32 %v7526_v27, %v9652_v41  ;;  %v3192_v58 = vmul.f32 %v9654_v14, %v9653_v63  ;;  %5722 = vpow2.f32 %v3339_v48  ;;  %v3415_v61 = vadd.f32 %v3383_v51, %v3191_v13  ;;  %v9657_v5 = vld [vmem:[#allocation79_spill] sm:$0xff]  ;;  %v9658_v56 = vld [vmem:[#allocation169_spill] sm:$0xff]  ;;  %v9663_v13 = vld [vmem:[#allocation18_spill] sm:$0xff] }
 0x329   :  { %v3384_v18 = vmul.f32 %v9656_v2, %v9655_v12  ;;  %v3576_v21 = vmul.f32 %v9658_v56, %v9657_v5  ;;  %v3754_v26 = vadd.f32 %v8416_v47, %v3562_v62  ;;  %5724 = vpow2.f32 %v3531_v37  ;;  %v9659_v4 = vld [vmem:[#allocation221_spill] sm:$0xff]  ;;  %v9660_v10 = vld [vmem:[#allocation111_spill] sm:$0xff]  ;;  %v9664_v63 = vld [vmem:[#allocation148_spill] sm:$0xff] }
 0x32a   :  { %v3051_v34 = vmax.f32 %v9659_v4, %v3019_v20  ;;  %v9661_v44 = vld [vmem:[#allocation193_spill] sm:$0xff]  ;;  %v8431_v27 = vpop.eup %5708  ;;  %5726 = vpow2.f32 %v3723_v15  ;;  %v3607_v41 = vadd.f32 %v3575_v33, %v3415_v61  ;;  %v3193_v51 = vmul.f32 %v7951_v49, %v9663_v13  ;;  %v9666_v62 = vld [vmem:[#allocation219_spill] sm:$0xff] }
 0x32b   :  { %v3768_v8 = vmul.f32 %v9661_v44, %v9660_v10  ;;  %9662 = vst [vmem:[#allocation42_spill] sm:$0xff] %v8431_v27  ;;  %v3416_v48 = vadd.f32 %v3384_v18, %v3192_v58  ;;  %5728 = vrcp.f32 %v3754_v26  ;;  %v9665_v12 = vld [vmem:[#allocation185_spill] sm:$0xff]  ;;  %v9667_v10 = vld [vmem:[#allocation50_spill] sm:$0xff]  ;;  %v9668_v27 = vld [vmem:[#allocation172_spill] sm:$0xff] }
 0x32c   :  { %v3083_v14 = vsub.f32 %v9664_v63, %v3051_v34  ;;  %v3275_v2 = vsub.f32 %v9665_v12, %v3051_v34  ;;  %v3467_v37 = vsub.f32 %v9666_v62, %v3051_v34  ;;  %v8438_v5 = vpop.eup %5710  ;;  %v3799_v56 = vadd.f32 %v3767_v46, %v3607_v41  ;;  %v9669_v58 = vld [vmem:[#allocation82_spill] sm:$0xff]  ;;  %v9672_v12 = vld [vmem:[#allocation136_spill] sm:$0xff] }
 0x32d   :  { %v3659_v4 = vsub.f32 %v3019_v20, %v3051_v34  ;;  %v3608_v44 = vadd.f32 %v3576_v21, %v3416_v48  ;;  %v3385_v15 = vmul.f32 %v9668_v27, %v9667_v10  ;;  %v8442_v61 = vpop.eup %5712  ;;  %v3577_v26 = vmul.f32 %v7966_v9, %v9669_v58  ;;  %v9670_v41 = vld [vmem:[#allocation114_spill] sm:$0xff] }
 0x32e   :  { %v3145_v18 = vmul.f32 1.442695, %v3083_v14  ;;  %v3337_v33 = vmul.f32 1.442695, %v3275_v2  ;;  %v3529_v49 = vmul.f32 1.442695, %v3467_v37  ;;  %v8446_v13 = vpop.eup %5714  ;;  %v3369_v63 = vadd.f32 %v8442_v61, %v8438_v5 }
 0x32f   :  { %v3863_v46 = vmul.f32 %v8007_v23, %v3799_v56  ;;  %v3721_v20 = vmul.f32 1.442695, %v3659_v4  ;;  %v3800_v21 = vadd.f32 %v3768_v8, %v3608_v44  ;;  %v8451_v34 = vpop.eup %5716  ;;  %v3417_v27 = vadd.f32 %v3385_v15, %v3193_v51  ;;  %v9671_v14 = vld [vmem:[#allocation20_spill] sm:$0xff]  ;;  %v9675_v56 = vld [vmem:[#allocation171_spill] sm:$0xff]  ;;  %v9678_v10 = vld [vmem:[#allocation194_spill] sm:$0xff] }
 0x330   :  { %5730 = vpow2.f32 %v3145_v18  ;;  %v3769_v48 = vmul.f32 %v7978_v42, %v9670_v41  ;;  %v3194_v2 = vmul.f32 %v9672_v12, %v9671_v14  ;;  %v8457_v9 = vpop.eup %5718  ;;  %v3561_v62 = vadd.f32 %v8446_v13, %v3369_v63  ;;  %v9673_v23 = vld [vmem:[#allocation196_spill] sm:$0xff]  ;;  %v9680_v58 = vld [vmem:[#allocation6_spill] sm:$0xff] }
 0x331   :  { %5285 = vmatprep.mubr.msk.f32.mxu1 %vm1731_vm2, %v3863_v46  ;;  %5732 = vpow2.f32 %v3337_v33  ;;  %v3864_v37 = vmul.f32 %v9673_v23, %v3800_v21  ;;  %v9674_v8 = vld [vmem:[#allocation52_spill] sm:$0xff]  ;;  %v8464_v44 = vpop.eup %5720  ;;  %v3609_v51 = vadd.f32 %v3577_v26, %v3417_v27  ;;  %v9682_v46 = vld [vmem:[#allocation17_spill] sm:$0xff]  ;;  %v9683_v21 = vld [vmem:[#allocation174_spill] sm:$0xff] }
 0x332   :  { %v3386_v4 = vmul.f32 %v9675_v56, %v9674_v8  ;;  %9676 = vst [vmem:[#allocation157_spill] sm:$0xff] %v8464_v44  ;;  %5734 = vpow2.f32 %v3529_v49  ;;  %v9677_v42 = vld [vmem:[#allocation84_spill] sm:$0xff]  ;;  %v8470_v14 = vpop.eup %5722  ;;  %v3753_v63 = vadd.f32 %v8451_v34, %v3561_v62  ;;  %v3195_v12 = vmul.f32 %v9683_v21, %v9682_v46  ;;  %v9684_v27 = vld [vmem:[#allocation49_spill] sm:$0xff]  ;;  %v9685_v8 = vld [vmem:[#allocation199_spill] sm:$0xff] }
 0x333   :  { %v3578_v15 = vmul.f32 %v9678_v10, %v9677_v42  ;;  %v9679_v18 = vld [vmem:[#allocation116_spill] sm:$0xff]  ;;  %9681 = vst [vmem:[#allocation141_spill] sm:$0xff] %v8470_v14  ;;  %5736 = vpow2.f32 %v3721_v20  ;;  %5286 = vmatmul.mubr.msk.f32.gmra.mrb[138].mxu1 %vm1731_vm2, %v3864_v37  ;;  %v8476_v23 = vpop.eup %5724  ;;  %v3372_v49 = vadd.f32 %v8470_v14, %v8464_v44  ;;  %v3801_v26 = vadd.f32 %v3769_v48, %v3609_v51  ;;  %v9686_v42 = vld [vmem:[#allocation81_spill] sm:$0xff]  ;;  %v9692_v14 = vld [vmem:[#allocation83_spill] sm:$0xff] }
 0x334   :  { %v3770_v41 = vmul.f32 %v9680_v58, %v9679_v18  ;;  %v3418_v33 = vadd.f32 %v3386_v4, %v3194_v2  ;;  %v3387_v56 = vmul.f32 %v9685_v8, %v9684_v27  ;;  %v3579_v10 = vmul.f32 %v8039_v31, %v9686_v42  ;;  %v8484_v62 = vpop.eup %5726  ;;  %v9687_v2 = vld [vmem:[#allocation113_spill] sm:$0xff]  ;;  %v9688_v4 = vld [vmem:[#allocation19_spill] sm:$0xff]  ;;  %v9689_v18 = vld [vmem:[#allocation198_spill] sm:$0xff] }
 0x335   :  { %5738 = vrcp.f32 %v3753_v63  ;;  %v3771_v37 = vmul.f32 %v8052_v55, %v9687_v2  ;;  %v3196_v58 = vmul.f32 %v9689_v18, %v9688_v4  ;;  %v8490_v46 = vpop.eup %5728  ;;  %v3564_v48 = vadd.f32 %v8476_v23, %v3372_v49  ;;  %v9690_v27 = vld [vmem:[#allocation51_spill] sm:$0xff]  ;;  %v9691_v8 = vld [vmem:[#allocation137_spill] sm:$0xff]  ;;  %v9696_v2 = vld [vmem:[#allocation22_spill] sm:$0xff] }
 0x336   :  { %v3610_v20 = vadd.f32 %v3578_v15, %v3418_v33  ;;  %v3865_v51 = vmul.f32 %v8078_v60, %v3801_v26  ;;  %v3419_v21 = vadd.f32 %v3387_v56, %v3195_v12  ;;  %v3388_v31 = vmul.f32 %v9691_v8, %v9690_v27  ;;  %v9693_v63 = vld [vmem:[#allocation173_spill] sm:$0xff]  ;;  %v9694_v33 = vld [vmem:[#allocation115_spill] sm:$0xff]  ;;  %v9697_v12 = vld [vmem:[#allocation54_spill] sm:$0xff] }
 0x337   :  { %v3580_v15 = vmul.f32 %v9693_v63, %v9692_v14  ;;  %v9695_v44 = vld [vmem:[#allocation197_spill] sm:$0xff]  ;;  %v3197_v4 = vmul.f32 %v8091_v54, %v9696_v2  ;;  %v3756_v18 = vadd.f32 %v8484_v62, %v3564_v48  ;;  %v3389_v26 = vmul.f32 %v8098_v3, %v9697_v12  ;;  %v9698_v56 = vld [vmem:[#allocation38_spill] sm:$0xff]  ;;  %v9701_v8 = vld [vmem:[#allocation24_spill] sm:$0xff] }
 0x338   :  { %v3802_v42 = vadd.f32 %v3770_v41, %v3610_v20  ;;  %v3772_v55 = vmul.f32 %v9695_v44, %v9694_v33  ;;  %5288 = vmatprep.mubr.msk.f32.mxu1 %vm1731_vm2, %v3865_v51  ;;  %v3611_v49 = vadd.f32 %v3579_v10, %v3419_v21  ;;  %v3420_v60 = vadd.f32 %v3388_v31, %v3196_v58  ;;  %v9699_v20 = vld [vmem:[#allocation86_spill] sm:$0xff]  ;;  %v9702_v3 = vld [vmem:[#allocation56_spill] sm:$0xff] }
 0x339   :  { %v3581_v14 = vmul.f32 %v8106_v19, %v9699_v20  ;;  %v9700_v27 = vld [vmem:[#allocation118_spill] sm:$0xff]  ;;  %v3198_v54 = vmul.f32 %v8057_v1, %v9701_v8  ;;  %5740 = vrcp.f32 %v3756_v18  ;;  %v3421_v58 = vadd.f32 %v3389_v26, %v3197_v4  ;;  %v9703_v19 = vld [vmem:[#allocation88_spill] sm:$0xff]  ;;  %v9707_v1 = vld [vmem:[#allocation21_spill] sm:$0xff] }
 0x33a   :  { %v3866_v41 = vmul.f32 %v9698_v56, %v3802_v42  ;;  %v3773_v44 = vmul.f32 %v8121_v17, %v9700_v27  ;;  %v8513_v63 = vpop.eup %5730  ;;  %v3803_v48 = vadd.f32 %v3771_v37, %v3611_v49  ;;  %v3612_v10 = vadd.f32 %v3580_v15, %v3420_v60  ;;  %v9704_v31 = vld [vmem:[#allocation70_spill] sm:$0xff]  ;;  %v9705_v17 = vld [vmem:[#allocation120_spill] sm:$0xff]  ;;  %v9708_v26 = vld [vmem:[#allocation53_spill] sm:$0xff] }
 0x33b   :  { %v8515_v51 = vpop.eup %5732  ;;  %v3390_v21 = vmul.f32 %v8062_v52, %v9702_v3  ;;  %v3582_v42 = vmul.f32 %v9704_v31, %v9703_v19  ;;  %v9706_v33 = vld [vmem:[#allocation102_spill] sm:$0xff]  ;;  %v3199_v12 = vmul.f32 %v8155_v57, %v9707_v1  ;;  %v3613_v49 = vadd.f32 %v3581_v14, %v3421_v58  ;;  %v9710_v20 = vld [vmem:[#allocation153_spill] sm:$0xff]  ;;  %v9714_v14 = vld [vmem:[#allocation23_spill] sm:$0xff] }
 0x33c   :  { %5289 = vmatmul.mubr.msk.f32.gmra.mrb[140].mxu1 %vm1731_vm2, %v3866_v41  ;;  %v3774_v2 = vmul.f32 %v9706_v33, %v9705_v17  ;;  %v8526_v18 = vpop.eup %5734  ;;  %v3371_v37 = vadd.f32 %v8515_v51, %v8513_v63  ;;  %v3867_v15 = vmul.f32 %v8147_v30, %v3803_v48  ;;  %v3804_v4 = vadd.f32 %v3772_v55, %v3612_v10  ;;  %v9709_v41 = vld [vmem:[#allocation85_spill] sm:$0xff]  ;;  %v9712_v57 = vld [vmem:[#allocation154_spill] sm:$0xff]  ;;  %v9715_v48 = vld [vmem:[#allocation152_spill] sm:$0xff] }
 0x33d   :  { %v8531_v60 = vpop.eup %5736  ;;  %v3422_v52 = vadd.f32 %v3390_v21, %v3198_v54  ;;  %v3391_v56 = vmul.f32 %v8160_v0, %v9708_v26  ;;  %v3583_v27 = vmul.f32 %v9710_v20, %v9709_v41  ;;  %v9711_v8 = vld [vmem:[#allocation117_spill] sm:$0xff]  ;;  %v3805_v55 = vadd.f32 %v3773_v44, %v3613_v49  ;;  %v9716_v21 = vld [vmem:[#allocation55_spill] sm:$0xff]  ;;  %v9719_v26 = vld [vmem:[#allocation204_spill] sm:$0xff] }
 0x33e   :  { %v3775_v3 = vmul.f32 %v9712_v57, %v9711_v8  ;;  %v3563_v19 = vadd.f32 %v8526_v18, %v3371_v37  ;;  %5291 = vmatprep.mubr.msk.f32.mxu1 %vm1731_vm2, %v3867_v15  ;;  %v9713_v31 = vld [vmem:[#allocation5_spill] sm:$0xff]  ;;  %v3200_v10 = vmul.f32 %v9715_v48, %v9714_v14  ;;  %v9718_v1 = vld [vmem:[#allocation87_spill] sm:$0xff]  ;;  %v9723_v8 = vld [vmem:[#allocation26_spill] sm:$0xff] }
 0x33f   :  { %v3868_v30 = vmul.f32 %v9713_v31, %v3804_v4  ;;  %v8544_v54 = vpop.eup %5738  ;;  %v3614_v58 = vadd.f32 %v3582_v42, %v3422_v52  ;;  %v3423_v0 = vadd.f32 %v3391_v56, %v3199_v12  ;;  %v9717_v17 = vld [vmem:[#allocation201_spill] sm:$0xff]  ;;  %v3584_v41 = vmul.f32 %v9719_v26, %v9718_v1  ;;  %v9720_v15 = vld [vmem:[#allocation139_spill] sm:$0xff]  ;;  %v9724_v56 = vld [vmem:[#allocation58_spill] sm:$0xff] }
 0x340   :  { %v3392_v33 = vmul.f32 %v9717_v17, %v9716_v21  ;;  %v3755_v37 = vadd.f32 %v8531_v60, %v3563_v19  ;;  %v3869_v4 = vmul.f32 %v9720_v15, %v3805_v55  ;;  %v9721_v44 = vld [vmem:[#allocation119_spill] sm:$0xff]  ;;  %v9722_v49 = vld [vmem:[#allocation37_spill] sm:$0xff]  ;;  %v3201_v57 = vmul.f32 %v8218_v45, %v9723_v8  ;;  %v9725_v19 = vld [vmem:[#allocation90_spill] sm:$0xff] }
 0x341   :  { %5292 = vmatmul.mubr.msk.f32.gmra.mrb[142].mxu1 %vm1731_vm2, %v3868_v30  ;;  %v3776_v20 = vmul.f32 %v9722_v49, %v9721_v44  ;;  %v3806_v42 = vadd.f32 %v3774_v2, %v3614_v58  ;;  %v3615_v12 = vadd.f32 %v3583_v27, %v3423_v0  ;;  %v3393_v31 = vmul.f32 %v8222_v35, %v9724_v56  ;;  %v9726_v14 = vld [vmem:[#allocation122_spill] sm:$0xff]  ;;  %v9727_v48 = vld [vmem:[#allocation28_spill] sm:$0xff]  ;;  %v9729_v1 = vld [vmem:[#allocation69_spill] sm:$0xff] }
 0x342   :  { %v3424_v52 = vadd.f32 %v3392_v33, %v3200_v10  ;;  %5742 = vrcp.f32 %v3755_v37  ;;  %5294 = vmatprep.mubr.msk.f32.mxu1 %vm1731_vm2, %v3869_v4  ;;  %v3585_v30 = vmul.f32 %v8227_v25, %v9725_v19  ;;  %v3777_v55 = vmul.f32 %v8235_v53, %v9726_v14  ;;  %v9728_v21 = vld [vmem:[#allocation138_spill] sm:$0xff]  ;;  %v9730_v35 = vld [vmem:[#allocation60_spill] sm:$0xff]  ;;  %v9731_v0 = vld [vmem:[#allocation175_spill] sm:$0xff] }
 0x343   :  { %v3202_v17 = vmul.f32 %v9728_v21, %v9727_v48  ;;  %v3870_v45 = vmul.f32 %v9729_v1, %v3806_v42  ;;  %v3807_v2 = vadd.f32 %v3775_v3, %v3615_v12  ;;  %v3425_v10 = vadd.f32 %v3393_v31, %v3201_v57  ;;  %v8567_v58 = vpop.eup %5740  ;;  %v9732_v26 = vld [vmem:[#allocation92_spill] sm:$0xff]  ;;  %v9735_v53 = vld [vmem:[#allocation25_spill] sm:$0xff]  ;;  %v9740_v19 = vld [vmem:[#allocation202_spill] sm:$0xff] }
 0x344   :  { %v3616_v27 = vadd.f32 %v3584_v41, %v3424_v52  ;;  %v3394_v33 = vmul.f32 %v9731_v0, %v9730_v35  ;;  %v9733_v37 = vld [vmem:[#allocation200_spill] sm:$0xff]  ;;  %v3203_v44 = vmul.f32 %v8269_v38, %v9735_v53  ;;  %v9736_v8 = vld [vmem:[#allocation57_spill] sm:$0xff]  ;;  %v9749_v0 = vld [vmem:[#allocation71_spill] sm:$0xff] }
 0x345   :  { %v3586_v15 = vmul.f32 %v9733_v37, %v9732_v26  ;;  %v9734_v25 = vld [vmem:[#allocation124_spill] sm:$0xff]  ;;  %5295 = vmatmul.mubr.msk.f32.gmra.mrb[144].mxu1 %vm1731_vm2, %v3870_v45  ;;  %v3871_v3 = vmul.f32 %v8258_v7, %v3807_v2  ;;  %v3617_v49 = vadd.f32 %v3585_v30, %v3425_v10  ;;  %v3395_v57 = vmul.f32 %v8273_v43, %v9736_v8  ;;  %v9737_v12 = vld [vmem:[#allocation89_spill] sm:$0xff]  ;;  %v9742_v30 = vld [vmem:[#allocation59_spill] sm:$0xff] }
 0x346   :  { %v3778_v4 = vmul.f32 %v8211_v11, %v9734_v25  ;;  %v3808_v41 = vadd.f32 %v3776_v20, %v3616_v27  ;;  %v3426_v42 = vadd.f32 %v3394_v33, %v3202_v17  ;;  %v3587_v52 = vmul.f32 %v8276_v40, %v9737_v12  ;;  %v9738_v56 = vld [vmem:[#allocation121_spill] sm:$0xff]  ;;  %v9739_v11 = vld [vmem:[#allocation27_spill] sm:$0xff]  ;;  %v9741_v38 = vld [vmem:[#allocation176_spill] sm:$0xff] }
 0x347   :  { %v3779_v31 = vmul.f32 %v8286_v39, %v9738_v56  ;;  %v3204_v14 = vmul.f32 %v9740_v19, %v9739_v11  ;;  %5297 = vmatprep.mubr.msk.f32.mxu1 %vm1731_vm2, %v3871_v3  ;;  %v3809_v7 = vadd.f32 %v3777_v55, %v3617_v49  ;;  %v3427_v20 = vadd.f32 %v3395_v57, %v3203_v44  ;;  %v9743_v21 = vld [vmem:[#allocation101_spill] sm:$0xff]  ;;  %v9744_v17 = vld [vmem:[#allocation91_spill] sm:$0xff]  ;;  %v9748_v39 = vld [vmem:[#allocation30_spill] sm:$0xff] }
 0x348   :  { %v3872_v48 = vmul.f32 %v9741_v38, %v3808_v41  ;;  %v3396_v1 = vmul.f32 %v9743_v21, %v9742_v30  ;;  %v3618_v43 = vadd.f32 %v3586_v15, %v3426_v42  ;;  %v9745_v45 = vld [vmem:[#allocation187_spill] sm:$0xff]  ;;  %v3205_v35 = vmul.f32 %v8317_v36, %v9748_v39  ;;  %v9750_v37 = vld [vmem:[#allocation62_spill] sm:$0xff]  ;;  %v9753_v49 = vld [vmem:[#allocation32_spill] sm:$0xff] }
 0x349   :  { %v3588_v2 = vmul.f32 %v9745_v45, %v9744_v17  ;;  %v9746_v40 = vld [vmem:[#allocation123_spill] sm:$0xff]  ;;  %v3873_v33 = vmul.f32 %v9749_v0, %v3809_v7  ;;  %v3619_v26 = vadd.f32 %v3587_v52, %v3427_v20  ;;  %v3397_v25 = vmul.f32 %v8320_v16, %v9750_v37  ;;  %v9751_v15 = vld [vmem:[#allocation94_spill] sm:$0xff]  ;;  %v9755_v52 = vld [vmem:[#allocation64_spill] sm:$0xff] }
 0x34a   :  { %v9747_v27 = vld [vmem:[#allocation7_spill] sm:$0xff]  ;;  %5298 = vmatmul.mubr.msk.f32.gmra.mrb[146].mxu1 %vm1731_vm2, %v3872_v48  ;;  %v3428_v55 = vadd.f32 %v3396_v1, %v3204_v14  ;;  %v3810_v53 = vadd.f32 %v3778_v4, %v3618_v43  ;;  %v3589_v44 = vmul.f32 %v8327_v24, %v9751_v15  ;;  %v9752_v3 = vld [vmem:[#allocation126_spill] sm:$0xff]  ;;  %v9757_v16 = vld [vmem:[#allocation149_spill] sm:$0xff] }
 0x34b   :  { %v3780_v10 = vmul.f32 %v9747_v27, %v9746_v40  ;;  %v3781_v41 = vmul.f32 %v8337_v32, %v9752_v3  ;;  %v9754_v8 = vld [vmem:[#allocation39_spill] sm:$0xff]  ;;  %5300 = vmatprep.mubr.msk.f32.mxu1 %vm1731_vm2, %v3873_v33  ;;  %v3811_v36 = vadd.f32 %v3779_v31, %v3619_v26  ;;  %v3429_v12 = vadd.f32 %v3397_v25, %v3205_v35  ;;  %v9756_v56 = vld [vmem:[#allocation150_spill] sm:$0xff]  ;;  %v9758_v14 = vld [vmem:[#allocation96_spill] sm:$0xff] }
 0x34c   :  { %v3206_v57 = vmul.f32 %v9754_v8, %v9753_v49  ;;  %v3620_v42 = vadd.f32 %v3588_v2, %v3428_v55  ;;  %v3398_v11 = vmul.f32 %v9756_v56, %v9755_v52  ;;  %v8610_v19 = vpop.eup %5742  ;;  %v3874_v4 = vmul.f32 %v9757_v16, %v3810_v53  ;;  %v9759_v38 = vld [vmem:[#allocation129_spill] sm:$0xff]  ;;  %v9764_v2 = vld [vmem:[#allocation203_spill] sm:$0xff]  ;;  %v9771_v37 = vld [vmem:[#allocation186_spill] sm:$0xff] }
 0x34d   :  { %v3590_v24 = vmul.f32 %v8304_v50, %v9758_v14  ;;  %v3782_v32 = vmul.f32 %v8314_v28, %v9759_v38  ;;  %v9760_v48 = vld [vmem:[#allocation29_spill] sm:$0xff]  ;;  %v3875_v31 = vmul.f32 %v8358_v29, %v3811_v36  ;;  %v3621_v30 = vadd.f32 %v3589_v44, %v3429_v12  ;;  %v9765_v28 = vld [vmem:[#allocation31_spill] sm:$0xff]  ;;  %v9773_v53 = vld [vmem:[#allocation140_spill] sm:$0xff] }
 0x34e   :  { %v3207_v7 = vmul.f32 %v8372_v59, %v9760_v48  ;;  %v3812_v20 = vadd.f32 %v3780_v10, %v3620_v42  ;;  %v3430_v21 = vadd.f32 %v3398_v11, %v3206_v57  ;;  %5301 = vmatmul.mubr.msk.f32.gmra.mrb[148].mxu1 %vm1731_vm2, %v3874_v4  ;;  %v9761_v1 = vld [vmem:[#allocation61_spill] sm:$0xff]  ;;  %v9767_v29 = vld [vmem:[#allocation151_spill] sm:$0xff]  ;;  %v9774_v44 = vld [vmem:[#allocation34_spill] sm:$0xff] }
 0x34f   :  { %v3399_v43 = vmul.f32 %v8378_v6, %v9761_v1  ;;  %v9762_v17 = vld [vmem:[#allocation93_spill] sm:$0xff]  ;;  %5303 = vmatprep.mubr.msk.f32.mxu1 %vm1731_vm2, %v3875_v31  ;;  %v3813_v10 = vadd.f32 %v3781_v41, %v3621_v30  ;;  %v9768_v0 = vld [vmem:[#allocation63_spill] sm:$0xff]  ;;  %v3209_v3 = vmul.f32 %v8438_v5, %v9774_v44  ;;  %v9775_v49 = vld [vmem:[#allocation156_spill] sm:$0xff] }
 0x350   :  { %v3591_v45 = vmul.f32 %v8386_v22, %v9762_v17  ;;  %v9763_v50 = vld [vmem:[#allocation125_spill] sm:$0xff]  ;;  %v3876_v59 = vmul.f32 %v9767_v29, %v3812_v20  ;;  %v3622_v35 = vadd.f32 %v3590_v24, %v3430_v21  ;;  %v9769_v33 = vld [vmem:[#allocation103_spill] sm:$0xff]  ;;  %v9772_v22 = vld [vmem:[#allocation128_spill] sm:$0xff] }
 0x351   :  { %v3783_v40 = vmul.f32 %v9764_v2, %v9763_v50  ;;  %v9766_v27 = vld [vmem:[#allocation205_spill] sm:$0xff]  ;;  %v3400_v26 = vmul.f32 %v9769_v33, %v9768_v0  ;;  %v3431_v55 = vadd.f32 %v3399_v43, %v3207_v7  ;;  %v9770_v6 = vld [vmem:[#allocation95_spill] sm:$0xff]  ;;  %v3784_v15 = vmul.f32 %v9773_v53, %v9772_v22  ;;  %v9776_v42 = vld [vmem:[#allocation66_spill] sm:$0xff] }
 0x352   :  { %v3208_v39 = vmul.f32 %v9766_v27, %v9765_v28  ;;  %v3592_v25 = vmul.f32 %v9771_v37, %v9770_v6  ;;  %v3877_v8 = vmul.f32 %v9775_v49, %v3813_v10  ;;  %v3814_v57 = vadd.f32 %v3782_v32, %v3622_v35  ;;  %5304 = vmatmul.mubr.msk.f32.gmra.mrb[150].mxu1 %vm1731_vm2, %v3876_v59  ;;  %v9777_v52 = vld [vmem:[#allocation98_spill] sm:$0xff]  ;;  %v9778_v11 = vld [vmem:[#allocation132_spill] sm:$0xff]  ;;  %v9781_v5 = vld [vmem:[#allocation177_spill] sm:$0xff] }
 0x353   :  { %v3401_v41 = vmul.f32 %v8442_v61, %v9776_v42  ;;  %v3623_v12 = vadd.f32 %v3591_v45, %v3431_v55  ;;  %v3593_v56 = vmul.f32 %v8446_v13, %v9777_v52  ;;  %v3785_v16 = vmul.f32 %v8451_v34, %v9778_v11  ;;  %v9779_v4 = vld [vmem:[#allocation36_spill] sm:$0xff]  ;;  %v9783_v61 = vld [vmem:[#allocation10_spill] sm:$0xff]  ;;  %v9786_v13 = vld [vmem:[#allocation135_spill] sm:$0xff] }
 0x354   :  { %v3432_v36 = vadd.f32 %v3400_v26, %v3208_v39  ;;  %v9780_v14 = vld [vmem:[#allocation208_spill] sm:$0xff]  ;;  %5306 = vmatprep.mubr.msk.f32.mxu1 %vm1731_vm2, %v3877_v8  ;;  %v3878_v38 = vmul.f32 %v9781_v5, %v3814_v57  ;;  %v9785_v21 = vld [vmem:[#allocation158_spill] sm:$0xff]  ;;  %v3786_v43 = vmul.f32 %v8416_v47, %v9786_v13  ;;  %v9787_v34 = vld [vmem:[#allocation33_spill] sm:$0xff] }
 0x355   :  { %v3210_v24 = vmul.f32 %v9780_v14, %v9779_v4  ;;  %v3433_v48 = vadd.f32 %v3401_v41, %v3209_v3  ;;  %v9782_v7 = vld [vmem:[#allocation68_spill] sm:$0xff]  ;;  %v3815_v20 = vadd.f32 %v3783_v40, %v3623_v12  ;;  %v3211_v17 = vmul.f32 %v8513_v63, %v9787_v34  ;;  %v9788_v28 = vld [vmem:[#allocation65_spill] sm:$0xff]  ;;  %v9790_v59 = vld [vmem:[#allocation131_spill] sm:$0xff] }
 0x356   :  { %v3624_v32 = vadd.f32 %v3592_v25, %v3432_v36  ;;  %v3402_v31 = vmul.f32 %v9783_v61, %v9782_v7  ;;  %v9784_v30 = vld [vmem:[#allocation100_spill] sm:$0xff]  ;;  %v3403_v27 = vmul.f32 %v8515_v51, %v9788_v28  ;;  %5307 = vmatmul.mubr.msk.f32.gmra.mrb[152].mxu1 %vm1731_vm2, %v3878_v38  ;;  %v9789_v40 = vld [vmem:[#allocation97_spill] sm:$0xff]  ;;  %v3787_v10 = vmul.f32 %v8531_v60, %v9790_v59  ;;  %v9791_v47 = vld [vmem:[#allocation35_spill] sm:$0xff] }
 0x357   :  { %v3594_v1 = vmul.f32 %v9785_v21, %v9784_v30  ;;  %v3625_v50 = vadd.f32 %v3593_v56, %v3433_v48  ;;  %v3879_v39 = vmul.f32 %v8457_v9, %v3815_v20  ;;  %v3595_v29 = vmul.f32 %v8526_v18, %v9789_v40  ;;  %v9792_v35 = vld [vmem:[#allocation157_spill] sm:$0xff]  ;;  %v9793_v63 = vld [vmem:[#allocation42_spill] sm:$0xff]  ;;  %v9794_v51 = vld [vmem:[#allocation67_spill] sm:$0xff] }
 0x358   :  { %v3816_v45 = vadd.f32 %v3784_v15, %v3624_v32  ;;  %v3434_v2 = vadd.f32 %v3402_v31, %v3210_v24  ;;  %v3212_v0 = vmul.f32 %v9792_v35, %v9791_v47  ;;  %v3435_v6 = vadd.f32 %v3403_v27, %v3211_v17  ;;  %v9795_v37 = vld [vmem:[#allocation141_spill] sm:$0xff]  ;;  %v9796_v9 = vld [vmem:[#allocation99_spill] sm:$0xff]  ;;  %v9797_v18 = vld [vmem:[#allocation134_spill] sm:$0xff] }
 0x359   :  { %v3817_v26 = vadd.f32 %v3785_v16, %v3625_v50  ;;  %5309 = vmatprep.mubr.msk.f32.mxu1 %vm1731_vm2, %v3879_v39  ;;  %v3404_v25 = vmul.f32 %v9795_v37, %v9794_v51  ;;  %v3596_v22 = vmul.f32 %v8476_v23, %v9796_v9  ;;  %v3788_v53 = vmul.f32 %v8484_v62, %v9797_v18 }
 0x35a   :  { %v3880_v33 = vmul.f32 %v9793_v63, %v3816_v45  ;;  %v3626_v55 = vadd.f32 %v3594_v1, %v3434_v2  ;;  %v3627_v44 = vadd.f32 %v3595_v29, %v3435_v6 }
 0x35b   :  { %v3881_v60 = vmul.f32 %v8544_v54, %v3817_v26  ;;  %v3436_v3 = vadd.f32 %v3404_v25, %v3212_v0  ;;  %v8689_v54 = vld [vmem:[%s8858_s7] ss:$0 sm:$0xff] }
 0x35c   :  { %v3818_v15 = vadd.f32 %v3786_v43, %v3626_v55  ;;  %5310 = vmatmul.mubr.msk.f32.gmra.mrb[154].mxu1 %vm1731_vm2, %v3880_v33  ;;  %v3819_v8 = vadd.f32 %v3787_v10, %v3627_v44 }
 0x35d   :  { %5312 = vmatprep.mubr.msk.f32.mxu1 %vm1731_vm2, %v3881_v60  ;;  %v3628_v57 = vadd.f32 %v3596_v22, %v3436_v3 }
 0x35e   :  { %v3882_v49 = vmul.f32 %v8490_v46, %v3818_v15  ;;  %v3883_v36 = vmul.f32 %v8610_v19, %v3819_v8 }
 0x35f   :  { %v3820_v23 = vadd.f32 %v3788_v53, %v3628_v57 }
 0x360   :  { %5313 = vmatmul.mubr.msk.f32.gmra.mrb[156].mxu1 %vm1731_vm2, %v3882_v49 }
 0x361   :  { %5315 = vmatprep.mubr.msk.f32.mxu1 %vm1731_vm2, %v3883_v36  ;;  %v3884_v62 = vmul.f32 %v8567_v58, %v3820_v23 }
 0x364   :  { %5316 = vmatmul.mubr.msk.f32.gmra.mrb[158].mxu1 %vm1731_vm2, %v3884_v62 }
 0x3bc   :  { %v5272_v42 = vpop.f32.mrb[128].mxu1 }
 0x3bd   :  { %v4068_v46 = vadd.f32 %v5272_v42, %v8689_v54  ;;  %v4062_v41 = vpop.f32.mrb[129].mxu1 }
 0x3be   :  { %v4063_v19 = vadd.f32 %v8689_v54, %v4062_v41 }
 0x3bf   :  { %4222 = vst.msk [vmem:[%s8859_s8 + $0x8] sm:$0xff] %vm79_vm1, %v4068_v46 }
 0x3c0   :  { %4221 = vst.msk [vmem:[%s8859_s8] sm:$0xff] %vm79_vm1, %v4063_v19 }
 0x3cc   :  { %v5275_v58 = vpop.f32.mrb[130].mxu1 }
 0x3cd   :  { %v4078_v12 = vadd.f32 %v5275_v58, %v8689_v54  ;;  %v4072_v52 = vpop.f32.mrb[131].mxu1 }
 0x3ce   :  { %v4073_v56 = vadd.f32 %v8689_v54, %v4072_v52 }
 0x3cf   :  { %4224 = vst.msk [vmem:[%s8859_s8 + $0x18] sm:$0xff] %vm79_vm1, %v4078_v12 }
 0x3d0   :  { %4223 = vst.msk [vmem:[%s8859_s8 + $0x10] sm:$0xff] %vm79_vm1, %v4073_v56 }
 0x3dd   :  { %v5278_v11 = vpop.f32.mrb[132].mxu1 }
 0x3de   :  { %v4088_v16 = vadd.f32 %v5278_v11, %v8689_v54  ;;  %v4082_v4 = vpop.f32.mrb[133].mxu1 }
 0x3df   :  { %v4083_v14 = vadd.f32 %v8689_v54, %v4082_v4 }
 0x3e0   :  { %4226 = vst.msk [vmem:[%s8859_s8 + $0x28] sm:$0xff] %vm79_vm1, %v4088_v16 }
 0x3e1   :  { %4225 = vst.msk [vmem:[%s8859_s8 + $0x20] sm:$0xff] %vm79_vm1, %v4083_v14 }
 0x3eb   :  { %v5281_v24 = vpop.f32.mrb[134].mxu1 }
 0x3ec   :  { %v4098_v5 = vadd.f32 %v5281_v24, %v8689_v54  ;;  %v4092_v38 = vpop.f32.mrb[135].mxu1 }
 0x3ed   :  { %v4093_v32 = vadd.f32 %v8689_v54, %v4092_v38 }
 0x3ee   :  { %4228 = vst.msk [vmem:[%s8859_s8 + $0x38] sm:$0xff] %vm79_vm1, %v4098_v5 }
 0x3ef   :  { %4227 = vst.msk [vmem:[%s8859_s8 + $0x30] sm:$0xff] %vm79_vm1, %v4093_v32 }
 0x3f8   :  { %v5284_v48 = vpop.f32.mrb[136].mxu1 }
 0x3f9   :  { %v4108_v7 = vadd.f32 %v5284_v48, %v8689_v54  ;;  %v4102_v61 = vpop.f32.mrb[137].mxu1 }
 0x3fa   :  { %v4103_v31 = vadd.f32 %v8689_v54, %v4102_v61 }
 0x3fb   :  { %4230 = vst.msk [vmem:[%s8859_s8 + $0x48] sm:$0xff] %vm79_vm1, %v4108_v7 }
 0x3fc   :  { %4229 = vst.msk [vmem:[%s8859_s8 + $0x40] sm:$0xff] %vm79_vm1, %v4103_v31 }
 0x406   :  { %v5287_v20 = vpop.f32.mrb[138].mxu1 }
 0x407   :  { %v4118_v30 = vadd.f32 %v5287_v20, %v8689_v54  ;;  %v4112_v21 = vpop.f32.mrb[139].mxu1 }
 0x408   :  { %v4113_v1 = vadd.f32 %v8689_v54, %v4112_v21 }
 0x409   :  { %4232 = vst.msk [vmem:[%s8859_s8 + $0x58] sm:$0xff] %vm79_vm1, %v4118_v30 }
 0x40a   :  { %4231 = vst.msk [vmem:[%s8859_s8 + $0x50] sm:$0xff] %vm79_vm1, %v4113_v1 }
 0x40f   :  { %v5290_v13 = vpop.f32.mrb[140].mxu1 }
 0x410   :  { %v4128_v43 = vadd.f32 %v5290_v13, %v8689_v54  ;;  %v4122_v34 = vpop.f32.mrb[141].mxu1 }
 0x411   :  { %v4123_v17 = vadd.f32 %v8689_v54, %v4122_v34 }
 0x412   :  { %4234 = vst.msk [vmem:[%s8859_s8 + $0x68] sm:$0xff] %vm79_vm1, %v4128_v43 }
 0x413   :  { %4233 = vst.msk [vmem:[%s8859_s8 + $0x60] sm:$0xff] %vm79_vm1, %v4123_v17 }
 0x414   :  { %v5293_v45 = vpop.f32.mrb[142].mxu1 }
 0x415   :  { %v4138_v50 = vadd.f32 %v5293_v45, %v8689_v54  ;;  %v4132_v2 = vpop.f32.mrb[143].mxu1 }
 0x416   :  { %v4133_v28 = vadd.f32 %v8689_v54, %v4132_v2 }
 0x417   :  { %4236 = vst.msk [vmem:[%s8859_s8 + $0x78] sm:$0xff] %vm79_vm1, %v4138_v50 }
 0x418   :  { %4235 = vst.msk [vmem:[%s8859_s8 + $0x70] sm:$0xff] %vm79_vm1, %v4133_v28  ;;  %v5296_v27 = vpop.f32.mrb[144].mxu1 }
 0x419   :  { %v4148_v39 = vadd.f32 %v5296_v27, %v8689_v54  ;;  %v4142_v40 = vpop.f32.mrb[145].mxu1 }
 0x41a   :  { %v4143_v29 = vadd.f32 %v8689_v54, %v4142_v40 }
 0x41b   :  { %4238 = vst.msk [vmem:[%s8859_s8 + $0x88] sm:$0xff] %vm79_vm1, %v4148_v39 }
 0x41c   :  { %4237 = vst.msk [vmem:[%s8859_s8 + $0x80] sm:$0xff] %vm79_vm1, %v4143_v29 }
 0x41d   :  { %v5299_v59 = vpop.f32.mrb[146].mxu1 }
 0x41e   :  { %v4158_v10 = vadd.f32 %v5299_v59, %v8689_v54  ;;  %v4152_v47 = vpop.f32.mrb[147].mxu1 }
 0x41f   :  { %v4153_v35 = vadd.f32 %v8689_v54, %v4152_v47 }
 0x420   :  { %4240 = vst.msk [vmem:[%s8859_s8 + $0x98] sm:$0xff] %vm79_vm1, %v4158_v10 }
 0x421   :  { %4239 = vst.msk [vmem:[%s8859_s8 + $0x90] sm:$0xff] %vm79_vm1, %v4153_v35  ;;  %v5302_v0 = vpop.f32.mrb[148].mxu1 }
 0x422   :  { %v4168_v63 = vadd.f32 %v5302_v0, %v8689_v54  ;;  %v4162_v33 = vpop.f32.mrb[149].mxu1 }
 0x423   :  { %v4163_v26 = vadd.f32 %v8689_v54, %v4162_v33 }
 0x424   :  { %4242 = vst.msk [vmem:[%s8859_s8 + $0xa8] sm:$0xff] %vm79_vm1, %v4168_v63 }
 0x425   :  { %4241 = vst.msk [vmem:[%s8859_s8 + $0xa0] sm:$0xff] %vm79_vm1, %v4163_v26  ;;  %v5305_v55 = vpop.f32.mrb[150].mxu1 }
 0x426   :  { %v4178_v6 = vadd.f32 %v5305_v55, %v8689_v54  ;;  %v4172_v51 = vpop.f32.mrb[151].mxu1 }
 0x427   :  { %v4173_v37 = vadd.f32 %v8689_v54, %v4172_v51 }
 0x428   :  { %4244 = vst.msk [vmem:[%s8859_s8 + $0xb8] sm:$0xff] %vm79_vm1, %v4178_v6 }
 0x429   :  { %4243 = vst.msk [vmem:[%s8859_s8 + $0xb0] sm:$0xff] %vm79_vm1, %v4173_v37  ;;  %v5308_v25 = vpop.f32.mrb[152].mxu1 }
 0x42a   :  { %v4188_v9 = vadd.f32 %v5308_v25, %v8689_v54  ;;  %v4182_v22 = vpop.f32.mrb[153].mxu1 }
 0x42b   :  { %v4183_v18 = vadd.f32 %v8689_v54, %v4182_v22 }
 0x42c   :  { %4246 = vst.msk [vmem:[%s8859_s8 + $0xc8] sm:$0xff] %vm79_vm1, %v4188_v9 }
 0x42d   :  { %4245 = vst.msk [vmem:[%s8859_s8 + $0xc0] sm:$0xff] %vm79_vm1, %v4183_v18 }
 0x42f   :  { %v5311_v53 = vpop.f32.mrb[154].mxu1 }
 0x430   :  { %v4198_v60 = vadd.f32 %v5311_v53, %v8689_v54  ;;  %v4192_v15 = vpop.f32.mrb[155].mxu1 }
 0x431   :  { %v4193_v44 = vadd.f32 %v8689_v54, %v4192_v15 }
 0x432   :  { %4248 = vst.msk [vmem:[%s8859_s8 + $0xd8] sm:$0xff] %vm79_vm1, %v4198_v60 }
 0x433   :  { %4247 = vst.msk [vmem:[%s8859_s8 + $0xd0] sm:$0xff] %vm79_vm1, %v4193_v44  ;;  %v5314_v3 = vpop.f32.mrb[156].mxu1 }
 0x434   :  { %v4208_v49 = vadd.f32 %v5314_v3, %v8689_v54  ;;  %v4202_v8 = vpop.f32.mrb[157].mxu1 }
 0x435   :  { %v4203_v57 = vadd.f32 %v8689_v54, %v4202_v8 }
 0x436   :  { %4250 = vst.msk [vmem:[%s8859_s8 + $0xe8] sm:$0xff] %vm79_vm1, %v4208_v49 }
 0x437   :  { %4249 = vst.msk [vmem:[%s8859_s8 + $0xe0] sm:$0xff] %vm79_vm1, %v4203_v57  ;;  %v5317_v36 = vpop.f32.mrb[158].mxu1 }
 0x438   :  { %v4218_v23 = vadd.f32 %v5317_v36, %v8689_v54  ;;  %v4212_v62 = vpop.f32.mrb[159].mxu1 }
 0x439   :  { %v4213_v42 = vadd.f32 %v8689_v54, %v4212_v62 }
 0x43a   :  { %4252 = vst.msk [vmem:[%s8859_s8 + $0xf8] sm:$0xff] %vm79_vm1, %v4218_v23 }
 0x43b   :  { %4251 = vst.msk [vmem:[%s8859_s8 + $0xf0] sm:$0xff] %vm79_vm1, %v4213_v42 }
 0x43c   :  { %4257 = vsyncpa [#allocation3], 1 }

</bundles_post_ra>
